<compile_context>
chip_gen: v7x
topology: tpu7x:2x2x1
jax: 0.10.0
libtpu: 0.0.40
codegen_flags: <defaults>
</compile_context>

<pallas_src>
import jax
import jax.numpy as jnp
from jax import lax
from jax.experimental import pallas as pl
from jax.experimental.pallas import tpu as pltpu


H = 128          # hidden width fixed by the module (SAGEConv(..., 128))
NB = 128         # nodes per graph block (padded, lane aligned)


# --------------------------------- kernel -----------------------------------

def net_kernel(nvalid_ref,                    # SMEM [G] int32 (scalar prefetch)
               x_ref, adj_ref,                # per-graph blocks
               wconv_ref, vecs_ref, wlin_ref, # packed parameters
               out_ref):                      # [1,1] output block
    f32 = jnp.float32
    bf16 = jnp.bfloat16
    nb, fp = x_ref.shape

    g = pl.program_id(0)
    n0 = nvalid_ref[g]                                    # real node count

    idx_col = lax.broadcasted_iota(jnp.int32, (nb, 1), 0)
    idx_row = lax.broadcasted_iota(jnp.int32, (1, nb), 1)
    v_col = (idx_col < n0).astype(f32)                    # [nb,1] validity
    v_row = (idx_row < n0).astype(f32)                    # [1,nb]

    adj = adj_ref[...]                                    # [nb,nb] f32 (static)
    vecs = vecs_ref[...]                                  # [16,128] f32
    b1, b2, b3 = vecs[0:1, :], vecs[1:2, :], vecs[2:3, :]
    p1, p2, p3 = vecs[3:4, :], vecs[4:5, :], vecs[5:6, :]
    bl1, bl2, bl3 = vecs[6:7, :], vecs[7:8, :], vecs[8:9, :]

    # fused SAGE weights [W_l ; W_r], bf16, static row slices
    wc1 = wconv_ref[0:2 * fp, :]
    wc2 = wconv_ref[2 * fp:2 * fp + 2 * H, :]
    wc3 = wconv_ref[2 * fp + 2 * H:2 * fp + 4 * H, :]

    def sage_relu(feats, vr, w_cat, b):
        # induced subgraph: column-mask dropped/padding neighbors; degree on
        # the masked adjacency (mean aggregation, empty neighborhood -> 0).
        a_eff = adj * vr
        deg = jnp.sum(a_eff, axis=1, keepdims=True)
        a_norm = a_eff * pl.reciprocal(jnp.maximum(deg, 1.0), approx=True)
        agg = jnp.dot(a_norm.astype(bf16), feats.astype(bf16),
                      preferred_element_type=f32)
        # fused [agg | x] @ [W_l ; W_r]  (one K=2F matmul on the MXU)
        cat = jnp.concatenate([agg, feats], axis=1).astype(bf16)
        out = jnp.dot(cat, w_cat, preferred_element_type=f32) + b
        return jnp.maximum(out, 0.0)

    def topk_pool(feats, vc, vr, p_row):
        # score = <x, p> / ||p||  (kept in f32 so selections are stable)
        inv_pn = lax.rsqrt(jnp.sum(p_row * p_row, axis=1, keepdims=True))
        score_c = jnp.sum(feats * p_row, axis=1, keepdims=True) * inv_pn  # [nb,1]
        score_r = jnp.transpose(score_c)                                  # [1,nb]
        # node j (lane) ranks ahead of node i (sublane); index tie-break
        ahead = jnp.logical_or(
            score_r > score_c,
            jnp.logical_and(score_r == score_c, idx_row < idx_col),
        ).astype(f32)
        rank = jnp.sum(vr * ahead, axis=1, keepdims=True)                 # [nb,1]
        cnt = jnp.sum(vr, axis=1, keepdims=True)                          # [1,1]
        k = jnp.ceil(0.5 * cnt)
        keep_c = vc * (rank < k).astype(f32)
        keep_r = jnp.transpose(keep_c)
        new_cnt = jnp.sum(keep_r, axis=1, keepdims=True)
        feats_new = feats * jnp.tanh(score_c) * keep_c
        return feats_new, keep_c, keep_r, new_cnt

    def readout(feats, vc, vr, cnt):
        # global max pool (masked) + global mean pool (one small MXU matmul)
        gmp = jnp.max(jnp.where(vc > 0.5, feats, -1e30), axis=0, keepdims=True)
        gmp = jnp.where(cnt > 0.5, gmp, 0.0)       # guard empty-graph sentinel
        gap = (jnp.dot(vr, feats, preferred_element_type=f32)
               * pl.reciprocal(jnp.maximum(cnt, 1.0), approx=True))
        return jnp.concatenate([gmp, gap], axis=1)                        # [1,2H]

    # --- block 1 ---
    feats = sage_relu(x_ref[...], v_row, wc1, b1)
    feats, v_col, v_row, cnt = topk_pool(feats, v_col, v_row, p1)
    x1 = readout(feats, v_col, v_row, cnt)
    # --- block 2 ---
    feats = sage_relu(feats, v_row, wc2, b2)
    feats, v_col, v_row, cnt = topk_pool(feats, v_col, v_row, p2)
    x2 = readout(feats, v_col, v_row, cnt)
    # --- block 3 ---
    feats = sage_relu(feats, v_row, wc3, b3)
    feats, v_col, v_row, cnt = topk_pool(feats, v_col, v_row, p3)
    x3 = readout(feats, v_col, v_row, cnt)

    # --- MLP head (per graph; padded lanes stay exactly zero) ---
    z = x1 + x2 + x3                                                      # [1,256]
    wl1 = wlin_ref[0:2 * H, :]          # [256,128]
    wl2 = wlin_ref[2 * H:3 * H, :]      # [128,128] (cols >= 64 zero-padded)
    wl3 = wlin_ref[3 * H:4 * H, :]      # [128,128] (rows >= 64, cols >= 1 zero)
    z = jnp.maximum(jnp.dot(z, wl1, preferred_element_type=f32) + bl1, 0.0)
    # F.dropout(p=0.5) is identity at inference time.
    # TODO(synk): training-mode dropout (RNG mask) not implemented.
    z = jnp.maximum(jnp.dot(z, wl2, preferred_element_type=f32) + bl2, 0.0)
    z = jnp.dot(z, wl3, preferred_element_type=f32) + bl3                 # [1,128]
    out_ref[...] = jax.nn.sigmoid(z[:, 0:1])                              # [1,1]


# -------------------------------- wrapper ------------------------------------

def net_forward(nvalid, x_blocks, adj_blocks, wconv, vecs, wlin, *, nb=NB):
    total_nodes, fp = x_blocks.shape
    num_graphs = total_nodes // nb

    grid_spec = pltpu.PrefetchScalarGridSpec(
        num_scalar_prefetch=1,                       # nvalid -> SMEM
        grid=(num_graphs,),
        in_specs=[
            pl.BlockSpec((nb, fp), lambda g, n: (g, 0)),        # x block
            pl.BlockSpec((nb, nb), lambda g, n: (g, 0)),        # adj block
            pl.BlockSpec(wconv.shape, lambda g, n: (0, 0)),     # shared weights
            pl.BlockSpec(vecs.shape, lambda g, n: (0, 0)),
            pl.BlockSpec(wlin.shape, lambda g, n: (0, 0)),
        ],
        out_specs=pl.BlockSpec((None, 1, 1), lambda g, n: (g, 0, 0)),
    )
    out = pl.pallas_call(
        net_kernel,
        out_shape=jax.ShapeDtypeStruct((num_graphs, 1, 1), jnp.float32),
        grid_spec=grid_spec,
        compiler_params=pltpu.CompilerParams(
            dimension_semantics=("parallel",),       # graphs are independent
            vmem_limit_bytes=32 * 1024 * 1024),
    )(nvalid, x_blocks, adj_blocks, wconv, vecs, wlin)
    return out.reshape(num_graphs, 1)


def init_params(key, num_node_features, hidden=H):
    def dense(k, fan_in, fan_out):
        return (jax.random.normal(k, (fan_in, fan_out), jnp.float32)
                / jnp.sqrt(jnp.float32(fan_in)))

    keys = jax.random.split(key, 16)
    p = {}
    # SAGEConv: W_l (neighbor / aggregated), W_r (root), bias
    p["w1l"] = dense(keys[0], num_node_features, hidden)
    p["w1r"] = dense(keys[1], num_node_features, hidden)
    p["b1"] = jnp.zeros((1, hidden), jnp.float32)
    p["w2l"] = dense(keys[2], hidden, hidden)
    p["w2r"] = dense(keys[3], hidden, hidden)
    p["b2"] = jnp.zeros((1, hidden), jnp.float32)
    p["w3l"] = dense(keys[4], hidden, hidden)
    p["w3r"] = dense(keys[5], hidden, hidden)
    p["b3"] = jnp.zeros((1, hidden), jnp.float32)
    # TopKPooling projection vectors
    p["p1"] = jax.random.normal(keys[6], (1, hidden), jnp.float32)
    p["p2"] = jax.random.normal(keys[7], (1, hidden), jnp.float32)
    p["p3"] = jax.random.normal(keys[8], (1, hidden), jnp.float32)
    # lin1 / lin2 / lin3
    p["wl1"] = dense(keys[9], 2 * hidden, hidden)
    p["bl1"] = jnp.zeros((1, hidden), jnp.float32)
    p["wl2"] = dense(keys[10], hidden, 64)
    p["bl2"] = jnp.zeros((1, 64), jnp.float32)
    p["wl3"] = dense(keys[11], 64, 1)
    p["bl3"] = jnp.zeros((1, 1), jnp.float32)
    return p


def pack_params(p, fp, h=H):
    """Pack 18 small tensors into 3 arrays (bf16 conv weights, f32 vecs/lin)."""
    def pad_rows(w, rows):
        return jnp.zeros((rows, w.shape[1]), w.dtype).at[:w.shape[0]].set(w)

    w1l = pad_rows(p["w1l"], fp)
    w1r = pad_rows(p["w1r"], fp)
    wconv = jnp.concatenate(
        [w1l, w1r, p["w2l"], p["w2r"], p["w3l"], p["w3r"]], axis=0
    ).astype(jnp.bfloat16)                                   # [2*fp + 4H, H]

    vecs = jnp.zeros((16, h), jnp.float32)
    vecs = vecs.at[0, :].set(p["b1"][0]).at[1, :].set(p["b2"][0])
    vecs = vecs.at[2, :].set(p["b3"][0])
    vecs = vecs.at[3, :].set(p["p1"][0]).at[4, :].set(p["p2"][0])
    vecs = vecs.at[5, :].set(p["p3"][0])
    vecs = vecs.at[6, :].set(p["bl1"][0])
    vecs = vecs.at[7, :64].set(p["bl2"][0])
    vecs = vecs.at[8, :1].set(p["bl3"][0])

    wlin = jnp.zeros((4 * h, h), jnp.float32)
    wlin = wlin.at[0:2 * h, :].set(p["wl1"])                 # [256,128]
    wlin = wlin.at[2 * h:3 * h, :64].set(p["wl2"])           # [128,64] padded
    wlin = wlin.at[3 * h:3 * h + 64, :1].set(p["wl3"])       # [64,1] padded
    return wconv, vecs, wlin


# ---------------------------------- demo -------------------------------------

if __name__ == "__main__":
    F = 32                      # raw node feature dim
    FP = 128                    # padded feature dim (lane aligned)
    G = 2                       # graphs per batch
    n_per_graph = [12, 10]      # real nodes per graph (rest is padding)

    key = jax.random.PRNGKey(0)
    k_x, k_p = jax.random.split(key)

    params = init_params(k_p, F)
    wconv, vecs, wlin = pack_params(params, FP)

    # Build per-graph padded blocks: node features, block-diagonal adjacency.
    x_blocks = jnp.zeros((G * NB, FP), jnp.float32)
    adj_blocks = jnp.zeros((G * NB, NB), jnp.float32)
    keys = jax.random.split(k_x, G)
    for g in range(G):
        n = n_per_graph[g]
        xg = jax.random.normal(keys[g], (n, F), jnp.float32)
        x_blocks = x_blocks.at[g * NB:g * NB + n, :F].set(xg)
        # undirected ring among the n real nodes of graph g
        for i in range(n):
            j = (i + 1) % n
            adj_blocks = adj_blocks.at[g * NB + i, j].set(1.0)
            adj_blocks = adj_blocks.at[g * NB + j, i].set(1.0)
    nvalid = jnp.array(n_per_graph, jnp.int32)

    out = net_forward(nvalid, x_blocks, adj_blocks, wconv, vecs, wlin)
    out = jax.block_until_ready(out)

    assert out.shape == (G, 1)
    assert bool(jnp.all(jnp.isfinite(out)))
    assert bool(jnp.all((out >= 0.0) & (out <= 1.0)))
    print("KERNEL_OK")
</pallas_src>

<mosaic_0001>
module attributes {stable_mosaic.version = 11 : i64} {
  func.func @net_kernel(%arg0: i32, %arg1: memref<2xi32, #tpu.memory_space<smem>>, %arg2: memref<128x128xf32, #tpu.memory_space<vmem>>, %arg3: memref<128x128xf32, #tpu.memory_space<vmem>>, %arg4: memref<768x128xbf16, #tpu.memory_space<vmem>>, %arg5: memref<16x128xf32, #tpu.memory_space<vmem>>, %arg6: memref<512x128xf32, #tpu.memory_space<vmem>>, %arg7: memref<1x1x1xf32, #tpu.memory_space<vmem>>) attributes {dimension_semantics = [#tpu.dimension_semantics<parallel>], iteration_bounds = array<i64: 2>, scalar_prefetch = 1 : i64, scratch_operands = 0 : i64, tpu.core_type = #tpu.core_type<tc>, window_params = [{transform_indices = @transform_0, window_bounds = array<i64: 128, 128>}, {transform_indices = @transform_1, window_bounds = array<i64: 128, 128>}, {pipeline_mode = #tpu.pipeline_mode<synchronous>, transform_indices = @transform_2, window_bounds = array<i64: 768, 128>}, {pipeline_mode = #tpu.pipeline_mode<synchronous>, transform_indices = @transform_3, window_bounds = array<i64: 16, 128>}, {pipeline_mode = #tpu.pipeline_mode<synchronous>, transform_indices = @transform_4, window_bounds = array<i64: 512, 128>}, {transform_indices = @transform_5, window_bounds = array<i64: 1, 1, 1>}]} {
    %0 = arith.index_cast %arg0 : i32 to index
    %1 = memref.load %arg1[%0] : memref<2xi32, #tpu.memory_space<smem>>
    %2 = tpu.iota {dimensions = array<i32: 0>} : vector<128x1xi32>
    %3 = tpu.iota {dimensions = array<i32: 1>} : vector<1x128xi32>
    %4 = vector.broadcast %1 : i32 to vector<128x1xi32>
    %5 = arith.cmpi slt, %2, %4 : vector<128x1xi32>
    %6 = arith.extui %5 : vector<128x1xi1> to vector<128x1xi32>
    %7 = arith.sitofp %6 : vector<128x1xi32> to vector<128x1xf32>
    %8 = vector.broadcast %1 : i32 to vector<1x128xi32>
    %9 = arith.cmpi slt, %3, %8 : vector<1x128xi32>
    %10 = arith.extui %9 : vector<1x128xi1> to vector<1x128xi32>
    %11 = arith.sitofp %10 : vector<1x128xi32> to vector<1x128xf32>
    %c0 = arith.constant 0 : index
    %c0_0 = arith.constant 0 : index
    %12 = vector.load %arg3[%c0, %c0_0] : memref<128x128xf32, #tpu.memory_space<vmem>>, vector<128x128xf32>
    %c0_1 = arith.constant 0 : index
    %c0_2 = arith.constant 0 : index
    %13 = vector.load %arg5[%c0_1, %c0_2] : memref<16x128xf32, #tpu.memory_space<vmem>>, vector<16x128xf32>
    %14 = vector.extract_strided_slice %13 {offsets = [0, 0], sizes = [1, 128], strides = [1, 1]} : vector<16x128xf32> to vector<1x128xf32>
    %15 = vector.extract_strided_slice %13 {offsets = [1, 0], sizes = [1, 128], strides = [1, 1]} : vector<16x128xf32> to vector<1x128xf32>
    %16 = vector.extract_strided_slice %13 {offsets = [2, 0], sizes = [1, 128], strides = [1, 1]} : vector<16x128xf32> to vector<1x128xf32>
    %17 = vector.extract_strided_slice %13 {offsets = [3, 0], sizes = [1, 128], strides = [1, 1]} : vector<16x128xf32> to vector<1x128xf32>
    %18 = vector.extract_strided_slice %13 {offsets = [4, 0], sizes = [1, 128], strides = [1, 1]} : vector<16x128xf32> to vector<1x128xf32>
    %19 = vector.extract_strided_slice %13 {offsets = [5, 0], sizes = [1, 128], strides = [1, 1]} : vector<16x128xf32> to vector<1x128xf32>
    %20 = vector.extract_strided_slice %13 {offsets = [6, 0], sizes = [1, 128], strides = [1, 1]} : vector<16x128xf32> to vector<1x128xf32>
    %21 = vector.extract_strided_slice %13 {offsets = [7, 0], sizes = [1, 128], strides = [1, 1]} : vector<16x128xf32> to vector<1x128xf32>
    %22 = vector.extract_strided_slice %13 {offsets = [8, 0], sizes = [1, 128], strides = [1, 1]} : vector<16x128xf32> to vector<1x128xf32>
    %c0_3 = arith.constant 0 : index
    %c0_4 = arith.constant 0 : index
    %23 = vector.load %arg4[%c0_3, %c0_4] : memref<768x128xbf16, #tpu.memory_space<vmem>>, vector<256x128xbf16>
    %c256 = arith.constant 256 : index
    %c0_5 = arith.constant 0 : index
    %24 = vector.load %arg4[%c256, %c0_5] : memref<768x128xbf16, #tpu.memory_space<vmem>>, vector<256x128xbf16>
    %c512 = arith.constant 512 : index
    %c0_6 = arith.constant 0 : index
    %25 = vector.load %arg4[%c512, %c0_6] : memref<768x128xbf16, #tpu.memory_space<vmem>>, vector<256x128xbf16>
    %c0_7 = arith.constant 0 : index
    %c0_8 = arith.constant 0 : index
    %26 = vector.load %arg2[%c0_7, %c0_8] : memref<128x128xf32, #tpu.memory_space<vmem>>, vector<128x128xf32>
    %27 = vector.broadcast %11 : vector<1x128xf32> to vector<128x128xf32>
    %28 = arith.mulf %12, %27 : vector<128x128xf32>
    %cst = arith.constant dense<0.000000e+00> : vector<128xf32>
    %29 = vector.multi_reduction <add>, %28, %cst [1] : vector<128x128xf32> to vector<128xf32>
    %30 = vector.shape_cast %29 : vector<128xf32> to vector<128x1xf32>
    %cst_9 = arith.constant 1.000000e+00 : f32
    %31 = vector.broadcast %cst_9 : f32 to vector<128x1xf32>
    %32 = arith.maximumf %30, %31 : vector<128x1xf32>
    %33 = tpu.reciprocal %32 {approx = true} : vector<128x1xf32> -> vector<128x1xf32>
    %34 = vector.broadcast %33 : vector<128x1xf32> to vector<128x128xf32>
    %35 = arith.mulf %28, %34 : vector<128x128xf32>
    %36 = arith.truncf %35 : vector<128x128xf32> to vector<128x128xbf16>
    %37 = arith.truncf %26 : vector<128x128xf32> to vector<128x128xbf16>
    %cst_10 = arith.constant dense<0.000000e+00> : vector<128x128xf32>
    %38 = tpu.matmul %36, %37, %cst_10 {dimension_numbers = #tpu.dot_dimension_numbers<[1], [0], [0], [1], [0, 0, 1, 1], [], []>} : vector<128x128xbf16>, vector<128x128xbf16>, vector<128x128xf32> -> vector<128x128xf32>
    %39 = tpu.concatenate %38, %26 in 1 : vector<128x128xf32>, vector<128x128xf32> -> vector<128x256xf32>
    %40 = arith.truncf %39 : vector<128x256xf32> to vector<128x256xbf16>
    %cst_11 = arith.constant dense<0.000000e+00> : vector<128x128xf32>
    %41 = tpu.matmul %40, %23, %cst_11 {dimension_numbers = #tpu.dot_dimension_numbers<[1], [0], [0], [1], [0, 0, 1, 1], [], []>} : vector<128x256xbf16>, vector<256x128xbf16>, vector<128x128xf32> -> vector<128x128xf32>
    %42 = vector.broadcast %14 : vector<1x128xf32> to vector<128x128xf32>
    %43 = arith.addf %41, %42 : vector<128x128xf32>
    %cst_12 = arith.constant 0.000000e+00 : f32
    %44 = vector.broadcast %cst_12 : f32 to vector<128x128xf32>
    %45 = arith.maximumf %43, %44 : vector<128x128xf32>
    %46 = arith.mulf %17, %17 : vector<1x128xf32>
    %cst_13 = arith.constant dense<0.000000e+00> : vector<1xf32>
    %47 = vector.multi_reduction <add>, %46, %cst_13 [1] : vector<1x128xf32> to vector<1xf32>
    %48 = vector.shape_cast %47 : vector<1xf32> to vector<1x1xf32>
    %49 = math.rsqrt %48 : vector<1x1xf32>
    %50 = vector.broadcast %17 : vector<1x128xf32> to vector<128x128xf32>
    %51 = arith.mulf %45, %50 : vector<128x128xf32>
    %cst_14 = arith.constant dense<0.000000e+00> : vector<128xf32>
    %52 = vector.multi_reduction <add>, %51, %cst_14 [1] : vector<128x128xf32> to vector<128xf32>
    %53 = vector.shape_cast %52 : vector<128xf32> to vector<128x1xf32>
    %54 = vector.broadcast %49 : vector<1x1xf32> to vector<128x1xf32>
    %55 = arith.mulf %53, %54 : vector<128x1xf32>
    %56 = tpu.transpose %55, [1, 0] : vector<128x1xf32> -> vector<1x128xf32>
    %57 = vector.broadcast %56 : vector<1x128xf32> to vector<128x128xf32>
    %58 = vector.broadcast %55 : vector<128x1xf32> to vector<128x128xf32>
    %59 = arith.cmpf ogt, %57, %58 : vector<128x128xf32>
    %60 = vector.broadcast %56 : vector<1x128xf32> to vector<128x128xf32>
    %61 = vector.broadcast %55 : vector<128x1xf32> to vector<128x128xf32>
    %62 = arith.cmpf oeq, %60, %61 : vector<128x128xf32>
    %63 = vector.broadcast %3 : vector<1x128xi32> to vector<128x128xi32>
    %64 = vector.broadcast %2 : vector<128x1xi32> to vector<128x128xi32>
    %65 = arith.cmpi slt, %63, %64 : vector<128x128xi32>
    %66 = arith.andi %62, %65 : vector<128x128xi1>
    %67 = arith.ori %59, %66 : vector<128x128xi1>
    %68 = arith.extui %67 : vector<128x128xi1> to vector<128x128xi32>
    %69 = arith.sitofp %68 : vector<128x128xi32> to vector<128x128xf32>
    %70 = vector.broadcast %11 : vector<1x128xf32> to vector<128x128xf32>
    %71 = arith.mulf %70, %69 : vector<128x128xf32>
    %cst_15 = arith.constant dense<0.000000e+00> : vector<128xf32>
    %72 = vector.multi_reduction <add>, %71, %cst_15 [1] : vector<128x128xf32> to vector<128xf32>
    %73 = vector.shape_cast %72 : vector<128xf32> to vector<128x1xf32>
    %cst_16 = arith.constant dense<0.000000e+00> : vector<1xf32>
    %74 = vector.multi_reduction <add>, %11, %cst_16 [1] : vector<1x128xf32> to vector<1xf32>
    %75 = vector.shape_cast %74 : vector<1xf32> to vector<1x1xf32>
    %cst_17 = arith.constant 5.000000e-01 : f32
    %76 = vector.broadcast %cst_17 : f32 to vector<1x1xf32>
    %77 = arith.mulf %76, %75 : vector<1x1xf32>
    %78 = math.ceil %77 : vector<1x1xf32>
    %79 = vector.broadcast %78 : vector<1x1xf32> to vector<128x1xf32>
    %80 = arith.cmpf olt, %73, %79 : vector<128x1xf32>
    %81 = arith.extui %80 : vector<128x1xi1> to vector<128x1xi32>
    %82 = arith.sitofp %81 : vector<128x1xi32> to vector<128x1xf32>
    %83 = arith.mulf %7, %82 : vector<128x1xf32>
    %84 = tpu.transpose %83, [1, 0] : vector<128x1xf32> -> vector<1x128xf32>
    %cst_18 = arith.constant dense<0.000000e+00> : vector<1xf32>
    %85 = vector.multi_reduction <add>, %84, %cst_18 [1] : vector<1x128xf32> to vector<1xf32>
    %86 = vector.shape_cast %85 : vector<1xf32> to vector<1x1xf32>
    %87 = math.tanh %55 : vector<128x1xf32>
    %88 = vector.broadcast %87 : vector<128x1xf32> to vector<128x128xf32>
    %89 = arith.mulf %45, %88 : vector<128x128xf32>
    %90 = vector.broadcast %83 : vector<128x1xf32> to vector<128x128xf32>
    %91 = arith.mulf %89, %90 : vector<128x128xf32>
    %cst_19 = arith.constant 5.000000e-01 : f32
    %92 = vector.broadcast %cst_19 : f32 to vector<128x1xf32>
    %93 = arith.cmpf ogt, %83, %92 : vector<128x1xf32>
    %cst_20 = arith.constant -1.000000e+30 : f32
    %94 = vector.shape_cast %93 : vector<128x1xi1> to vector<128x1xi1>
    %95 = vector.broadcast %94 : vector<128x1xi1> to vector<128x128xi1>
    %96 = vector.broadcast %cst_20 : f32 to vector<128x128xf32>
    %97 = arith.select %95, %91, %96 : vector<128x128xi1>, vector<128x128xf32>
    %cst_21 = arith.constant dense<0xFF800000> : vector<128xf32>
    %98 = vector.multi_reduction <maximumf>, %97, %cst_21 [0] : vector<128x128xf32> to vector<128xf32>
    %99 = vector.shape_cast %98 : vector<128xf32> to vector<1x128xf32>
    %cst_22 = arith.constant 5.000000e-01 : f32
    %100 = vector.broadcast %cst_22 : f32 to vector<1x1xf32>
    %101 = arith.cmpf ogt, %86, %100 : vector<1x1xf32>
    %cst_23 = arith.constant 0.000000e+00 : f32
    %102 = vector.shape_cast %101 : vector<1x1xi1> to vector<1x1xi1>
    %103 = vector.broadcast %102 : vector<1x1xi1> to vector<1x128xi1>
    %104 = vector.broadcast %cst_23 : f32 to vector<1x128xf32>
    %105 = arith.select %103, %99, %104 : vector<1x128xi1>, vector<1x128xf32>
    %cst_24 = arith.constant dense<0.000000e+00> : vector<1x128xf32>
    %106 = tpu.matmul %84, %91, %cst_24 {dimension_numbers = #tpu.dot_dimension_numbers<[1], [0], [0], [1], [0, 0, 1, 1], [], []>} : vector<1x128xf32>, vector<128x128xf32>, vector<1x128xf32> -> vector<1x128xf32>
    %cst_25 = arith.constant 1.000000e+00 : f32
    %107 = vector.broadcast %cst_25 : f32 to vector<1x1xf32>
    %108 = arith.maximumf %86, %107 : vector<1x1xf32>
    %109 = tpu.reciprocal %108 {approx = true} : vector<1x1xf32> -> vector<1x1xf32>
    %110 = vector.broadcast %109 : vector<1x1xf32> to vector<1x128xf32>
    %111 = arith.mulf %106, %110 : vector<1x128xf32>
    %112 = tpu.concatenate %105, %111 in 1 : vector<1x128xf32>, vector<1x128xf32> -> vector<1x256xf32>
    %113 = vector.broadcast %84 : vector<1x128xf32> to vector<128x128xf32>
    %114 = arith.mulf %12, %113 : vector<128x128xf32>
    %cst_26 = arith.constant dense<0.000000e+00> : vector<128xf32>
    %115 = vector.multi_reduction <add>, %114, %cst_26 [1] : vector<128x128xf32> to vector<128xf32>
    %116 = vector.shape_cast %115 : vector<128xf32> to vector<128x1xf32>
    %cst_27 = arith.constant 1.000000e+00 : f32
    %117 = vector.broadcast %cst_27 : f32 to vector<128x1xf32>
    %118 = arith.maximumf %116, %117 : vector<128x1xf32>
    %119 = tpu.reciprocal %118 {approx = true} : vector<128x1xf32> -> vector<128x1xf32>
    %120 = vector.broadcast %119 : vector<128x1xf32> to vector<128x128xf32>
    %121 = arith.mulf %114, %120 : vector<128x128xf32>
    %122 = arith.truncf %121 : vector<128x128xf32> to vector<128x128xbf16>
    %123 = arith.truncf %91 : vector<128x128xf32> to vector<128x128xbf16>
    %cst_28 = arith.constant dense<0.000000e+00> : vector<128x128xf32>
    %124 = tpu.matmul %122, %123, %cst_28 {dimension_numbers = #tpu.dot_dimension_numbers<[1], [0], [0], [1], [0, 0, 1, 1], [], []>} : vector<128x128xbf16>, vector<128x128xbf16>, vector<128x128xf32> -> vector<128x128xf32>
    %125 = tpu.concatenate %124, %91 in 1 : vector<128x128xf32>, vector<128x128xf32> -> vector<128x256xf32>
    %126 = arith.truncf %125 : vector<128x256xf32> to vector<128x256xbf16>
    %cst_29 = arith.constant dense<0.000000e+00> : vector<128x128xf32>
    %127 = tpu.matmul %126, %24, %cst_29 {dimension_numbers = #tpu.dot_dimension_numbers<[1], [0], [0], [1], [0, 0, 1, 1], [], []>} : vector<128x256xbf16>, vector<256x128xbf16>, vector<128x128xf32> -> vector<128x128xf32>
    %128 = vector.broadcast %15 : vector<1x128xf32> to vector<128x128xf32>
    %129 = arith.addf %127, %128 : vector<128x128xf32>
    %cst_30 = arith.constant 0.000000e+00 : f32
    %130 = vector.broadcast %cst_30 : f32 to vector<128x128xf32>
    %131 = arith.maximumf %129, %130 : vector<128x128xf32>
    %132 = arith.mulf %18, %18 : vector<1x128xf32>
    %cst_31 = arith.constant dense<0.000000e+00> : vector<1xf32>
    %133 = vector.multi_reduction <add>, %132, %cst_31 [1] : vector<1x128xf32> to vector<1xf32>
    %134 = vector.shape_cast %133 : vector<1xf32> to vector<1x1xf32>
    %135 = math.rsqrt %134 : vector<1x1xf32>
    %136 = vector.broadcast %18 : vector<1x128xf32> to vector<128x128xf32>
    %137 = arith.mulf %131, %136 : vector<128x128xf32>
    %cst_32 = arith.constant dense<0.000000e+00> : vector<128xf32>
    %138 = vector.multi_reduction <add>, %137, %cst_32 [1] : vector<128x128xf32> to vector<128xf32>
    %139 = vector.shape_cast %138 : vector<128xf32> to vector<128x1xf32>
    %140 = vector.broadcast %135 : vector<1x1xf32> to vector<128x1xf32>
    %141 = arith.mulf %139, %140 : vector<128x1xf32>
    %142 = tpu.transpose %141, [1, 0] : vector<128x1xf32> -> vector<1x128xf32>
    %143 = vector.broadcast %142 : vector<1x128xf32> to vector<128x128xf32>
    %144 = vector.broadcast %141 : vector<128x1xf32> to vector<128x128xf32>
    %145 = arith.cmpf ogt, %143, %144 : vector<128x128xf32>
    %146 = vector.broadcast %142 : vector<1x128xf32> to vector<128x128xf32>
    %147 = vector.broadcast %141 : vector<128x1xf32> to vector<128x128xf32>
    %148 = arith.cmpf oeq, %146, %147 : vector<128x128xf32>
    %149 = vector.broadcast %3 : vector<1x128xi32> to vector<128x128xi32>
    %150 = vector.broadcast %2 : vector<128x1xi32> to vector<128x128xi32>
    %151 = arith.cmpi slt, %149, %150 : vector<128x128xi32>
    %152 = arith.andi %148, %151 : vector<128x128xi1>
    %153 = arith.ori %145, %152 : vector<128x128xi1>
    %154 = arith.extui %153 : vector<128x128xi1> to vector<128x128xi32>
    %155 = arith.sitofp %154 : vector<128x128xi32> to vector<128x128xf32>
    %156 = vector.broadcast %84 : vector<1x128xf32> to vector<128x128xf32>
    %157 = arith.mulf %156, %155 : vector<128x128xf32>
    %cst_33 = arith.constant dense<0.000000e+00> : vector<128xf32>
    %158 = vector.multi_reduction <add>, %157, %cst_33 [1] : vector<128x128xf32> to vector<128xf32>
    %159 = vector.shape_cast %158 : vector<128xf32> to vector<128x1xf32>
    %cst_34 = arith.constant dense<0.000000e+00> : vector<1xf32>
    %160 = vector.multi_reduction <add>, %84, %cst_34 [1] : vector<1x128xf32> to vector<1xf32>
    %161 = vector.shape_cast %160 : vector<1xf32> to vector<1x1xf32>
    %cst_35 = arith.constant 5.000000e-01 : f32
    %162 = vector.broadcast %cst_35 : f32 to vector<1x1xf32>
    %163 = arith.mulf %162, %161 : vector<1x1xf32>
    %164 = math.ceil %163 : vector<1x1xf32>
    %165 = vector.broadcast %164 : vector<1x1xf32> to vector<128x1xf32>
    %166 = arith.cmpf olt, %159, %165 : vector<128x1xf32>
    %167 = arith.extui %166 : vector<128x1xi1> to vector<128x1xi32>
    %168 = arith.sitofp %167 : vector<128x1xi32> to vector<128x1xf32>
    %169 = arith.mulf %83, %168 : vector<128x1xf32>
    %170 = tpu.transpose %169, [1, 0] : vector<128x1xf32> -> vector<1x128xf32>
    %cst_36 = arith.constant dense<0.000000e+00> : vector<1xf32>
    %171 = vector.multi_reduction <add>, %170, %cst_36 [1] : vector<1x128xf32> to vector<1xf32>
    %172 = vector.shape_cast %171 : vector<1xf32> to vector<1x1xf32>
    %173 = math.tanh %141 : vector<128x1xf32>
    %174 = vector.broadcast %173 : vector<128x1xf32> to vector<128x128xf32>
    %175 = arith.mulf %131, %174 : vector<128x128xf32>
    %176 = vector.broadcast %169 : vector<128x1xf32> to vector<128x128xf32>
    %177 = arith.mulf %175, %176 : vector<128x128xf32>
    %cst_37 = arith.constant 5.000000e-01 : f32
    %178 = vector.broadcast %cst_37 : f32 to vector<128x1xf32>
    %179 = arith.cmpf ogt, %169, %178 : vector<128x1xf32>
    %cst_38 = arith.constant -1.000000e+30 : f32
    %180 = vector.shape_cast %179 : vector<128x1xi1> to vector<128x1xi1>
    %181 = vector.broadcast %180 : vector<128x1xi1> to vector<128x128xi1>
    %182 = vector.broadcast %cst_38 : f32 to vector<128x128xf32>
    %183 = arith.select %181, %177, %182 : vector<128x128xi1>, vector<128x128xf32>
    %cst_39 = arith.constant dense<0xFF800000> : vector<128xf32>
    %184 = vector.multi_reduction <maximumf>, %183, %cst_39 [0] : vector<128x128xf32> to vector<128xf32>
    %185 = vector.shape_cast %184 : vector<128xf32> to vector<1x128xf32>
    %cst_40 = arith.constant 5.000000e-01 : f32
    %186 = vector.broadcast %cst_40 : f32 to vector<1x1xf32>
    %187 = arith.cmpf ogt, %172, %186 : vector<1x1xf32>
    %cst_41 = arith.constant 0.000000e+00 : f32
    %188 = vector.shape_cast %187 : vector<1x1xi1> to vector<1x1xi1>
    %189 = vector.broadcast %188 : vector<1x1xi1> to vector<1x128xi1>
    %190 = vector.broadcast %cst_41 : f32 to vector<1x128xf32>
    %191 = arith.select %189, %185, %190 : vector<1x128xi1>, vector<1x128xf32>
    %cst_42 = arith.constant dense<0.000000e+00> : vector<1x128xf32>
    %192 = tpu.matmul %170, %177, %cst_42 {dimension_numbers = #tpu.dot_dimension_numbers<[1], [0], [0], [1], [0, 0, 1, 1], [], []>} : vector<1x128xf32>, vector<128x128xf32>, vector<1x128xf32> -> vector<1x128xf32>
    %cst_43 = arith.constant 1.000000e+00 : f32
    %193 = vector.broadcast %cst_43 : f32 to vector<1x1xf32>
    %194 = arith.maximumf %172, %193 : vector<1x1xf32>
    %195 = tpu.reciprocal %194 {approx = true} : vector<1x1xf32> -> vector<1x1xf32>
    %196 = vector.broadcast %195 : vector<1x1xf32> to vector<1x128xf32>
    %197 = arith.mulf %192, %196 : vector<1x128xf32>
    %198 = tpu.concatenate %191, %197 in 1 : vector<1x128xf32>, vector<1x128xf32> -> vector<1x256xf32>
    %199 = vector.broadcast %170 : vector<1x128xf32> to vector<128x128xf32>
    %200 = arith.mulf %12, %199 : vector<128x128xf32>
    %cst_44 = arith.constant dense<0.000000e+00> : vector<128xf32>
    %201 = vector.multi_reduction <add>, %200, %cst_44 [1] : vector<128x128xf32> to vector<128xf32>
    %202 = vector.shape_cast %201 : vector<128xf32> to vector<128x1xf32>
    %cst_45 = arith.constant 1.000000e+00 : f32
    %203 = vector.broadcast %cst_45 : f32 to vector<128x1xf32>
    %204 = arith.maximumf %202, %203 : vector<128x1xf32>
    %205 = tpu.reciprocal %204 {approx = true} : vector<128x1xf32> -> vector<128x1xf32>
    %206 = vector.broadcast %205 : vector<128x1xf32> to vector<128x128xf32>
    %207 = arith.mulf %200, %206 : vector<128x128xf32>
    %208 = arith.truncf %207 : vector<128x128xf32> to vector<128x128xbf16>
    %209 = arith.truncf %177 : vector<128x128xf32> to vector<128x128xbf16>
    %cst_46 = arith.constant dense<0.000000e+00> : vector<128x128xf32>
    %210 = tpu.matmul %208, %209, %cst_46 {dimension_numbers = #tpu.dot_dimension_numbers<[1], [0], [0], [1], [0, 0, 1, 1], [], []>} : vector<128x128xbf16>, vector<128x128xbf16>, vector<128x128xf32> -> vector<128x128xf32>
    %211 = tpu.concatenate %210, %177 in 1 : vector<128x128xf32>, vector<128x128xf32> -> vector<128x256xf32>
    %212 = arith.truncf %211 : vector<128x256xf32> to vector<128x256xbf16>
    %cst_47 = arith.constant dense<0.000000e+00> : vector<128x128xf32>
    %213 = tpu.matmul %212, %25, %cst_47 {dimension_numbers = #tpu.dot_dimension_numbers<[1], [0], [0], [1], [0, 0, 1, 1], [], []>} : vector<128x256xbf16>, vector<256x128xbf16>, vector<128x128xf32> -> vector<128x128xf32>
    %214 = vector.broadcast %16 : vector<1x128xf32> to vector<128x128xf32>
    %215 = arith.addf %213, %214 : vector<128x128xf32>
    %cst_48 = arith.constant 0.000000e+00 : f32
    %216 = vector.broadcast %cst_48 : f32 to vector<128x128xf32>
    %217 = arith.maximumf %215, %216 : vector<128x128xf32>
    %218 = arith.mulf %19, %19 : vector<1x128xf32>
    %cst_49 = arith.constant dense<0.000000e+00> : vector<1xf32>
    %219 = vector.multi_reduction <add>, %218, %cst_49 [1] : vector<1x128xf32> to vector<1xf32>
    %220 = vector.shape_cast %219 : vector<1xf32> to vector<1x1xf32>
    %221 = math.rsqrt %220 : vector<1x1xf32>
    %222 = vector.broadcast %19 : vector<1x128xf32> to vector<128x128xf32>
    %223 = arith.mulf %217, %222 : vector<128x128xf32>
    %cst_50 = arith.constant dense<0.000000e+00> : vector<128xf32>
    %224 = vector.multi_reduction <add>, %223, %cst_50 [1] : vector<128x128xf32> to vector<128xf32>
    %225 = vector.shape_cast %224 : vector<128xf32> to vector<128x1xf32>
    %226 = vector.broadcast %221 : vector<1x1xf32> to vector<128x1xf32>
    %227 = arith.mulf %225, %226 : vector<128x1xf32>
    %228 = tpu.transpose %227, [1, 0] : vector<128x1xf32> -> vector<1x128xf32>
    %229 = vector.broadcast %228 : vector<1x128xf32> to vector<128x128xf32>
    %230 = vector.broadcast %227 : vector<128x1xf32> to vector<128x128xf32>
    %231 = arith.cmpf ogt, %229, %230 : vector<128x128xf32>
    %232 = vector.broadcast %228 : vector<1x128xf32> to vector<128x128xf32>
    %233 = vector.broadcast %227 : vector<128x1xf32> to vector<128x128xf32>
    %234 = arith.cmpf oeq, %232, %233 : vector<128x128xf32>
    %235 = vector.broadcast %3 : vector<1x128xi32> to vector<128x128xi32>
    %236 = vector.broadcast %2 : vector<128x1xi32> to vector<128x128xi32>
    %237 = arith.cmpi slt, %235, %236 : vector<128x128xi32>
    %238 = arith.andi %234, %237 : vector<128x128xi1>
    %239 = arith.ori %231, %238 : vector<128x128xi1>
    %240 = arith.extui %239 : vector<128x128xi1> to vector<128x128xi32>
    %241 = arith.sitofp %240 : vector<128x128xi32> to vector<128x128xf32>
    %242 = vector.broadcast %170 : vector<1x128xf32> to vector<128x128xf32>
    %243 = arith.mulf %242, %241 : vector<128x128xf32>
    %cst_51 = arith.constant dense<0.000000e+00> : vector<128xf32>
    %244 = vector.multi_reduction <add>, %243, %cst_51 [1] : vector<128x128xf32> to vector<128xf32>
    %245 = vector.shape_cast %244 : vector<128xf32> to vector<128x1xf32>
    %cst_52 = arith.constant dense<0.000000e+00> : vector<1xf32>
    %246 = vector.multi_reduction <add>, %170, %cst_52 [1] : vector<1x128xf32> to vector<1xf32>
    %247 = vector.shape_cast %246 : vector<1xf32> to vector<1x1xf32>
    %cst_53 = arith.constant 5.000000e-01 : f32
    %248 = vector.broadcast %cst_53 : f32 to vector<1x1xf32>
    %249 = arith.mulf %248, %247 : vector<1x1xf32>
    %250 = math.ceil %249 : vector<1x1xf32>
    %251 = vector.broadcast %250 : vector<1x1xf32> to vector<128x1xf32>
    %252 = arith.cmpf olt, %245, %251 : vector<128x1xf32>
    %253 = arith.extui %252 : vector<128x1xi1> to vector<128x1xi32>
    %254 = arith.sitofp %253 : vector<128x1xi32> to vector<128x1xf32>
    %255 = arith.mulf %169, %254 : vector<128x1xf32>
    %256 = tpu.transpose %255, [1, 0] : vector<128x1xf32> -> vector<1x128xf32>
    %cst_54 = arith.constant dense<0.000000e+00> : vector<1xf32>
    %257 = vector.multi_reduction <add>, %256, %cst_54 [1] : vector<1x128xf32> to vector<1xf32>
    %258 = vector.shape_cast %257 : vector<1xf32> to vector<1x1xf32>
    %259 = math.tanh %227 : vector<128x1xf32>
    %260 = vector.broadcast %259 : vector<128x1xf32> to vector<128x128xf32>
    %261 = arith.mulf %217, %260 : vector<128x128xf32>
    %262 = vector.broadcast %255 : vector<128x1xf32> to vector<128x128xf32>
    %263 = arith.mulf %261, %262 : vector<128x128xf32>
    %cst_55 = arith.constant 5.000000e-01 : f32
    %264 = vector.broadcast %cst_55 : f32 to vector<128x1xf32>
    %265 = arith.cmpf ogt, %255, %264 : vector<128x1xf32>
    %cst_56 = arith.constant -1.000000e+30 : f32
    %266 = vector.shape_cast %265 : vector<128x1xi1> to vector<128x1xi1>
    %267 = vector.broadcast %266 : vector<128x1xi1> to vector<128x128xi1>
    %268 = vector.broadcast %cst_56 : f32 to vector<128x128xf32>
    %269 = arith.select %267, %263, %268 : vector<128x128xi1>, vector<128x128xf32>
    %cst_57 = arith.constant dense<0xFF800000> : vector<128xf32>
    %270 = vector.multi_reduction <maximumf>, %269, %cst_57 [0] : vector<128x128xf32> to vector<128xf32>
    %271 = vector.shape_cast %270 : vector<128xf32> to vector<1x128xf32>
    %cst_58 = arith.constant 5.000000e-01 : f32
    %272 = vector.broadcast %cst_58 : f32 to vector<1x1xf32>
    %273 = arith.cmpf ogt, %258, %272 : vector<1x1xf32>
    %cst_59 = arith.constant 0.000000e+00 : f32
    %274 = vector.shape_cast %273 : vector<1x1xi1> to vector<1x1xi1>
    %275 = vector.broadcast %274 : vector<1x1xi1> to vector<1x128xi1>
    %276 = vector.broadcast %cst_59 : f32 to vector<1x128xf32>
    %277 = arith.select %275, %271, %276 : vector<1x128xi1>, vector<1x128xf32>
    %cst_60 = arith.constant dense<0.000000e+00> : vector<1x128xf32>
    %278 = tpu.matmul %256, %263, %cst_60 {dimension_numbers = #tpu.dot_dimension_numbers<[1], [0], [0], [1], [0, 0, 1, 1], [], []>} : vector<1x128xf32>, vector<128x128xf32>, vector<1x128xf32> -> vector<1x128xf32>
    %cst_61 = arith.constant 1.000000e+00 : f32
    %279 = vector.broadcast %cst_61 : f32 to vector<1x1xf32>
    %280 = arith.maximumf %258, %279 : vector<1x1xf32>
    %281 = tpu.reciprocal %280 {approx = true} : vector<1x1xf32> -> vector<1x1xf32>
    %282 = vector.broadcast %281 : vector<1x1xf32> to vector<1x128xf32>
    %283 = arith.mulf %278, %282 : vector<1x128xf32>
    %284 = tpu.concatenate %277, %283 in 1 : vector<1x128xf32>, vector<1x128xf32> -> vector<1x256xf32>
    %285 = arith.addf %112, %198 : vector<1x256xf32>
    %286 = arith.addf %285, %284 : vector<1x256xf32>
    %c0_62 = arith.constant 0 : index
    %c0_63 = arith.constant 0 : index
    %287 = vector.load %arg6[%c0_62, %c0_63] : memref<512x128xf32, #tpu.memory_space<vmem>>, vector<256x128xf32>
    %c256_64 = arith.constant 256 : index
    %c0_65 = arith.constant 0 : index
    %288 = vector.load %arg6[%c256_64, %c0_65] : memref<512x128xf32, #tpu.memory_space<vmem>>, vector<128x128xf32>
    %c384 = arith.constant 384 : index
    %c0_66 = arith.constant 0 : index
    %289 = vector.load %arg6[%c384, %c0_66] : memref<512x128xf32, #tpu.memory_space<vmem>>, vector<128x128xf32>
    %cst_67 = arith.constant dense<0.000000e+00> : vector<1x128xf32>
    %290 = tpu.matmul %286, %287, %cst_67 {dimension_numbers = #tpu.dot_dimension_numbers<[1], [0], [0], [1], [0, 0, 1, 1], [], []>} : vector<1x256xf32>, vector<256x128xf32>, vector<1x128xf32> -> vector<1x128xf32>
    %291 = arith.addf %290, %20 : vector<1x128xf32>
    %cst_68 = arith.constant 0.000000e+00 : f32
    %292 = vector.broadcast %cst_68 : f32 to vector<1x128xf32>
    %293 = arith.maximumf %291, %292 : vector<1x128xf32>
    %cst_69 = arith.constant dense<0.000000e+00> : vector<1x128xf32>
    %294 = tpu.matmul %293, %288, %cst_69 {dimension_numbers = #tpu.dot_dimension_numbers<[1], [0], [0], [1], [0, 0, 1, 1], [], []>} : vector<1x128xf32>, vector<128x128xf32>, vector<1x128xf32> -> vector<1x128xf32>
    %295 = arith.addf %294, %21 : vector<1x128xf32>
    %cst_70 = arith.constant 0.000000e+00 : f32
    %296 = vector.broadcast %cst_70 : f32 to vector<1x128xf32>
    %297 = arith.maximumf %295, %296 : vector<1x128xf32>
    %cst_71 = arith.constant dense<0.000000e+00> : vector<1x128xf32>
    %298 = tpu.matmul %297, %289, %cst_71 {dimension_numbers = #tpu.dot_dimension_numbers<[1], [0], [0], [1], [0, 0, 1, 1], [], []>} : vector<1x128xf32>, vector<128x128xf32>, vector<1x128xf32> -> vector<1x128xf32>
    %299 = arith.addf %298, %22 : vector<1x128xf32>
    %300 = vector.extract_strided_slice %299 {offsets = [0, 0], sizes = [1, 1], strides = [1, 1]} : vector<1x128xf32> to vector<1x1xf32>
    %301 = arith.negf %300 : vector<1x1xf32>
    %302 = math.exp %301 : vector<1x1xf32>
    %cst_72 = arith.constant 1.000000e+00 : f32
    %303 = vector.broadcast %cst_72 : f32 to vector<1x1xf32>
    %304 = arith.addf %303, %302 : vector<1x1xf32>
    %305 = arith.divf %303, %304 : vector<1x1xf32>
    %c0_73 = arith.constant 0 : index
    %c0_74 = arith.constant 0 : index
    %c0_75 = arith.constant 0 : index
    %306 = vector.load %arg7[%c0_73, %c0_74, %c0_75] : memref<1x1x1xf32, #tpu.memory_space<vmem>>, vector<1x1x1xf32>
    %307 = vector.shape_cast %306 : vector<1x1x1xf32> to vector<1x1xf32>
    %308 = vector.shape_cast %305 : vector<1x1xf32> to vector<1x1x1xf32>
    tpu.vector_store %arg7[%c0_73, %c0_74, %c0_75], %308 {strides = array<i32>} : memref<1x1x1xf32, #tpu.memory_space<vmem>>, vector<1x1x1xf32>,
    return
  }
  func.func @transform_0(%arg0: i32, %arg1: memref<2xi32, #tpu.memory_space<smem>>) -> (i32, i32) {
    %c0_i32 = arith.constant 0 : i32
    %c0_i32_0 = arith.constant 0 : i32
    return %arg0, %c0_i32 : i32, i32
  }
  func.func @transform_1(%arg0: i32, %arg1: memref<2xi32, #tpu.memory_space<smem>>) -> (i32, i32) {
    %c0_i32 = arith.constant 0 : i32
    %c0_i32_0 = arith.constant 0 : i32
    return %arg0, %c0_i32 : i32, i32
  }
  func.func @transform_2(%arg0: i32, %arg1: memref<2xi32, #tpu.memory_space<smem>>) -> (i32, i32) {
    %c0_i32 = arith.constant 0 : i32
    %c0_i32_0 = arith.constant 0 : i32
    %c0_i32_1 = arith.constant 0 : i32
    return %c0_i32, %c0_i32_0 : i32, i32
  }
  func.func @transform_3(%arg0: i32, %arg1: memref<2xi32, #tpu.memory_space<smem>>) -> (i32, i32) {
    %c0_i32 = arith.constant 0 : i32
    %c0_i32_0 = arith.constant 0 : i32
    %c0_i32_1 = arith.constant 0 : i32
    return %c0_i32, %c0_i32_0 : i32, i32
  }
  func.func @transform_4(%arg0: i32, %arg1: memref<2xi32, #tpu.memory_space<smem>>) -> (i32, i32) {
    %c0_i32 = arith.constant 0 : i32
    %c0_i32_0 = arith.constant 0 : i32
    %c0_i32_1 = arith.constant 0 : i32
    return %c0_i32, %c0_i32_0 : i32, i32
  }
  func.func @transform_5(%arg0: i32, %arg1: memref<2xi32, #tpu.memory_space<smem>>) -> (i32, i32, i32) {
    %c0_i32 = arith.constant 0 : i32
    %c0_i32_0 = arith.constant 0 : i32
    %c0_i32_1 = arith.constant 0 : i32
    return %arg0, %c0_i32, %c0_i32_0 : i32, i32, i32
  }
}

</mosaic_0001>

<bundles_post_ra>
// kernel: tpu_custom_call.1
= control target key start
LH: loop header
LB: loop body
LE: loop exit
PB: predicated region body
PF: predicated region fallthrough
CT: control target
= control target key end

     0   :  { %s7988_s0 = inlined_call_operand.hbm [shape: s32[2], index: 0, kind: input, shape index: {}]   ;;  %s7989_s1 = inlined_call_operand.hbm [shape: f32[256,128], index: 1, kind: input, shape index: {}]   ;;  %s7990_s2 = inlined_call_operand.hbm [shape: f32[256,128], index: 2, kind: input, shape index: {}]   ;;  %s7991_s3 = inlined_call_operand.hbm [shape: bf16[768,128], index: 3, kind: input, shape index: {}]   ;;  %s7992_s4 = inlined_call_operand.hbm [shape: f32[16,128], index: 4, kind: input, shape index: {}]   ;;  %s7993_s5 = inlined_call_operand.hbm [shape: f32[512,128], index: 5, kind: input, shape index: {}]   ;;  %s7994_s6 = inlined_call_operand.vmem [shape: f32[2,1,1], index: 6, kind: output, shape index: {}]  }
   0x1   :  { %s5308_s23 = scalar_lea.hbm %s7988_s0, 16 }
   0x2   :  { %p5309_p0 = scmp.ne.s32.totalorder %s7988_s0, %s5308_s23  ;;  %p5312_p1 = scmp.lt.u32.totalorder %s5308_s23, %s7988_s0 }
   0x4   :  { %p5314_p2 = pnand %p5312_p1, %p5309_p0 }
   0x6   :  { %5317 = shalt.err (!%p5314_p2)  }
   0x7   :  { %s5512_s28 = smov [#allocation3]  }
   0x8   :  { %12 = dma.hbm_to_smem %s7988_s0, 16, %s5512_s28, [#allocation2] }
   0x9   :  { %5478 = dma.done.wait [#allocation2], 16 }
   0xa   :  { %5479 = vsyncadd [#allocation2], 4294967280 }
   0xb   :  { %14 = sfence }
   0xc   :  { %15 = vsyncpa [#allocation5], 0 }
   0xd   :  { %17 = vsyncpa [#allocation5 + $0x1], 0 }
   0xe   :  { %18 = vsyncpa [#allocation7], 0 }
   0xf   :  { %20 = vsyncpa [#allocation7 + $0x1], 0 }
  0x10   :  { %21 = vsyncpa [#allocation10], 0  ;;  %s5572_s7 = smov 0   ;;  %s5574_s8 = smov 0  }
  0x11   :  { %s5576_s9 = smov 0   ;;  %s5578_s10 = smov 0  }
  0x12 LB: > { %s5591_s0 = sadd.s32 4294967295, %s5510_s10   ;;  %p47_p3 = scmp.ne.s32.totalorder %s5502_s8, %s5498_s7  ;;  %s5510_s10 = sphi %s5578_s10, %s8264_s10   ;;  %s5506_s9 = sphi %s5576_s9, %s8263_s9   ;;  %s5502_s8 = sphi %s5574_s8, %s8262_s8   ;;  %s5498_s7 = sphi %s5572_s7, %s8261_s7  }
  0x13   : > { %p7995_p4 = scmp.eq.s32.totalorder %s5591_s0, 0  ;;  %p3968_p5 = scmp.ge.s32.totalorder %s5510_s10, 1 }
  0x14   : > { %p173_p6 = scmp.lt.s32.totalorder %s5510_s10, 3  ;;  %s5513_s13 = smov [#allocation8]  }
  0x15   : > { %p5599_p7 = por %p7995_p4, %p47_p3  ;;  %s185_s14 = sshll.u32 %s5513_s13, 4  ;;  %s186_s14 = int_to_ptr.vmem [resolvable:$true] %s185_s14 }
  0x16   : > { %p5603_p8 = pnand %p3968_p5, %p173_p6  ;;  %s5514_s16 = smov [#allocation9]  }
  0x17   : > { %s8100_s11 = scalar_select %p5599_p7, 1, 0 }
  0x18   : > { %s8101_s12 = scalar_select %p5603_p8, 1, 0 }
  0x19   : > { %p4950_p9 = pneg %p5603_p8  ;;  %s198_s17 = sshll.u32 %s5514_s16, 4  ;;  %s5615_s17 = int_to_ptr.vmem [resolvable:$true] %s198_s17 }
  0x1a   : > { %s5318_s20 = scalar_lea.hbm %s7991_s3, 6144 }
  0x1b   : > { %p5611_p10 = pnand %p4950_p9, %p7995_p4  ;;  %p5319_p11 = scmp.ne.s32.totalorder %s7991_s3, %s5318_s20 }
  0x1c   : > { %p5325_p1 = scmp.lt.u32.totalorder %s5318_s20, %s7991_s3 }
  0x1d   : > { %p5625_p12 = pneg %p5611_p10 }
  0x1f   : > { %p5321_p13 = pnand %p5625_p12, %p5319_p11 }
  0x21   : > { %p5322_p0 = pneg %p5321_p13 }
  0x23   : > { %p5327_p2 = pnand %p5325_p1, %p5322_p0 }
  0x25   : > { %5330 = shalt.err (!%p5327_p2)
}
  0x26   : > { %s5331_s26 = scalar_lea.vmem %s186_s14, 6144  ;;  %p5339_p9 = scmp.lt.s32.totalorder %s186_s14, %s186_s14 }
  0x27   : > { %p5332_p3 = scmp.ne.s32.totalorder %s186_s14, %s5331_s26  ;;  %p5340_p4 = scmp.lt.s32.totalorder %s5331_s26, %s5331_s26 }
  0x29   : > { %p5334_p5 = pnand %p5332_p3, %p5625_p12  ;;  %p5341_p7 = por %p5340_p4, %p5339_p9 }
  0x2b   : > { %p5335_p6 = pneg %p5334_p5 }
  0x2d   : > { %p5342_p8 = pnand %p5341_p7, %p5335_p6 }
  0x2f   : > { %5345 = shalt.err (!%p5342_p8)
}
  0x30   : > { %s5515_s27 = smov 64   ;;  %s5516_s28 = smov 4  }
  0x31   : > { %4953 = dma.hbm_to_vmem [thread:$0]  (!%p5611_p10), %s7991_s3, 6144, %s186_s14, [#allocation7], %s5515_s27, %s5515_s27, %s5516_s28  }
  0x32   : > { %s5346_s16 = scalar_lea.hbm %s7992_s4, 256 }
  0x33   : > { %p5347_p11 = scmp.ne.s32.totalorder %s7992_s4, %s5346_s16  ;;  %p5353_p8 = scmp.lt.u32.totalorder %s5346_s16, %s7992_s4 }
  0x35   : > { %p5349_p4 = pnand %p5347_p11, %p5625_p12 }
  0x37   : > { %p5350_p7 = pneg %p5349_p4 }
  0x39   : > { %p5355_p13 = pnand %p5353_p8, %p5350_p7 }
  0x3b   : > { %5358 = shalt.err (!%p5355_p13)
}
  0x3c   : > { %s5359_s14 = scalar_lea.vmem %s5615_s17, 256  ;;  %p5367_p3 = scmp.lt.s32.totalorder %s5615_s17, %s5615_s17 }
  0x3d   : > { %p5360_p0 = scmp.ne.s32.totalorder %s5615_s17, %s5359_s14  ;;  %p5368_p5 = scmp.lt.s32.totalorder %s5359_s14, %s5359_s14 }
  0x3f   : > { %p5362_p1 = pnand %p5360_p0, %p5625_p12  ;;  %p5369_p6 = por %p5368_p5, %p5367_p3 }
  0x41   : > { %p5363_p2 = pneg %p5362_p1 }
  0x43   : > { %p5370_p9 = pnand %p5369_p6, %p5363_p2 }
  0x45   : > { %5373 = shalt.err (!%p5370_p9)
}
  0x46   : > { %s5517_s22 = smov 128   ;;  %s5518_s24 = smov 8  }
  0x47   : > { %4956 = dma.hbm_to_vmem [thread:$0]  (!%p5611_p10), %s7992_s4, 256, %s5615_s17, [#allocation10], %s5517_s22, %s5517_s22, %s5518_s24  }
  0x48   : > { %s5519_s27 = smov [#allocation11]   ;;  %s5668_s29 = sadd.s32 1, %s5510_s10  }
  0x49   : > { %s211_s28 = sshll.u32 %s5519_s27, 4  ;;  %s5374_s13 = scalar_lea.hbm %s7993_s5, 8192  ;;  %s212_s28 = int_to_ptr.vmem [resolvable:$true] %s211_s28 }
  0x4a   : > { %p5375_p11 = scmp.ne.s32.totalorder %s7993_s5, %s5374_s13  ;;  %p5381_p8 = scmp.lt.u32.totalorder %s5374_s13, %s7993_s5 }
  0x4c   : > { %p5377_p4 = pnand %p5375_p11, %p5625_p12 }
  0x4e   : > { %p5378_p7 = pneg %p5377_p4 }
  0x50   : > { %p5383_p13 = pnand %p5381_p8, %p5378_p7 }
  0x52   : > { %5386 = shalt.err (!%p5383_p13)
}
  0x53   : > { %s5387_s17 = scalar_lea.vmem %s212_s28, 8192  ;;  %p5395_p3 = scmp.lt.s32.totalorder %s212_s28, %s212_s28 }
  0x54   : > { %p5388_p0 = scmp.ne.s32.totalorder %s212_s28, %s5387_s17  ;;  %p5396_p5 = scmp.lt.s32.totalorder %s5387_s17, %s5387_s17 }
  0x56   : > { %p5390_p1 = pnand %p5388_p0, %p5625_p12  ;;  %p5397_p6 = por %p5396_p5, %p5395_p3 }
  0x58   : > { %p5391_p2 = pneg %p5390_p1 }
  0x5a   : > { %p5398_p9 = pnand %p5397_p6, %p5391_p2 }
  0x5c   : > { %5401 = shalt.err (!%p5398_p9)
}
  0x5d   : > { %4959 = dma.hbm_to_vmem [thread:$0]  (!%p5611_p10), %s7993_s5, 8192, %s212_s28, [#allocation10], %s5517_s22, %s5517_s22, %s5518_s24  }
  0x5e   : > { %s31_s23 = ssub.s32 %s5510_s10, %s5668_s29  ;;  %s34_s25 = sadd.s32 1, %s5506_s9 }
  0x5f   : > { %p32_p12 = scmp.eq.s32.totalorder %s31_s23, 0  ;;  %p41_p11 = scmp.ne.s32.totalorder %s5506_s9, %s5502_s8 }
  0x60   : > { %p42_p4 = scmp.eq.s32.totalorder %s5510_s10, 0  ;;  %p4970_p7 = scmp.lt.s32.totalorder %s5510_s10, 2 }
  0x61   : > { %s5699_s15 = scalar_select %p32_p12, %s5506_s9, %s34_s25  }
  0x62   : > { %p43_p8 = por %p42_p4, %p41_p11  ;;  %s225_s26 = sand.u32 1, %s5506_s9  }
  0x63   : > { %s3973_s27 = sshll.u32 %s225_s26, 7  ;;  %s4149_s30 = sshll.u32 %s5510_s10, 11 }
  0x64   : > { %s5706_s16 = scalar_lea.hbm %s7989_s1, %s4149_s30  ;;  %s229_s28 = scalar_lea.vmem [#allocation4], %s3973_s27 }
  0x65   : > { %s236_s18 = sshll.u32 %s229_s28, 4  ;;  %p5710_p10 = pnand %p4970_p7, %p43_p8  ;;  %s5708_s18 = int_to_ptr.vmem [resolvable:$true] %s236_s18 }
  0x66   : > { %s5717_s21 = scalar_lea.hbm %s7990_s2, %s4149_s30  ;;  %s250_s14 = scalar_lea.vmem [#allocation6], %s3973_s27 }
  0x67   : > { %s5719_s23 = sshll.u32 %s250_s14, 4  ;;  %s5721_s25 = scalar_lea.sflag [#allocation5], %s225_s26  ;;  %s5753_s23 = int_to_ptr.vmem [resolvable:$true] %s5719_s23 }
  0x68   : > { %s5402_s7 = scalar_lea.hbm %s5706_s16, 2048  ;;  %p5404_p0 = pneg %p5710_p10 }
  0x69   : > { %p5403_p13 = scmp.ne.s32.totalorder %s5706_s16, %s5402_s7  ;;  %s5407_s20 = scalar_lea.hbm %s7989_s1, 4096 }
  0x6a   : > { %p5408_p3 = scmp.lt.u32.totalorder %s5706_s16, %s7989_s1  ;;  %p5409_p5 = scmp.lt.u32.totalorder %s5407_s20, %s5402_s7 }
  0x6b   : > { %p5405_p1 = pnand %p5404_p0, %p5403_p13  ;;  %p5411_p9 = scmp.lt.u32.totalorder %s5402_s7, %s5706_s16 }
  0x6c   : > { %p5410_p6 = por %p5409_p5, %p5408_p3 }
  0x6d   : > { %p5406_p2 = pneg %p5405_p1 }
  0x6e   : > { %p5412_p12 = por %p5411_p9, %p5410_p6 }
  0x70   : > { %p5413_p11 = pnand %p5412_p12, %p5406_p2 }
  0x72   : > { %5416 = shalt.err (!%p5413_p11)
}
  0x73   : > { %s5417_s26 = scalar_lea.vmem %s5708_s18, 2048  ;;  %s5520_s27 = smov [#allocation4]  }
  0x74   : > { %p5418_p4 = scmp.ne.s32.totalorder %s5708_s18, %s5417_s26  ;;  %s5422_s14 = sshll.u32 %s5520_s27, 4  ;;  %s5423_s14 = int_to_ptr.vmem [resolvable:$false] %s5422_s14 }
  0x75   : > { %s5424_s13 = scalar_lea.vmem %s5423_s14, 4096  ;;  %p5425_p13 = scmp.lt.s32.totalorder %s5708_s18, %s5423_s14 }
  0x76   : > { %p5420_p7 = pnand %p5418_p4, %p5404_p0  ;;  %p5426_p1 = scmp.lt.s32.totalorder %s5424_s13, %s5417_s26 }
  0x78   : > { %p5421_p8 = pneg %p5420_p7  ;;  %p5427_p3 = por %p5426_p1, %p5425_p13 }
  0x7a   : > { %p5428_p5 = pnand %p5427_p3, %p5421_p8 }
  0x7c   : > { %5431 = shalt.err (!%p5428_p5)
}
  0x7d   : > { %4963 = dma.hbm_to_vmem [thread:$0]  (!%p5710_p10), %s5706_s16, 2048, %s5708_s18, %s5721_s25, %s5517_s22, %s5517_s22, %s5518_s24  }
  0x7e   : > { %s246_s7 = sand.u32 1, %s5510_s10   ;;  %s5432_s20 = scalar_lea.hbm %s5717_s21, 2048 }
  0x7f   : > { %s5756_s28 = scalar_lea.sflag [#allocation7], %s246_s7  ;;  %p5433_p2 = scmp.ne.s32.totalorder %s5717_s21, %s5432_s20 }
  0x80   : > { %s5437_s26 = scalar_lea.hbm %s7990_s2, 4096  ;;  %p5438_p12 = scmp.lt.u32.totalorder %s5717_s21, %s7990_s2 }
  0x81   : > { %p5435_p6 = pnand %p5433_p2, %p5404_p0  ;;  %p5439_p11 = scmp.lt.u32.totalorder %s5437_s26, %s5432_s20 }
  0x82   : > { %p5441_p7 = scmp.lt.u32.totalorder %s5432_s20, %s5717_s21 }
  0x83   : > { %p5436_p9 = pneg %p5435_p6  ;;  %p5440_p4 = por %p5439_p11, %p5438_p12 }
  0x85   : > { %p5442_p8 = por %p5441_p7, %p5440_p4 }
  0x87   : > { %p5443_p13 = pnand %p5442_p8, %p5436_p9 }
  0x89   : > { %5446 = shalt.err (!%p5443_p13)
}
  0x8a   : > { %s5447_s10 = scalar_lea.vmem %s5753_s23, 2048  ;;  %s5521_s16 = smov [#allocation6]  }
  0x8b   : > { %p5448_p1 = scmp.ne.s32.totalorder %s5753_s23, %s5447_s10  ;;  %s5452_s18 = sshll.u32 %s5521_s16, 4  ;;  %s5453_s18 = int_to_ptr.vmem [resolvable:$false] %s5452_s18 }
  0x8c   : > { %s5454_s25 = scalar_lea.vmem %s5453_s18, 4096  ;;  %p5455_p2 = scmp.lt.s32.totalorder %s5753_s23, %s5453_s18 }
  0x8d   : > { %p5450_p3 = pnand %p5448_p1, %p5404_p0  ;;  %p5456_p6 = scmp.lt.s32.totalorder %s5454_s25, %s5447_s10 }
  0x8f   : > { %p5451_p5 = pneg %p5450_p3  ;;  %p5457_p12 = por %p5456_p6, %p5455_p2 }
  0x91   : > { %p5458_p11 = pnand %p5457_p12, %p5451_p5 }
  0x93   : > { %5461 = shalt.err (!%p5458_p11)
}
  0x94   : > { %4966 = dma.hbm_to_vmem [thread:$0]  (!%p5710_p10), %s5717_s21, 2048, %s5753_s23, %s5756_s28, %s5517_s22, %s5517_s22, %s5518_s24  }
  0x95   : > { %p8105_p0 = scmp.ne.s32.totalorder %s8101_s12, 0 }
  0x97   : > { %269 = sbr.rel (%p8105_p0) target bundleno = 4574 (0x11de), region = 40 }
  0x9e   : > { %s271_s13 = sand.u32 1, %s5502_s8   ;;  %p8106_p9 = scmp.ne.s32.totalorder %s8100_s11, 0 }
  0x9f   : > { %s3980_s7 = sshll.u32 %s271_s13, 7  ;;  %s272_s20 = scalar_lea.sflag [#allocation5], %s271_s13 }
  0xa0   : > { %s5788_s17 = scalar_lea.vmem [#allocation4], %s3980_s7 }
  0xa1   : > { %5481 = dma.done.wait (%p8106_p9), %s272_s20, 2048  }
  0xa2   : > { %5483 = vsyncadd (%p8106_p9), %s272_s20, 4294965248  ;;  %s280_s19 = sand.u32 1, %s5591_s0   ;;  %s5795_s22 = scalar_lea.vmem [#allocation6], %s3980_s7 }
  0xa3   : > { %s281_s30 = scalar_lea.sflag [#allocation7], %s280_s19 }
  0xa4   : > { %5485 = dma.done.wait (%p8106_p9), %s281_s30, 2048  }
  0xa5   : > { %5487 = vsyncadd (%p8106_p9), %s281_s30, 4294965248  ;;  %p8107_p10 = scmp.eq.s32.totalorder %s5591_s0, 0 }
  0xa7   : > { %5489 = dma.done.wait (%p8107_p10), [#allocation7], 6144   ;;  %p8108_p4 = pmov %p8107_p10 }
  0xa9   : > { %5491 = vsyncadd (%p8108_p4), [#allocation7], 4294961152  ;;  %p8109_p7 = pmov %p8108_p4 }
  0xaa   : > { %p8110_p8 = pmov %p8108_p4 }
  0xab   : > { %5493 = dma.done.wait (%p8109_p7), [#allocation10], 8448  }
  0xac   : > { %5495 = vsyncadd (%p8110_p8), [#allocation10], 4294958848  ;;  %v333_v0 = vlaneseq  ;;  %s332_s11 = sld [smem:[#allocation3 + %s5591_s0]]  ;;  %v406_v3 = vld [vmem:[%s5795_s22 + $0x10] sm:$0xff]  ;;  %v404_v4 = vld [vmem:[%s5795_s22] sm:$0xff]  ;;  %v8026_v5 = vmov 0.0  }
  0xad   : > { %v407_v7 = vld [vmem:[%s5795_s22 + $0x18] sm:$0xff]  ;;  %v405_v8 = vld [vmem:[%s5795_s22 + $0x8] sm:$0xff]  ;;  %v518_v14 = vld [vmem:[%s5788_s17] sm:$0xff]  ;;  %vm965_vm1 = vcmask 1043459   ;;  %p328_p13 = scmp.lt.s32.totalorder %s5591_s0, 1 }
  0xae   : > { %v5811_v1 = vand.u32 127, %v333_v0  ;;  %v409_v13 = vld [vmem:[%s5795_s22 + $0x28] sm:$0xff]  ;;  %v408_v16 = vld [vmem:[%s5795_s22 + $0x20] sm:$0xff]  ;;  %v520_v17 = vld [vmem:[%s5788_s17 + $0x10] sm:$0xff] }
  0xaf   : > { %v519_v15 = vld [vmem:[%s5788_s17 + $0x8] sm:$0xff]  ;;  %v521_v18 = vld [vmem:[%s5788_s17 + $0x18] sm:$0xff]  ;;  %v522_v20 = vld [vmem:[%s5788_s17 + $0x20] sm:$0xff]  ;;  %s8266_s0 = smov (!%p328_p13, %s5591_s0), 1 }
  0xb0   : > { %v638_v19 = vpack.c.bf16 %v519_v15, %v518_v14  ;;  %v523_v21 = vld [vmem:[%s5788_s17 + $0x28] sm:$0xff]  ;;  %v411_v22 = vld [vmem:[%s5795_s22 + $0x38] sm:$0xff]  ;;  %v410_v23 = vld [vmem:[%s5795_s22 + $0x30] sm:$0xff]  ;;  %v5848_v24 = vpack.c.bf16 %v521_v18, %v520_v17  ;;  %s330_s21 = scalar_lea.vmem %s7994_s6, %s8266_s0 }
  0xb1   : > { %v413_v27 = vld [vmem:[%s5795_s22 + $0x48] sm:$0xff]  ;;  %v412_v28 = vld [vmem:[%s5795_s22 + $0x40] sm:$0xff]  ;;  %v5861_v29 = vpack.c.bf16 %v523_v21, %v522_v20  ;;  %v415_v32 = vld [vmem:[%s5795_s22 + $0x58] sm:$0xff] }
  0xb2   : > { %v5813_v2 = vstv %s332_s11  ;;  %4511 = vmatprep.subr.bf16.mxu0 %v638_v19  ;;  %883 = vmatprep.mubr.bf16.mxu1 %v638_v19  ;;  %v414_v33 = vld [vmem:[%s5795_s22 + $0x50] sm:$0xff]  ;;  %v525_v37 = vld [vmem:[%s5788_s17 + $0x38] sm:$0xff]  ;;  %v417_v38 = vld [vmem:[%s5795_s22 + $0x68] sm:$0xff] }
  0xb3   : > { %vm401_vm0 = vcmp.lt.s32.totalorder %v5811_v1, %v5813_v2  ;;  %4512 = vmatpush3.bf16.msra.mxu0 %v638_v19  ;;  %v524_v36 = vld [vmem:[%s5788_s17 + $0x30] sm:$0xff]  ;;  %v416_v39 = vld [vmem:[%s5795_s22 + $0x60] sm:$0xff]  ;;  %v527_v44 = vld [vmem:[%s5788_s17 + $0x48] sm:$0xff] }
  0xb4   : > { %v5820_v6 = vsel %vm401_vm0, 1.0, %v8026_v5  ;;  %4513 = vmatprep.subr.bf16.mxu0 %v5848_v24  ;;  %v5888_v40 = vpack.c.bf16 %v525_v37, %v524_v36  ;;  %v526_v43 = vld [vmem:[%s5788_s17 + $0x40] sm:$0xff]  ;;  %v419_v45 = vld [vmem:[%s5795_s22 + $0x78] sm:$0xff]  ;;  %v418_v46 = vld [vmem:[%s5795_s22 + $0x70] sm:$0xff] }
  0xb5   : > { %v5825_v9 = vmul.f32 %v5820_v6, %v406_v3  ;;  %v5828_v10 = vmul.f32 %v5820_v6, %v404_v4  ;;  %v5833_v11 = vmul.f32 %v5820_v6, %v407_v7  ;;  %v5836_v12 = vmul.f32 %v5820_v6, %v405_v8  ;;  %v528_v50 = vld [vmem:[%s5788_s17 + $0x50] sm:$0xff]  ;;  %v529_v51 = vld [vmem:[%s5788_s17 + $0x58] sm:$0xff]  ;;  %v530_v55 = vld [vmem:[%s5788_s17 + $0x60] sm:$0xff] }
  0xb6   : > { %v5853_v25 = vmul.f32 %v5820_v6, %v409_v13  ;;  %v5856_v26 = vmul.f32 %v5820_v6, %v408_v16  ;;  %v5866_v30 = vmul.f32 %v5820_v6, %v411_v22  ;;  %v5869_v31 = vmul.f32 %v5820_v6, %v410_v23  ;;  %v531_v56 = vld [vmem:[%s5788_s17 + $0x68] sm:$0xff]  ;;  %v532_v58 = vld [vmem:[%s5788_s17 + $0x70] sm:$0xff]  ;;  %v533_v59 = vld [vmem:[%s5788_s17 + $0x78] sm:$0xff] }
  0xb7   : > { %554 = vadd.xlane.f32.xlu1 %v5825_v9  ;;  %550 = vadd.xlane.f32.xlu0 %v5828_v10  ;;  %v5878_v34 = vmul.f32 %v5820_v6, %v413_v27  ;;  %v5881_v35 = vmul.f32 %v5820_v6, %v412_v28  ;;  %v5893_v41 = vmul.f32 %v5820_v6, %v415_v32  ;;  %v5017_v61 = vld [vmem:[#allocation8 + $0x40] sm:$0xff]   ;;  %v5019_v63 = vld [vmem:[#allocation8 + $0x48] sm:$0xff]   ;;  %v5021_v4 = vld [vmem:[#allocation8 + $0x50] sm:$0xff]  }
  0xb8   : > { %4514 = vmatpush3.bf16.msra.mxu0 %v5848_v24  ;;  %v5896_v42 = vmul.f32 %v5820_v6, %v414_v33  ;;  %v5904_v47 = vpack.c.bf16 %v527_v44, %v526_v43  ;;  %v5909_v48 = vmul.f32 %v5820_v6, %v417_v38  ;;  %v5912_v49 = vmul.f32 %v5820_v6, %v416_v39  ;;  %v5018_v62 = vld [vmem:[#allocation8] sm:$0xff]   ;;  %v5020_v3 = vld [vmem:[#allocation8 + $0x8] sm:$0xff]   ;;  %v5022_v7 = vld [vmem:[#allocation8 + $0x10] sm:$0xff]  }
  0xb9   : > { %4515 = vmatprep.subr.bf16.mxu0 %v5861_v29  ;;  %v5918_v52 = vpack.c.bf16 %v529_v51, %v528_v50  ;;  %v5923_v53 = vmul.f32 %v5820_v6, %v419_v45  ;;  %v5926_v54 = vmul.f32 %v5820_v6, %v418_v46  ;;  %v5932_v57 = vpack.c.bf16 %v531_v56, %v530_v55  ;;  %v5023_v8 = vld [vmem:[#allocation8 + $0x58] sm:$0xff]   ;;  %v5025_v14 = vld [vmem:[#allocation8 + $0x60] sm:$0xff]   ;;  %v5027_v16 = vld [vmem:[#allocation8 + $0x68] sm:$0xff]  }
  0xba   : > { %v5940_v60 = vpack.c.bf16 %v533_v59, %v532_v58  ;;  %4167 = vmatprep.subr.bf16.mxu1 %v5017_v61  ;;  %v5024_v13 = vld [vmem:[#allocation8 + $0x18] sm:$0xff]   ;;  %v5026_v15 = vld [vmem:[#allocation8 + $0x20] sm:$0xff]   ;;  %v5028_v17 = vld [vmem:[#allocation8 + $0x28] sm:$0xff]  }
  0xbb   : > { %556 = vadd.xlane.f32.xlu1 %v5833_v11  ;;  %552 = vadd.xlane.f32.xlu0 %v5836_v12  ;;  %v5029_v18 = vld [vmem:[#allocation8 + $0x70] sm:$0xff]  }
  0xbc   : > { %4516 = vmatpush3.bf16.msra.mxu0 %v5861_v29  ;;  %4168 = vmatpush3.bf16.msra.mxu1 %v5018_v62  ;;  %v5030_v19 = vld [vmem:[#allocation8 + $0x30] sm:$0xff]  }
  0xbd   : > { %4517 = vmatprep.subr.bf16.mxu0 %v5888_v40  ;;  %4169 = vmatprep.subr.bf16.mxu1 %v5019_v63 }
  0xbf   : > { %560 = vadd.xlane.f32.xlu1 %v5853_v25  ;;  %558 = vadd.xlane.f32.xlu0 %v5856_v26 }
  0xc0   : > { %4518 = vmatpush3.bf16.msra.mxu0 %v5888_v40  ;;  %4170 = vmatpush3.bf16.msra.mxu1 %v5020_v3 }
  0xc1   : > { %4519 = vmatprep.subr.bf16.mxu0 %v5904_v47  ;;  %4171 = vmatprep.subr.bf16.mxu1 %v5021_v4 }
  0xc3   : > { %564 = vadd.xlane.f32.xlu1 %v5866_v30  ;;  %562 = vadd.xlane.f32.xlu0 %v5869_v31 }
  0xc4   : > { %4520 = vmatpush3.bf16.msra.mxu0 %v5904_v47  ;;  %4172 = vmatpush3.bf16.msra.mxu1 %v5022_v7 }
  0xc5   : > { %4521 = vmatprep.subr.bf16.mxu0 %v5918_v52  ;;  %4173 = vmatprep.subr.bf16.mxu1 %v5023_v8 }
  0xc7   : > { %568 = vadd.xlane.f32.xlu1 %v5878_v34  ;;  %566 = vadd.xlane.f32.xlu0 %v5881_v35 }
  0xc8   : > { %4522 = vmatpush3.bf16.msra.mxu0 %v5918_v52  ;;  %4174 = vmatpush3.bf16.msra.mxu1 %v5024_v13 }
  0xc9   : > { %4523 = vmatprep.subr.bf16.mxu0 %v5932_v57  ;;  %4175 = vmatprep.subr.bf16.mxu1 %v5025_v14 }
  0xcb   : > { %572 = vadd.xlane.f32.xlu1 %v5893_v41  ;;  %570 = vadd.xlane.f32.xlu0 %v5896_v42 }
  0xcc   : > { %4524 = vmatpush3.bf16.msra.mxu0 %v5932_v57  ;;  %4176 = vmatpush3.bf16.msra.mxu1 %v5026_v15 }
  0xcd   : > { %4525 = vmatprep.subr.bf16.mxu0 %v5940_v60  ;;  %4177 = vmatprep.subr.bf16.mxu1 %v5027_v16 }
  0xcf   : > { %576 = vadd.xlane.f32.xlu1 %v5909_v48  ;;  %574 = vadd.xlane.f32.xlu0 %v5912_v49 }
  0xd0   : > { %4526 = vmatpush3.bf16.msra.mxu0 %v5940_v60  ;;  %4178 = vmatpush3.bf16.msra.mxu1 %v5028_v17 }
  0xd1   : > { %4179 = vmatprep.subr.bf16.mxu1 %v5029_v18 }
  0xd3   : > { %580 = vadd.xlane.f32.xlu1 %v5923_v53  ;;  %578 = vadd.xlane.f32.xlu0 %v5926_v54 }
  0xd4   : > { %4180 = vmatpush3.bf16.msra.mxu1 %v5030_v19 }
 0x144   : > { %v555_v20 = vpop.xlane.xlu1 %554  ;;  %v551_v21 = vpop.xlane.xlu0 %550 }
 0x145   : > { %v584_v22 = vmax.f32 %v555_v20, 1.0  ;;  %v582_v23 = vmax.f32 %v551_v21, 1.0 }
 0x147   : > { %5065 = vrcp.f32 %v584_v22 }
 0x148   : > { %v557_v27 = vpop.xlane.xlu1 %556  ;;  %v553_v28 = vpop.xlane.xlu0 %552  ;;  %5067 = vrcp.f32 %v582_v23 }
 0x149   : > { %v585_v32 = vmax.f32 %v557_v27, 1.0  ;;  %v583_v33 = vmax.f32 %v553_v28, 1.0 }
 0x14b   : > { %5069 = vrcp.f32 %v585_v32 }
 0x14c   : > { %5071 = vrcp.f32 %v583_v33  ;;  %v561_v36 = vpop.xlane.xlu1 %560  ;;  %v559_v37 = vpop.xlane.xlu0 %558 }
 0x14d   : > { %v587_v38 = vmax.f32 %v561_v36, 1.0  ;;  %v586_v39 = vmax.f32 %v559_v37, 1.0 }
 0x14f   : > { %5073 = vrcp.f32 %v587_v38 }
 0x150   : > { %5075 = vrcp.f32 %v586_v39  ;;  %v565_v43 = vpop.xlane.xlu1 %564  ;;  %v563_v44 = vpop.xlane.xlu0 %562 }
 0x151   : > { %v589_v45 = vmax.f32 %v565_v43, 1.0  ;;  %v588_v46 = vmax.f32 %v563_v44, 1.0  ;;  %v5066_v50 = vpop.eup %5065 }
 0x152   : > { %v5068_v51 = vpop.eup %5067  ;;  %v616_v63 = vmul.f32 %v5066_v50, %v5825_v9 }
 0x153   : > { %5077 = vrcp.f32 %v589_v45  ;;  %v614_v4 = vmul.f32 %v5068_v51, %v5828_v10 }
 0x154   : > { %5079 = vrcp.f32 %v588_v46  ;;  %v569_v55 = vpop.xlane.xlu1 %568  ;;  %v567_v56 = vpop.xlane.xlu0 %566 }
 0x155   : > { %v5070_v58 = vpop.eup %5069  ;;  %v591_v59 = vmax.f32 %v569_v55, 1.0  ;;  %v590_v61 = vmax.f32 %v567_v56, 1.0 }
 0x156   : > { %v5072_v62 = vpop.eup %5071  ;;  %v617_v3 = vmul.f32 %v5070_v58, %v5833_v11 }
 0x157   : > { %v615_v7 = vmul.f32 %v5072_v62, %v5836_v12  ;;  %5081 = vrcp.f32 %v591_v59 }
 0x158   : > { %v631_v8 = vpack.c.bf16 %v617_v3, %v616_v63  ;;  %5083 = vrcp.f32 %v590_v61  ;;  %v573_v13 = vpop.xlane.xlu1 %572  ;;  %v571_v14 = vpop.xlane.xlu0 %570  ;;  %v5031_v3 = vld [vmem:[#allocation8 + $0x78] sm:$0xff]  }
 0x159   : > { %v5074_v15 = vpop.eup %5073  ;;  %v630_v16 = vpack.c.bf16 %v615_v7, %v614_v4  ;;  %v593_v17 = vmax.f32 %v573_v13, 1.0  ;;  %v592_v18 = vmax.f32 %v571_v14, 1.0  ;;  %4181 = vmatprep.subr.bf16.mxu1 %v5031_v3  ;;  %v420_v4 = vld [vmem:[#allocation9] sm:$0xff] }
 0x15a   : > { %v5076_v19 = vpop.eup %5075  ;;  %v619_v20 = vmul.f32 %v5074_v15, %v5853_v25 }
 0x15b   : > { %4527 = vmatprep.mubr.bf16.mxu0 %v630_v16  ;;  %5085 = vrcp.f32 %v593_v17  ;;  %v618_v9 = vmul.f32 %v5076_v19, %v5856_v26 }
 0x15c   : > { %4528 = vmatmul.mubr.bf16.vlgmr.msra.gmra.mrb[0].mxu0 %v631_v8  ;;  %5087 = vrcp.f32 %v592_v18  ;;  %v577_v10 = vpop.xlane.xlu1 %576  ;;  %v575_v11 = vpop.xlane.xlu0 %574 }
 0x15d   : > { %v5078_v12 = vpop.eup %5077  ;;  %v632_v21 = vpack.c.bf16 %v619_v20, %v618_v9  ;;  %v595_v22 = vmax.f32 %v577_v10, 1.0  ;;  %v594_v23 = vmax.f32 %v575_v11, 1.0 }
 0x15e   : > { %v5080_v27 = vpop.eup %5079  ;;  %v621_v28 = vmul.f32 %v5078_v12, %v5866_v30 }
 0x15f   : > { %4531 = vmatprep.mubr.bf16.mxu0 %v632_v21  ;;  %v620_v32 = vmul.f32 %v5080_v27, %v5869_v31  ;;  %5089 = vrcp.f32 %v595_v22 }
 0x160   : > { %5091 = vrcp.f32 %v594_v23  ;;  %v581_v25 = vpop.xlane.xlu1 %580  ;;  %v579_v33 = vpop.xlane.xlu0 %578 }
 0x161   : > { %v5082_v36 = vpop.eup %5081  ;;  %v633_v26 = vpack.c.bf16 %v621_v28, %v620_v32  ;;  %v597_v37 = vmax.f32 %v581_v25, 1.0  ;;  %v596_v38 = vmax.f32 %v579_v33, 1.0 }
 0x162   : > { %v5084_v39 = vpop.eup %5083  ;;  %v623_v43 = vmul.f32 %v5082_v36, %v5878_v34 }
 0x163   : > { %5093 = vrcp.f32 %v597_v37  ;;  %v622_v44 = vmul.f32 %v5084_v39, %v5881_v35 }
 0x164   : > { %4532 = vmatmul.mubr.bf16.gmra.mrb[4].mxu0 %v633_v26  ;;  %5095 = vrcp.f32 %v596_v38 }
 0x165   : > { %v5086_v30 = vpop.eup %5085  ;;  %v634_v45 = vpack.c.bf16 %v623_v43, %v622_v44 }
 0x166   : > { %v5088_v46 = vpop.eup %5087  ;;  %v625_v31 = vmul.f32 %v5086_v30, %v5893_v41 }
 0x167   : > { %4535 = vmatprep.mubr.bf16.mxu0 %v634_v45  ;;  %v624_v50 = vmul.f32 %v5088_v46, %v5896_v42  ;;  %v5032_v42 = vld [vmem:[#allocation8 + $0x38] sm:$0xff]  }
 0x168   : > { %4182 = vmatpush3.bf16.msra.mxu1 %v5032_v42 }
 0x169   : > { %v5090_v51 = vpop.eup %5089  ;;  %v635_v55 = vpack.c.bf16 %v625_v31, %v624_v50 }
 0x16a   : > { %v5092_v56 = vpop.eup %5091  ;;  %v627_v58 = vmul.f32 %v5090_v51, %v5909_v48  ;;  %v5960_v48 = vmul.f32 %v420_v4, %v420_v4 }
 0x16b   : > { %v626_v34 = vmul.f32 %v5092_v56, %v5912_v49 }
 0x16c   : > { %4536 = vmatmul.mubr.bf16.gmra.mrb[8].mxu0 %v635_v55  ;;  %v966_v49 = vsel %vm965_vm1, %v5960_v48, 0.0 }
 0x16d   : > { %v5094_v59 = vpop.eup %5093  ;;  %v636_v35 = vpack.c.bf16 %v627_v58, %v626_v34  ;;  %967 = vadd.xlane.f32.xlu0 %v966_v49 }
 0x16e   : > { %v5096_v61 = vpop.eup %5095  ;;  %v629_v62 = vmul.f32 %v5094_v59, %v5923_v53 }
 0x16f   : > { %4539 = vmatprep.mubr.bf16.mxu0 %v636_v35  ;;  %v628_v63 = vmul.f32 %v5096_v61, %v5926_v54 }
 0x171   : > { %v637_v41 = vpack.c.bf16 %v629_v62, %v628_v63 }
 0x174   : > { %4540 = vmatmul.mubr.bf16.gmra.mrb[12].mxu0 %v637_v41 }
 0x22f   : > { %v4529_v7 = vpop.f32.mrb[0].mxu0 }
 0x230   : > { %v680_v8 = vpop.f32.mrb[1].mxu0 }
 0x231   : > { %v4530_v13 = vpop.f32.mrb[2].mxu0 }
 0x232   : > { %v744_v53 = vpack.c.bf16 %v4530_v13, %v4529_v7  ;;  %v683_v14 = vpop.f32.mrb[3].mxu0 }
 0x233   : > { %v743_v15 = vpack.c.bf16 %v683_v14, %v680_v8 }
 0x235   : > { %884 = vmatmul.mubr.bf16.vlgmr.msra.gmra.mrb[0].mxu1 %v743_v15 }
 0x236   : > { %891 = vmatprep.mubr.bf16.mxu1 %v5848_v24 }
 0x237   : > { %v4533_v54 = vpop.f32.mrb[4].mxu0 }
 0x238   : > { %v696_v16 = vpop.f32.mrb[5].mxu0 }
 0x239   : > { %v4534_v17 = vpop.f32.mrb[6].mxu0 }
 0x23a   : > { %v746_v18 = vpack.c.bf16 %v4534_v17, %v4533_v54  ;;  %v699_v19 = vpop.f32.mrb[7].mxu0 }
 0x23b   : > { %v745_v20 = vpack.c.bf16 %v699_v19, %v696_v16 }
 0x23d   : > { %892 = vmatmul.mubr.bf16.gmra.mrb[4].mxu1 %v744_v53 }
 0x23e   : > { %899 = vmatprep.mubr.bf16.mxu1 %v5861_v29  ;;  %v5971_v29 = vshrl.u32 %v333_v0, 7 }
 0x23f   : > { %v4537_v9 = vpop.f32.mrb[8].mxu0 }
 0x240   : > { %v712_v10 = vpop.f32.mrb[9].mxu0  ;;  %vm1110_vm2 = vcmp.lt.s32.totalorder %v5811_v1, %v5971_v29 }
 0x241   : > { %v4538_v11 = vpop.f32.mrb[10].mxu0 }
 0x242   : > { %v748_v12 = vpack.c.bf16 %v4538_v11, %v4537_v9  ;;  %v715_v21 = vpop.f32.mrb[11].mxu0 }
 0x243   : > { %v747_v22 = vpack.c.bf16 %v715_v21, %v712_v10 }
 0x245   : > { %900 = vmatmul.mubr.bf16.gmra.mrb[8].mxu1 %v745_v20 }
 0x246   : > { %907 = vmatprep.mubr.bf16.mxu1 %v5888_v40  ;;  %v5974_v40 = vsub.s32 0, %v5971_v29 }
 0x247   : > { %v4541_v23 = vpop.f32.mrb[12].mxu0 }
 0x248   : > { %v728_v24 = vpop.f32.mrb[13].mxu0  ;;  %v5977_v33 = vrot.slane %v420_v4, %v5974_v40 }
 0x249   : > { %v4542_v27 = vpop.f32.mrb[14].mxu0 }
 0x24a   : > { %v750_v28 = vpack.c.bf16 %v4542_v27, %v4541_v23  ;;  %v731_v32 = vpop.f32.mrb[15].mxu0 }
 0x24b   : > { %v749_v25 = vpack.c.bf16 %v731_v32, %v728_v24 }
 0x24d   : > { %908 = vmatmul.mubr.bf16.gmra.mrb[12].mxu1 %v746_v18 }
 0x24e   : > { %915 = vmatprep.mubr.bf16.mxu1 %v5904_v47  ;;  %v972_v47 = vsub.s32 3, %v5971_v29 }
 0x255   : > { %916 = vmatmul.mubr.bf16.gmra.mrb[16].mxu1 %v747_v22 }
 0x256   : > { %923 = vmatprep.mubr.bf16.mxu1 %v5918_v52 }
 0x25d   : > { %924 = vmatmul.mubr.bf16.gmra.mrb[20].mxu1 %v748_v12 }
 0x25e   : > { %931 = vmatprep.mubr.bf16.mxu1 %v5932_v57 }
 0x265   : > { %932 = vmatmul.mubr.bf16.gmra.mrb[24].mxu1 %v749_v25 }
 0x266   : > { %939 = vmatprep.mubr.bf16.mxu1 %v5940_v60  ;;  %v5982_v60 = vrot.slane %v420_v4, %v972_v47 }
 0x26d   : > { %940 = vmatmul.mubr.bf16.gmra.mrb[28].mxu1 %v750_v28 }
 0x308   : > { %v4183_v36 = vpop.f32.mrb[0].mxu1 }
 0x309   : > { %v4184_v52 = vpop.f32.mrb[1].mxu1 }
 0x30a   : > { %v4185_v26 = vadd.f32 %v4184_v52, %v4183_v36  ;;  %v4186_v37 = vpop.f32.mrb[2].mxu1 }
 0x30b   : > { %v4187_v57 = vpop.f32.mrb[3].mxu1 }
 0x30c   : > { %v5985_v0 = vadd.f32 %v4185_v26, %v5977_v33  ;;  %v4188_v38 = vadd.f32 %v4187_v57, %v4186_v37 }
 0x30e   : > { %v948_v39 = vmax.f32 %v5985_v0, 0.0  ;;  %v5989_v43 = vadd.f32 %v4188_v38, %v5977_v33 }
 0x310   : > { %v949_v44 = vmax.f32 %v5989_v43, 0.0  ;;  %v4189_v30 = vpop.f32.mrb[4].mxu1  ;;  %v974_v45 = vmul.f32 %v5982_v60, %v948_v39 }
 0x311   : > { %v4190_v46 = vpop.f32.mrb[5].mxu1 }
 0x312   : > { %v4191_v31 = vadd.f32 %v4190_v46, %v4189_v30  ;;  %v4192_v50 = vpop.f32.mrb[6].mxu1  ;;  %990 = vadd.xlane.f32.xlu1 %v974_v45  ;;  %v975_v51 = vmul.f32 %v5982_v60, %v949_v44 }
 0x313   : > { %v4193_v55 = vpop.f32.mrb[7].mxu1 }
 0x314   : > { %v5999_v56 = vadd.f32 %v4191_v31, %v5977_v33  ;;  %v4194_v58 = vadd.f32 %v4193_v55, %v4192_v50  ;;  %992 = vadd.xlane.f32.xlu0 %v975_v51 }
 0x316   : > { %v8019_v34 = vmax.f32 %v5999_v56, 0.0  ;;  %v6003_v59 = vadd.f32 %v4194_v58, %v5977_v33 }
 0x318   : > { %v8018_v35 = vmax.f32 %v6003_v59, 0.0  ;;  %v4195_v61 = vpop.f32.mrb[8].mxu1  ;;  %v976_v62 = vmul.f32 %v5982_v60, %v8019_v34 }
 0x319   : > { %v4196_v63 = vpop.f32.mrb[9].mxu1 }
 0x31a   : > { %v4197_v41 = vadd.f32 %v4196_v63, %v4195_v61  ;;  %994 = vadd.xlane.f32.xlu1 %v976_v62  ;;  %v4198_v3 = vpop.f32.mrb[10].mxu1  ;;  %v977_v42 = vmul.f32 %v5982_v60, %v8018_v35 }
 0x31b   : > { %v4199_v4 = vpop.f32.mrb[11].mxu1 }
 0x31c   : > { %v6013_v49 = vadd.f32 %v4197_v41, %v5977_v33  ;;  %v4200_v7 = vadd.f32 %v4199_v4, %v4198_v3  ;;  %996 = vadd.xlane.f32.xlu0 %v977_v42 }
 0x31e   : > { %v8017_v8 = vmax.f32 %v6013_v49, 0.0  ;;  %v6017_v13 = vadd.f32 %v4200_v7, %v5977_v33 }
 0x320   : > { %v8015_v53 = vmax.f32 %v6017_v13, 0.0  ;;  %v4201_v14 = vpop.f32.mrb[12].mxu1  ;;  %v978_v15 = vmul.f32 %v5982_v60, %v8017_v8 }
 0x321   : > { %v4202_v54 = vpop.f32.mrb[13].mxu1 }
 0x322   : > { %v4203_v16 = vadd.f32 %v4202_v54, %v4201_v14  ;;  %v4204_v17 = vpop.f32.mrb[14].mxu1  ;;  %998 = vadd.xlane.f32.xlu1 %v978_v15  ;;  %v979_v18 = vmul.f32 %v5982_v60, %v8015_v53  ;;  %v6348_v53 = vadd.s32 120, %v5971_v29 }
 0x323   : > { %v4205_v19 = vpop.f32.mrb[15].mxu1 }
 0x324   : > { %v6027_v20 = vadd.f32 %v4203_v16, %v5977_v33  ;;  %v4206_v9 = vadd.f32 %v4205_v19, %v4204_v17  ;;  %1000 = vadd.xlane.f32.xlu0 %v979_v18  ;;  %8112 = vst [vmem:[#allocation18_spill] sm:$0xff] %v6348_v53 }
 0x326   : > { %v8013_v10 = vmax.f32 %v6027_v20, 0.0  ;;  %v6031_v11 = vadd.f32 %v4206_v9, %v5977_v33 }
 0x328   : > { %v8011_v12 = vmax.f32 %v6031_v11, 0.0  ;;  %v4207_v21 = vpop.f32.mrb[16].mxu1  ;;  %v980_v22 = vmul.f32 %v5982_v60, %v8013_v10  ;;  %v6334_v10 = vadd.s32 112, %v5971_v29 }
 0x329   : > { %v4208_v23 = vpop.f32.mrb[17].mxu1 }
 0x32a   : > { %v4209_v24 = vadd.f32 %v4208_v23, %v4207_v21  ;;  %1002 = vadd.xlane.f32.xlu1 %v980_v22  ;;  %v4210_v27 = vpop.f32.mrb[18].mxu1  ;;  %v981_v28 = vmul.f32 %v5982_v60, %v8011_v12  ;;  %v6320_v12 = vadd.s32 104, %v5971_v29  ;;  %8111 = vst [vmem:[#allocation17_spill] sm:$0xff] %v6334_v10 }
 0x32b   : > { %v4211_v32 = vpop.f32.mrb[19].mxu1 }
 0x32c   : > { %v6041_v25 = vadd.f32 %v4209_v24, %v5977_v33  ;;  %v4212_v36 = vadd.f32 %v4211_v32, %v4210_v27  ;;  %1004 = vadd.xlane.f32.xlu0 %v981_v28 }
 0x32e   : > { %v8008_v52 = vmax.f32 %v6041_v25, 0.0  ;;  %v6045_v26 = vadd.f32 %v4212_v36, %v5977_v33 }
 0x330   : > { %v8007_v37 = vmax.f32 %v6045_v26, 0.0  ;;  %v4213_v57 = vpop.f32.mrb[20].mxu1  ;;  %v982_v38 = vmul.f32 %v5982_v60, %v8008_v52  ;;  %v6306_v52 = vadd.s32 96, %v5971_v29 }
 0x331   : > { %v4214_v30 = vpop.f32.mrb[21].mxu1 }
 0x332   : > { %v4215_v45 = vadd.f32 %v4214_v30, %v4213_v57  ;;  %v4216_v46 = vpop.f32.mrb[22].mxu1  ;;  %1006 = vadd.xlane.f32.xlu1 %v982_v38  ;;  %v983_v31 = vmul.f32 %v5982_v60, %v8007_v37  ;;  %v8021_v37 = vmov 0.0|0.0  }
 0x333   : > { %v4217_v50 = vpop.f32.mrb[23].mxu1  ;;  %4782 = vmatprep.subr.bf16.mxu0 %v8021_v37 }
 0x334   : > { %v6055_v51 = vadd.f32 %v4215_v45, %v5977_v33  ;;  %v4218_v55 = vadd.f32 %v4217_v50, %v4216_v46  ;;  %1008 = vadd.xlane.f32.xlu0 %v983_v31  ;;  %v968_v46 = vpop.xlane.xlu0 %967 }
 0x335   : > { %5097 = vrsqrt.f32 %v968_v46 }
 0x336   : > { %v8006_v58 = vmax.f32 %v6055_v51, 0.0  ;;  %v6059_v61 = vadd.f32 %v4218_v55, %v5977_v33 }
 0x338   : > { %v8003_v62 = vmax.f32 %v6059_v61, 0.0  ;;  %v4219_v63 = vpop.f32.mrb[24].mxu1  ;;  %v984_v41 = vmul.f32 %v5982_v60, %v8006_v58  ;;  %v6291_v58 = vadd.s32 88, %v5971_v29 }
 0x339   : > { %v4220_v3 = vpop.f32.mrb[25].mxu1 }
 0x33a   : > { %v4221_v42 = vadd.f32 %v4220_v3, %v4219_v63  ;;  %1010 = vadd.xlane.f32.xlu1 %v984_v41  ;;  %v4222_v4 = vpop.f32.mrb[26].mxu1  ;;  %v985_v7 = vmul.f32 %v5982_v60, %v8003_v62 }
 0x33b   : > { %v4223_v14 = vpop.f32.mrb[27].mxu1 }
 0x33c   : > { %v6069_v15 = vadd.f32 %v4221_v42, %v5977_v33  ;;  %v4224_v54 = vadd.f32 %v4223_v14, %v4222_v4  ;;  %1012 = vadd.xlane.f32.xlu0 %v985_v7 }
 0x33e   : > { %v8002_v16 = vmax.f32 %v6069_v15, 0.0  ;;  %v6073_v17 = vadd.f32 %v4224_v54, %v5977_v33 }
 0x33f   : > { %v5098_v31 = vpop.eup %5097 }
 0x340   : > { %v8000_v18 = vmax.f32 %v6073_v17, 0.0  ;;  %v4225_v19 = vpop.f32.mrb[28].mxu1  ;;  %v986_v9 = vmul.f32 %v5982_v60, %v8002_v16  ;;  %v6263_v16 = vadd.s32 72, %v5971_v29 }
 0x341   : > { %v4226_v21 = vpop.f32.mrb[29].mxu1 }
 0x342   : > { %v4227_v22 = vadd.f32 %v4226_v21, %v4225_v19  ;;  %v4228_v23 = vpop.f32.mrb[30].mxu1  ;;  %1014 = vadd.xlane.f32.xlu1 %v986_v9  ;;  %v987_v24 = vmul.f32 %v5982_v60, %v8000_v18  ;;  %v6249_v18 = vadd.s32 64, %v5971_v29 }
 0x343   : > { %v4229_v27 = vpop.f32.mrb[31].mxu1 }
 0x344   : > { %v6083_v28 = vadd.f32 %v4227_v22, %v5977_v33  ;;  %v4230_v32 = vadd.f32 %v4229_v27, %v4228_v23  ;;  %1016 = vadd.xlane.f32.xlu0 %v987_v24 }
 0x346   : > { %v7999_v36 = vmax.f32 %v6083_v28, 0.0  ;;  %v6087_v57 = vadd.f32 %v4230_v32, %v5977_v33  ;;  %v1025_v33 = vrot.slane %v5098_v31, %v972_v47 }
 0x348   : > { %v7998_v38 = vmax.f32 %v6087_v57, 0.0  ;;  %v988_v30 = vmul.f32 %v5982_v60, %v7999_v36  ;;  %v6235_v36 = vadd.s32 56, %v5971_v29 }
 0x34a   : > { %1018 = vadd.xlane.f32.xlu1 %v988_v30  ;;  %v989_v45 = vmul.f32 %v5982_v60, %v7998_v38  ;;  %v6221_v38 = vadd.s32 48, %v5971_v29 }
 0x34c   : > { %1020 = vadd.xlane.f32.xlu0 %v989_v45 }
 0x350   : > { %1238 = vadd.xlane.f32.xlu0 %v5820_v6 }
 0x39f   : > { %v991_v50 = vpop.xlane.xlu1 %990 }
 0x3a0   : > { %v6099_v55 = vmul.f32 %v1025_v33, %v991_v50 }
 0x3a1   : > { %v993_v63 = vpop.xlane.xlu0 %992 }
 0x3a2   : > { %1042 = vxpose.xlu1.b32.start [1/16] (narrow) %v6099_v55, 8  ;;  %v6102_v41 = vmul.f32 %v1025_v33, %v993_v63  ;;  %5099 = vtanh.f32 %v6099_v55 }
 0x3a4   : > { %5101 = vtanh.f32 %v6102_v41 }
 0x3a6   : > { %1043 = vxpose.xlu1.b32.cont [2/16] (narrow) %v6102_v41, 8 }
 0x3a7   : > { %v995_v60 = vpop.xlane.xlu1 %994 }
 0x3a8   : > { %v6105_v3 = vmul.f32 %v1025_v33, %v995_v60 }
 0x3a9   : > { %v997_v42 = vpop.xlane.xlu0 %996 }
 0x3aa   : > { %1044 = vxpose.xlu1.b32.cont [3/16] (narrow) %v6105_v3, 8  ;;  %v6108_v4 = vmul.f32 %v1025_v33, %v997_v42  ;;  %5103 = vtanh.f32 %v6105_v3 }
 0x3ac   : > { %5105 = vtanh.f32 %v6108_v4 }
 0x3ae   : > { %1045 = vxpose.xlu1.b32.cont [4/16] (narrow) %v6108_v4, 8 }
 0x3af   : > { %v999_v47 = vpop.xlane.xlu1 %998 }
 0x3b0   : > { %v6111_v7 = vmul.f32 %v1025_v33, %v999_v47 }
 0x3b1   : > { %v1001_v14 = vpop.xlane.xlu0 %1000 }
 0x3b2   : > { %1046 = vxpose.xlu1.b32.cont [5/16] (narrow) %v6111_v7, 8  ;;  %v6114_v54 = vmul.f32 %v1025_v33, %v1001_v14  ;;  %5107 = vtanh.f32 %v6111_v7 }
 0x3b4   : > { %5109 = vtanh.f32 %v6114_v54 }
 0x3b6   : > { %1047 = vxpose.xlu1.b32.cont [6/16] (narrow) %v6114_v54, 8 }
 0x3b7   : > { %v1003_v19 = vpop.xlane.xlu1 %1002 }
 0x3b8   : > { %v6117_v9 = vmul.f32 %v1025_v33, %v1003_v19 }
 0x3b9   : > { %v1005_v21 = vpop.xlane.xlu0 %1004 }
 0x3ba   : > { %1048 = vxpose.xlu1.b32.cont [7/16] (narrow) %v6117_v9, 8  ;;  %v6120_v22 = vmul.f32 %v1025_v33, %v1005_v21  ;;  %5111 = vtanh.f32 %v6117_v9 }
 0x3bc   : > { %5113 = vtanh.f32 %v6120_v22 }
 0x3be   : > { %1049 = vxpose.xlu1.b32.cont [8/16] (narrow) %v6120_v22, 8 }
 0x3bf   : > { %v1007_v23 = vpop.xlane.xlu1 %1006 }
 0x3c0   : > { %v6123_v24 = vmul.f32 %v1025_v33, %v1007_v23  ;;  %v6148_v23 = vadd.s32 8, %v5971_v29 }
 0x3c1   : > { %v1009_v27 = vpop.xlane.xlu0 %1008 }
 0x3c2   : > { %1050 = vxpose.xlu1.b32.cont [9/16] (narrow) %v6123_v24, 8  ;;  %v6126_v32 = vmul.f32 %v1025_v33, %v1009_v27  ;;  %vm1111_vm3 = vcmp.lt.s32.totalorder %v5811_v1, %v6148_v23  ;;  %5115 = vtanh.f32 %v6123_v24 }
 0x3c4   : > { %5117 = vtanh.f32 %v6126_v32 }
 0x3c6   : > { %1051 = vxpose.xlu1.b32.cont [10/16] (narrow) %v6126_v32, 8 }
 0x3c7   : > { %v1011_v30 = vpop.xlane.xlu1 %1010 }
 0x3c8   : > { %v6129_v45 = vmul.f32 %v1025_v33, %v1011_v30 }
 0x3c9   : > { %v1013_v46 = vpop.xlane.xlu0 %1012 }
 0x3ca   : > { %1052 = vxpose.xlu1.b32.cont [11/16] (narrow) %v6129_v45, 8  ;;  %v6132_v31 = vmul.f32 %v1025_v33, %v1013_v46  ;;  %v6156_v46 = vadd.s32 16, %v5971_v29  ;;  %5119 = vtanh.f32 %v6129_v45 }
 0x3cc   : > { %vm1112_vm11 = vcmp.lt.s32.totalorder %v5811_v1, %v6156_v46  ;;  %5121 = vtanh.f32 %v6132_v31 }
 0x3ce   : > { %1053 = vxpose.xlu1.b32.cont [12/16] (narrow) %v6132_v31, 8 }
 0x3cf   : > { %v1015_v50 = vpop.xlane.xlu1 %1014 }
 0x3d0   : > { %v6135_v63 = vmul.f32 %v1025_v33, %v1015_v50 }
 0x3d1   : > { %v1017_v60 = vpop.xlane.xlu0 %1016 }
 0x3d2   : > { %1054 = vxpose.xlu1.b32.cont [13/16] (narrow) %v6135_v63, 8  ;;  %v6138_v42 = vmul.f32 %v1025_v33, %v1017_v60  ;;  %5123 = vtanh.f32 %v6135_v63 }
 0x3d4   : > { %5125 = vtanh.f32 %v6138_v42 }
 0x3d6   : > { %1055 = vxpose.xlu1.b32.cont [14/16] (narrow) %v6138_v42, 8 }
 0x3d7   : > { %v1019_v47 = vpop.xlane.xlu1 %1018 }
 0x3d8   : > { %v6141_v14 = vmul.f32 %v1025_v33, %v1019_v47  ;;  %v6190_v47 = vadd.s32 32, %v5971_v29 }
 0x3d9   : > { %v1021_v19 = vpop.xlane.xlu0 %1020 }
 0x3da   : > { %1056 = vxpose.xlu1.b32.cont [15/16] (narrow) %v6141_v14, 8  ;;  %v6144_v21 = vmul.f32 %v1025_v33, %v1021_v19  ;;  %v6167_v33 = vadd.s32 24, %v5971_v29  ;;  %5127 = vtanh.f32 %v6141_v14 }
 0x3dc   : > { %vm1113_vm0 = vcmp.lt.s32.totalorder %v5811_v1, %v6167_v33  ;;  %5129 = vtanh.f32 %v6144_v21 }
 0x3de   : > { %1057 = vxpose.xlu1.b32.end [16/16] (narrow) %v6144_v21, 8 }
 0x422   : > { %v1058_v27 = vpop.trf.xlu1 }
 0x423   : > { %v6151_v30 = vrot.slane %v1058_v27, %v5974_v40 }
 0x425   : > { %vm1078_vm4 = vcmp.gt.f32.partialorder %v6151_v30, %v6099_v55  ;;  %vm1094_vm5 = vcmp.eq.f32.partialorder %v6151_v30, %v6099_v55  ;;  %vm1095_vm6 = vcmp.eq.f32.partialorder %v6151_v30, %v6102_v41  ;;  %vm1079_vm8 = vcmp.gt.f32.partialorder %v6151_v30, %v6102_v41 }
 0x426   : > { %vm1126_vm7 = vmand %vm1094_vm5, %vm1110_vm2  ;;  %vm1096_vm10 = vcmp.eq.f32.partialorder %v6151_v30, %v6105_v3  ;;  %vm1080_vm13 = vcmp.gt.f32.partialorder %v6151_v30, %v6105_v3  ;;  %vm1097_vm15 = vcmp.eq.f32.partialorder %v6151_v30, %v6108_v4  ;;  %vm1081_vm5 = vcmp.gt.f32.partialorder %v6151_v30, %v6108_v4 }
 0x427   : > { %vm1142_vm9 = vmor %vm1078_vm4, %vm1126_vm7  ;;  %vm1098_vm7 = vcmp.eq.f32.partialorder %v6151_v30, %v6111_v7 }
 0x428   : > { %v4018_v50 = vsel %vm1142_vm9, 1.0, %v8026_v5  ;;  %vm1127_vm12 = vmand %vm1095_vm6, %vm1111_vm3 }
 0x429   : > { %v1190_v60 = vmul.f32 %v4018_v50, %v5820_v6  ;;  %vm1143_vm14 = vmor %vm1079_vm8, %vm1127_vm12  ;;  %vm1114_vm8 = vcmp.lt.s32.totalorder %v5811_v1, %v6190_v47  ;;  %v6207_v50 = vadd.s32 40, %v5971_v29 }
 0x42a   : > { %v4019_v19 = vsel %vm1143_vm14, 1.0, %v8026_v5  ;;  %vm1128_vm1 = vmand %vm1096_vm10, %vm1112_vm11  ;;  %vm1082_vm10 = vcmp.gt.f32.partialorder %v6151_v30, %v6111_v7 }
 0x42b   : > { %1206 = vadd.xlane.f32.xlu0 %v1190_v60  ;;  %vm1144_vm4 = vmor %vm1080_vm13, %vm1128_vm1  ;;  %v1191_v27 = vmul.f32 %v4019_v19, %v5820_v6  ;;  %vm1099_vm13 = vcmp.eq.f32.partialorder %v6151_v30, %v6114_v54  ;;  %vm8099_vm14 = vcmp.lt.s32.totalorder %v5811_v1, %v6207_v50  ;;  %vm1083_vm1 = vcmp.gt.f32.partialorder %v6151_v30, %v6114_v54 }
 0x42c   : > { %vm1129_vm6 = vmand %vm1097_vm15, %vm1113_vm0  ;;  %v4020_v60 = vsel %vm1144_vm4, 1.0, %v8026_v5 }
 0x42d   : > { %vm1145_vm9 = vmor %vm1081_vm5, %vm1129_vm6  ;;  %v1192_v19 = vmul.f32 %v4020_v60, %v5820_v6  ;;  %vm1100_vm5 = vcmp.eq.f32.partialorder %v6151_v30, %v6117_v9  ;;  %vm8001_vm6 = vcmp.lt.s32.totalorder %v5811_v1, %v6221_v38 }
 0x42e   : > { %vm1130_vm12 = vmand %vm1098_vm7, %vm1114_vm8 }
 0x42f   : > { %1208 = vadd.xlane.f32.xlu0 %v1191_v27  ;;  %v4021_v27 = vsel %vm1145_vm9, 1.0, %v8026_v5  ;;  %vm1146_vm15 = vmor %vm1082_vm10, %vm1130_vm12  ;;  %vm1084_vm9 = vcmp.gt.f32.partialorder %v6151_v30, %v6117_v9  ;;  %vm1101_vm12 = vcmp.eq.f32.partialorder %v6151_v30, %v6120_v22 }
 0x430   : > { %vm1131_vm4 = vmand %vm1099_vm13, %vm8099_vm14  ;;  %v1193_v60 = vmul.f32 %v4021_v27, %v5820_v6  ;;  %vm8005_vm13 = vcmp.lt.s32.totalorder %v5811_v1, %v6235_v36 }
 0x431   : > { %vm1147_vm7 = vmor %vm1083_vm1, %vm1131_vm4  ;;  %vm1085_vm1 = vcmp.gt.f32.partialorder %v6151_v30, %v6120_v22 }
 0x432   : > { %vm1132_vm10 = vmand %vm1100_vm5, %vm8001_vm6  ;;  %vm1102_vm5 = vcmp.eq.f32.partialorder %v6151_v30, %v6123_v24  ;;  %vm8004_vm6 = vcmp.lt.s32.totalorder %v5811_v1, %v6249_v18 }
 0x433   : > { %1210 = vadd.xlane.f32.xlu0 %v1192_v19  ;;  %v4022_v19 = vsel %vm1146_vm15, 1.0, %v8026_v5  ;;  %vm1148_vm15 = vmor %vm1084_vm9, %vm1132_vm10  ;;  %vm1086_vm9 = vcmp.gt.f32.partialorder %v6151_v30, %v6123_v24 }
 0x434   : > { %v1194_v27 = vmul.f32 %v4022_v19, %v5820_v6  ;;  %vm1133_vm4 = vmand %vm1101_vm12, %vm8005_vm13  ;;  %vm1103_vm12 = vcmp.eq.f32.partialorder %v6151_v30, %v6126_v32  ;;  %vm1104_vm13 = vcmp.eq.f32.partialorder %v6151_v30, %v6129_v45 }
 0x435   : > { %vm1134_vm10 = vmand %vm1102_vm5, %vm8004_vm6 }
 0x437   : > { %1212 = vadd.xlane.f32.xlu0 %v1193_v60  ;;  %v4023_v60 = vsel %vm1147_vm7, 1.0, %v8026_v5  ;;  %vm1149_vm7 = vmor %vm1085_vm1, %vm1133_vm4  ;;  %vm1087_vm4 = vcmp.gt.f32.partialorder %v6151_v30, %v6126_v32 }
 0x438   : > { %v1195_v19 = vmul.f32 %v4023_v60, %v5820_v6  ;;  %v6272_v60 = vadd.s32 80, %v5971_v29  ;;  %vm1150_vm1 = vmor %vm1086_vm9, %vm1134_vm10  ;;  %vm1088_vm9 = vcmp.gt.f32.partialorder %v6151_v30, %v6129_v45 }
 0x43a   : > { %vm8009_vm6 = vcmp.lt.s32.totalorder %v5811_v1, %v6272_v60 }
 0x43b   : > { %1214 = vadd.xlane.f32.xlu0 %v1194_v27  ;;  %v4024_v27 = vsel %vm1148_vm15, 1.0, %v8026_v5  ;;  %vm8010_vm15 = vcmp.lt.s32.totalorder %v5811_v1, %v6263_v16  ;;  %vm1136_vm10 = vmand %vm1104_vm13, %vm8009_vm6  ;;  %vm1106_vm6 = vcmp.eq.f32.partialorder %v6151_v30, %v6135_v63 }
 0x43c   : > { %v1196_v62 = vmul.f32 %v4024_v27, %v5820_v6  ;;  %vm1135_vm5 = vmand %vm1103_vm12, %vm8010_vm15  ;;  %vm1105_vm12 = vcmp.eq.f32.partialorder %v6151_v30, %v6132_v31  ;;  %vm8014_vm15 = vcmp.lt.s32.totalorder %v5811_v1, %v6306_v52 }
 0x43f   : > { %1216 = vadd.xlane.f32.xlu0 %v1195_v19  ;;  %v4025_v19 = vsel %vm1149_vm7, 1.0, %v8026_v5  ;;  %vm1151_vm7 = vmor %vm1087_vm4, %vm1135_vm5  ;;  %vm1089_vm5 = vcmp.gt.f32.partialorder %v6151_v30, %v6132_v31 }
 0x440   : > { %v1197_v27 = vmul.f32 %v4025_v19, %v5820_v6  ;;  %vm1152_vm4 = vmor %vm1088_vm9, %vm1136_vm10  ;;  %vm1090_vm9 = vcmp.gt.f32.partialorder %v6151_v30, %v6135_v63 }
 0x441   : > { %vm1138_vm10 = vmand %vm1106_vm6, %vm8014_vm15  ;;  %vm8058_vm15 = vcmp.lt.s32.totalorder %v5811_v1, %v6334_v10 }
 0x443   : > { %1218 = vadd.xlane.f32.xlu0 %v1196_v62  ;;  %v4026_v62 = vsel %vm1150_vm1, 1.0, %v8026_v5  ;;  %vm8012_vm1 = vcmp.lt.s32.totalorder %v5811_v1, %v6291_v58 }
 0x444   : > { %v1198_v19 = vmul.f32 %v4026_v62, %v5820_v6  ;;  %vm1137_vm13 = vmand %vm1105_vm12, %vm8012_vm1  ;;  %vm1107_vm12 = vcmp.eq.f32.partialorder %v6151_v30, %v6138_v42  ;;  %vm8016_vm1 = vcmp.lt.s32.totalorder %v5811_v1, %v6320_v12 }
 0x445   : > { %vm1139_vm6 = vmand %vm1107_vm12, %vm8016_vm1  ;;  %vm1109_vm12 = vcmp.eq.f32.partialorder %v6151_v30, %v6144_v21  ;;  %vm8057_vm1 = vcmp.lt.s32.totalorder %v5811_v1, %v6348_v53 }
 0x447   : > { %1220 = vadd.xlane.f32.xlu0 %v1197_v27  ;;  %v4027_v27 = vsel %vm1151_vm7, 1.0, %v8026_v5  ;;  %vm1153_vm7 = vmor %vm1089_vm5, %vm1137_vm13  ;;  %vm1091_vm5 = vcmp.gt.f32.partialorder %v6151_v30, %v6138_v42  ;;  %vm1108_vm13 = vcmp.eq.f32.partialorder %v6151_v30, %v6141_v14 }
 0x448   : > { %v1199_v62 = vmul.f32 %v4027_v27, %v5820_v6 }
 0x44b   : > { %1222 = vadd.xlane.f32.xlu0 %v1198_v19  ;;  %v4028_v19 = vsel %vm1152_vm4, 1.0, %v8026_v5  ;;  %vm1154_vm4 = vmor %vm1090_vm9, %vm1138_vm10  ;;  %vm1092_vm9 = vcmp.gt.f32.partialorder %v6151_v30, %v6141_v14 }
 0x44c   : > { %v1200_v27 = vmul.f32 %v4028_v19, %v5820_v6  ;;  %vm1140_vm10 = vmand %vm1108_vm13, %vm8058_vm15 }
 0x44f   : > { %1224 = vadd.xlane.f32.xlu0 %v1199_v62  ;;  %v4029_v62 = vsel %vm1153_vm7, 1.0, %v8026_v5  ;;  %vm1155_vm7 = vmor %vm1091_vm5, %vm1139_vm6  ;;  %vm1093_vm5 = vcmp.gt.f32.partialorder %v6151_v30, %v6144_v21  ;;  %v1239_v30 = vpop.xlane.xlu0 %1238 }
 0x450   : > { %v1201_v19 = vmul.f32 %v4029_v62, %v5820_v6  ;;  %v4031_v8 = vsel %vm1155_vm7, 1.0, %v8026_v5  ;;  %vm1141_vm6 = vmand %vm1109_vm12, %vm8057_vm1  ;;  %vm8055_vm7 = vmmov 0   ;;  %vm354_vm12 = vcmp.lt.s32.totalorder %v6148_v23, %v5813_v2 }
 0x451   : > { %vm1157_vm13 = vmor %vm1093_vm5, %vm1141_vm6  ;;  %4575 = vmatprep.mubr.msk.f32.mxu0 %vm8055_vm7, %v8026_v5  ;;  %vm355_vm5 = vcmp.lt.s32.totalorder %v6156_v46, %v5813_v2 }
 0x452   : > { %v4033_v34 = vsel %vm1157_vm13, 1.0, %v8026_v5  ;;  %vm356_vm13 = vcmp.lt.s32.totalorder %v6167_v33, %v5813_v2 }
 0x453   : > { %1226 = vadd.xlane.f32.xlu0 %v1200_v27  ;;  %v4030_v27 = vsel %vm1154_vm4, 1.0, %v8026_v5  ;;  %vm1156_vm4 = vmor %vm1092_vm9, %vm1140_vm10  ;;  %vm353_vm9 = vcmp.lt.s32.totalorder %v5971_v29, %v5813_v2 }
 0x454   : > { %v1202_v62 = vmul.f32 %v4030_v27, %v5820_v6  ;;  %v4032_v27 = vsel %vm1156_vm4, 1.0, %v8026_v5 }
 0x455   : > { %v1204_v35 = vmul.f32 %v4032_v27, %v5820_v6 }
 0x457   : > { %1228 = vadd.xlane.f32.xlu0 %v1201_v19  ;;  %v1203_v19 = vmul.f32 %v4031_v8, %v5820_v6  ;;  %v1240_v8 = vmul.f32 0.5, %v1239_v30  ;;  %v3986_v30 = vsel %vm354_vm12, 1.0, %v8026_v5 }
 0x45b   : > { %1230 = vadd.xlane.f32.xlu0 %v1202_v62  ;;  %v1205_v62 = vmul.f32 %v4033_v34, %v5820_v6  ;;  %v5100_v34 = vpop.eup %5099 }
 0x45c   : > { %v5102_v41 = vpop.eup %5101 }
 0x45f   : > { %1232 = vadd.xlane.f32.xlu0 %v1203_v19  ;;  %v6376_v19 = vceil.f32 %v1240_v8  ;;  %v1358_v8 = vmul.f32 %v5100_v34, %v948_v39  ;;  %v5104_v39 = vpop.eup %5103 }
 0x460   : > { %v5106_v34 = vpop.eup %5105 }
 0x463   : > { %1234 = vadd.xlane.f32.xlu0 %v1204_v35  ;;  %v3985_v35 = vsel %vm353_vm9, 1.0, %v8026_v5 }
 0x467   : > { %1236 = vadd.xlane.f32.xlu0 %v1205_v62 }
 0x4b8   : > { %v1207_v27 = vpop.xlane.xlu0 %1206 }
 0x4b9   : > { %vm1242_vm10 = vcmp.lt.f32.partialorder %v1207_v27, %v6376_v19  ;;  %v1359_v27 = vmul.f32 %v5102_v41, %v949_v44 }
 0x4ba   : > { %v4034_v6 = vsel %vm1242_vm10, 1.0, %v8026_v5  ;;  %vm357_vm10 = vcmp.lt.s32.totalorder %v6190_v47, %v5813_v2 }
 0x4bb   : > { %v6387_v55 = vmul.f32 %v4034_v6, %v3985_v35  ;;  %v3987_v6 = vsel %vm355_vm5, 1.0, %v8026_v5 }
 0x4bc   : > { %v1209_v62 = vpop.xlane.xlu0 %1208 }
 0x4bd   : > { %8113 = vst [vmem:[#allocation19_spill] sm:$0xff] %v6387_v55  ;;  %vm1243_vm4 = vcmp.lt.f32.partialorder %v1209_v62, %v6376_v19  ;;  %1306 = vxpose.xlu0.b32.start [1/16] (narrow) %v6387_v55, 8  ;;  %v1374_v7 = vmul.f32 %v1358_v8, %v6387_v55  ;;  %v8115_v8 = vmax.f32 %v5999_v56, 0.0  ;;  %vm1390_vm5 = vcmp.gt.f32.partialorder %v6387_v55, 0.5 }
 0x4be   : > { %v4035_v3 = vsel %vm1243_vm4, 1.0, %v8026_v5  ;;  %vm358_vm4 = vcmp.lt.s32.totalorder %v6207_v50, %v5813_v2 }
 0x4bf   : > { %v6396_v4 = vmul.f32 %v4035_v3, %v3986_v30  ;;  %v3988_v30 = vsel %vm356_vm13, 1.0, %v8026_v5  ;;  %v1360_v9 = vmul.f32 %v5104_v39, %v8115_v8 }
 0x4c0   : > { %v1211_v35 = vpop.xlane.xlu0 %1210 }
 0x4c1   : > { %vm1244_vm6 = vcmp.lt.f32.partialorder %v1211_v35, %v6376_v19  ;;  %1307 = vxpose.xlu0.b32.cont [2/16] (narrow) %v6396_v4, 8  ;;  %v6409_v62 = vmul.f32 %v1359_v27, %v6396_v4  ;;  %v8116_v27 = vmax.f32 %v6003_v59, 0.0 }
 0x4c2   : > { %v4036_v0 = vsel %vm1244_vm6, 1.0, %v8026_v5 }
 0x4c3   : > { %v6413_v43 = vmul.f32 %v4036_v0, %v3987_v6  ;;  %v6416_v44 = vpack.c.bf16 %v6409_v62, %v1374_v7  ;;  %v1361_v35 = vmul.f32 %v5106_v34, %v8116_v27  ;;  %v5108_v6 = vpop.eup %5107  ;;  %v8118_v34 = vmax.f32 %v6013_v49, 0.0 }
 0x4c4   : > { %v1213_v41 = vpop.xlane.xlu0 %1212  ;;  %v5110_v27 = vpop.eup %5109 }
 0x4c5   : > { %vm1245_vm9 = vcmp.lt.f32.partialorder %v1213_v41, %v6376_v19  ;;  %1308 = vxpose.xlu0.b32.cont [3/16] (narrow) %v6413_v43, 8  ;;  %4784 = vmatpush3.bf16.msra.mxu0 %v6416_v44  ;;  %v3989_v41 = vsel %vm357_vm10, 1.0, %v8026_v5  ;;  %v1362_v8 = vmul.f32 %v5108_v6, %v8118_v34  ;;  %v5112_v24 = vpop.eup %5111  ;;  %v6464_v6 = vsel %vm1390_vm5, %v1374_v7, -1e+30 }
 0x4c6   : > { %v4037_v54 = vsel %vm1245_vm9, 1.0, %v8026_v5  ;;  %1905 = vmatprep.mubr.bf16.mxu1 %v6416_v44  ;;  %4785 = vmatprep.subr.bf16.mxu0 %v8021_v37  ;;  %vm359_vm9 = vcmp.lt.s32.totalorder %v6221_v38, %v5813_v2  ;;  %vm1391_vm10 = vcmp.gt.f32.partialorder %v6396_v4, 0.5  ;;  %vm360_vm5 = vcmp.lt.s32.totalorder %v6235_v36, %v5813_v2 }
 0x4c7   : > { %v6428_v3 = vmul.f32 %v4037_v54, %v3988_v30  ;;  %v1376_v30 = vmul.f32 %v1360_v9, %v6413_v43  ;;  %v3991_v55 = vsel %vm359_vm9, 1.0, %v8026_v5  ;;  %v3992_v32 = vsel %vm360_vm5, 1.0, %v8026_v5 }
 0x4c8   : > { %v1215_v0 = vpop.xlane.xlu0 %1214 }
 0x4c9   : > { %8114 = vst [vmem:[#allocation20_spill] sm:$0xff] %v6428_v3  ;;  %vm1246_vm12 = vcmp.lt.f32.partialorder %v1215_v0, %v6376_v19  ;;  %1309 = vxpose.xlu0.b32.cont [4/16] (narrow) %v6428_v3, 8  ;;  %v6441_v54 = vmul.f32 %v1361_v35, %v6428_v3  ;;  %v3990_v35 = vsel %vm358_vm4, 1.0, %v8026_v5 }
 0x4ca   : > { %v4038_v56 = vsel %vm1246_vm12, 1.0, %v8026_v5 }
 0x4cb   : > { %v6445_v59 = vmul.f32 %v4038_v56, %v3989_v41  ;;  %v6448_v39 = vpack.c.bf16 %v6441_v54, %v1376_v30  ;;  %v8120_v41 = vmax.f32 %v6017_v13, 0.0 }
 0x4cc   : > { %v1217_v9 = vpop.xlane.xlu0 %1216 }
 0x4cd   : > { %8117 = vst [vmem:[#allocation21_spill] sm:$0xff] %v6445_v59  ;;  %vm1394_vm6 = vcmp.gt.f32.partialorder %v6445_v59, 0.5  ;;  %vm1247_vm13 = vcmp.lt.f32.partialorder %v1217_v9, %v6376_v19  ;;  %1310 = vxpose.xlu0.b32.cont [5/16] (narrow) %v6445_v59, 8  ;;  %4787 = vmatpush3.bf16.msra.mxu0 %v6448_v39  ;;  %v1378_v49 = vmul.f32 %v1362_v8, %v6445_v59 }
 0x4ce   : > { %v4039_v22 = vsel %vm1247_vm13, 1.0, %v8026_v5  ;;  %4788 = vmatprep.subr.bf16.mxu0 %v8021_v37  ;;  %v1363_v56 = vmul.f32 %v5110_v27, %v8120_v41  ;;  %v8121_v27 = vmax.f32 %v6027_v20, 0.0  ;;  %v5114_v37 = vpop.eup %5113 }
 0x4cf   : > { %v6466_v0 = vmul.f32 %v4039_v22, %v3990_v35  ;;  %v6470_v34 = vsel %vm1394_vm6, %v1378_v49, -1e+30  ;;  %v6487_v22 = vsel %vm1391_vm10, %v6409_v62, -1e+30  ;;  %vm1392_vm6 = vcmp.gt.f32.partialorder %v6413_v43, 0.5 }
 0x4d0   : > { %v1219_v9 = vpop.xlane.xlu0 %1218  ;;  %v1364_v35 = vmul.f32 %v5112_v24, %v8121_v27  ;;  %vm361_vm10 = vcmp.lt.s32.totalorder %v6249_v18, %v5813_v2  ;;  %v6509_v24 = vsel %vm1392_vm6, %v1376_v30, -1e+30  ;;  %vm362_vm6 = vcmp.lt.s32.totalorder %v6263_v16, %v5813_v2 }
 0x4d1   : > { %8119 = vst [vmem:[#allocation22_spill] sm:$0xff] %v6466_v0  ;;  %vm1395_vm12 = vcmp.gt.f32.partialorder %v6466_v0, 0.5  ;;  %vm1248_vm4 = vcmp.lt.f32.partialorder %v1219_v9, %v6376_v19  ;;  %1311 = vxpose.xlu0.b32.cont [6/16] (narrow) %v6466_v0, 8  ;;  %v1379_v13 = vmul.f32 %v1363_v56, %v6466_v0  ;;  %v8126_v30 = vmax.f32 %v6041_v25, 0.0 }
 0x4d2   : > { %v4040_v7 = vsel %vm1248_vm4, 1.0, %v8026_v5 }
 0x4d3   : > { %v6489_v41 = vmul.f32 %v4040_v7, %v3991_v55  ;;  %v6491_v9 = vsel %vm1395_vm12, %v1379_v13, -1e+30  ;;  %v6493_v8 = vpack.c.bf16 %v1379_v13, %v1378_v49  ;;  %v5116_v55 = vpop.eup %5115  ;;  %v8123_v49 = vmov 0.0|0.0  }
 0x4d4   : > { %v1221_v56 = vpop.xlane.xlu0 %1220  ;;  %v8125_v7 = vmax.f32 %v6031_v11, 0.0  ;;  %vm1393_vm12 = vcmp.gt.f32.partialorder %v6428_v3, 0.5 }
 0x4d5   : > { %8122 = vst [vmem:[#allocation23_spill] sm:$0xff] %v6489_v41  ;;  %vm1396_vm13 = vcmp.gt.f32.partialorder %v6489_v41, 0.5  ;;  %vm1249_vm9 = vcmp.lt.f32.partialorder %v1221_v56, %v6376_v19  ;;  %1312 = vxpose.xlu0.b32.cont [7/16] (narrow) %v6489_v41, 8  ;;  %4790 = vmatpush3.bf16.msra.mxu0 %v6493_v8  ;;  %v1380_v20 = vmul.f32 %v1364_v35, %v6489_v41  ;;  %v3993_v35 = vsel %vm361_vm10, 1.0, %v8026_v5  ;;  %v5118_v41 = vpop.eup %5117 }
 0x4d6   : > { %v4041_v62 = vsel %vm1249_vm9, 1.0, %v8026_v5  ;;  %4791 = vmatprep.subr.bf16.mxu0 %v8123_v49  ;;  %v1365_v27 = vmul.f32 %v5114_v37, %v8125_v7  ;;  %vm363_vm10 = vcmp.lt.s32.totalorder %v6272_v60, %v5813_v2 }
 0x4d7   : > { %v6511_v13 = vmul.f32 %v4041_v62, %v3992_v32  ;;  %v6515_v56 = vsel %vm1396_vm13, %v1380_v20, -1e+30  ;;  %v1366_v32 = vmul.f32 %v5116_v55, %v8126_v30  ;;  %v6532_v62 = vsel %vm1393_vm12, %v6441_v54, -1e+30 }
 0x4d8   : > { %v1223_v0 = vpop.xlane.xlu0 %1222  ;;  %v8129_v55 = vmax.f32 %v6045_v26, 0.0  ;;  %v3995_v30 = vsel %vm363_vm10, 1.0, %v8026_v5 }
 0x4d9   : > { %8124 = vst [vmem:[#allocation24_spill] sm:$0xff] %v6511_v13  ;;  %vm1397_vm4 = vcmp.gt.f32.partialorder %v6511_v13, 0.5  ;;  %vm1250_vm5 = vcmp.lt.f32.partialorder %v1223_v0, %v6376_v19  ;;  %1313 = vxpose.xlu0.b32.cont [8/16] (narrow) %v6511_v13, 8  ;;  %v1381_v11 = vmul.f32 %v1365_v27, %v6511_v13  ;;  %v3994_v27 = vsel %vm362_vm6, 1.0, %v8026_v5 }
 0x4da   : > { %v4042_v37 = vsel %vm1250_vm5, 1.0, %v8026_v5  ;;  %vm364_vm5 = vcmp.lt.s32.totalorder %v6291_v58, %v5813_v2 }
 0x4db   : > { %v6534_v7 = vmul.f32 %v4042_v37, %v3993_v35  ;;  %v6536_v0 = vsel %vm1397_vm4, %v1381_v11, -1e+30  ;;  %v6538_v45 = vpack.c.bf16 %v1381_v11, %v1380_v20  ;;  %v5120_v11 = vpop.eup %5119 }
 0x4dc   : > { %v1225_v59 = vpop.xlane.xlu0 %1224  ;;  %v1457_v31 = vmax.f32 %v6532_v62, %v6536_v0  ;;  %v8130_v62 = vmax.f32 %v6464_v6, %v6470_v34  ;;  %v8132_v0 = vmax.f32 %v6055_v51, 0.0 }
 0x4dd   : > { %8127 = vst [vmem:[#allocation25_spill] sm:$0xff] %v6534_v7  ;;  %vm1398_vm13 = vcmp.gt.f32.partialorder %v6534_v7, 0.5  ;;  %vm1251_vm9 = vcmp.lt.f32.partialorder %v1225_v59, %v6376_v19  ;;  %1314 = vxpose.xlu0.b32.cont [9/16] (narrow) %v6534_v7, 8  ;;  %4793 = vmatpush3.bf16.msra.mxu0 %v6538_v45  ;;  %v1382_v25 = vmul.f32 %v1366_v32, %v6534_v7 }
 0x4de   : > { %v4043_v54 = vsel %vm1251_vm9, 1.0, %v8026_v5  ;;  %4794 = vmatprep.subr.bf16.mxu0 %v8123_v49  ;;  %v1367_v59 = vmul.f32 %v5118_v41, %v8129_v55  ;;  %vm365_vm9 = vcmp.lt.s32.totalorder %v6306_v52, %v5813_v2 }
 0x4df   : > { %v6553_v20 = vmul.f32 %v4043_v54, %v3994_v27  ;;  %v1446_v35 = vsel %vm1398_vm13, %v1382_v25, -1e+30  ;;  %v1368_v27 = vmul.f32 %v5120_v11, %v8132_v0  ;;  %v5122_v54 = vpop.eup %5121 }
 0x4e0   : > { %v1227_v37 = vpop.xlane.xlu0 %1226  ;;  %v6561_v32 = vmax.f32 %v8130_v62, %v1446_v35  ;;  %v3996_v35 = vsel %vm364_vm5, 1.0, %v8026_v5 }
 0x4e1   : > { %8128 = vst [vmem:[#allocation26_spill] sm:$0xff] %v6553_v20  ;;  %vm1399_vm12 = vcmp.gt.f32.partialorder %v6553_v20, 0.5  ;;  %vm1252_vm4 = vcmp.lt.f32.partialorder %v1227_v37, %v6376_v19  ;;  %1315 = vxpose.xlu0.b32.cont [10/16] (narrow) %v6553_v20, 8  ;;  %v1383_v26 = vmul.f32 %v1367_v59, %v6553_v20  ;;  %v8133_v37 = vmax.f32 %v6487_v22, %v6491_v9 }
 0x4e2   : > { %v4044_v63 = vsel %vm1252_vm4, 1.0, %v8026_v5  ;;  %v8135_v9 = vmax.f32 %v6059_v61, 0.0  ;;  %vm366_vm4 = vcmp.lt.s32.totalorder %v6320_v12, %v5813_v2 }
 0x4e3   : > { %v6571_v41 = vmul.f32 %v4044_v63, %v3995_v30  ;;  %v1447_v6 = vsel %vm1399_vm12, %v1383_v26, -1e+30  ;;  %v6573_v34 = vpack.c.bf16 %v1383_v26, %v1382_v25  ;;  %v5124_v30 = vpop.eup %5123  ;;  %v3997_v26 = vsel %vm365_vm9, 1.0, %v8026_v5 }
 0x4e4   : > { %v1229_v55 = vpop.xlane.xlu0 %1228  ;;  %v6581_v59 = vmax.f32 %v8133_v37, %v1447_v6  ;;  %v1369_v25 = vmul.f32 %v5122_v54, %v8135_v9  ;;  %v8136_v63 = vmax.f32 %v6509_v24, %v6515_v56  ;;  %v3998_v37 = vsel %vm366_vm4, 1.0, %v8026_v5 }
 0x4e5   : > { %8131 = vst [vmem:[#allocation27_spill] sm:$0xff] %v6571_v41  ;;  %vm1400_vm6 = vcmp.gt.f32.partialorder %v6571_v41, 0.5  ;;  %vm1253_vm13 = vcmp.lt.f32.partialorder %v1229_v55, %v6376_v19  ;;  %1316 = vxpose.xlu0.b32.cont [11/16] (narrow) %v6571_v41, 8  ;;  %4796 = vmatpush3.bf16.msra.mxu0 %v6573_v34  ;;  %v1384_v51 = vmul.f32 %v1368_v27, %v6571_v41  ;;  %v8138_v27 = vmax.f32 %v6069_v15, 0.0  ;;  %v5126_v55 = vpop.eup %5125 }
 0x4e6   : > { %v4045_v42 = vsel %vm1253_vm13, 1.0, %v8026_v5  ;;  %4797 = vmatprep.subr.bf16.mxu0 %v8123_v49  ;;  %vm367_vm13 = vcmp.lt.s32.totalorder %v6334_v10, %v5813_v2 }
 0x4e7   : > { %v6593_v22 = vmul.f32 %v4045_v42, %v3996_v35  ;;  %v1448_v11 = vsel %vm1400_vm6, %v1384_v51, -1e+30  ;;  %v1370_v54 = vmul.f32 %v5124_v30, %v8138_v27 }
 0x4e8   : > { %v1231_v62 = vpop.xlane.xlu0 %1230  ;;  %v6601_v6 = vmax.f32 %v8136_v63, %v1448_v11  ;;  %v5128_v11 = vpop.eup %5127 }
 0x4e9   : > { %8134 = vst [vmem:[#allocation28_spill] sm:$0xff] %v6593_v22  ;;  %vm1401_vm10 = vcmp.gt.f32.partialorder %v6593_v22, 0.5  ;;  %vm1254_vm12 = vcmp.lt.f32.partialorder %v1231_v62, %v6376_v19  ;;  %1317 = vxpose.xlu0.b32.cont [12/16] (narrow) %v6593_v22, 8  ;;  %v1385_v61 = vmul.f32 %v1369_v25, %v6593_v22  ;;  %v3999_v62 = vsel %vm367_vm13, 1.0, %v8026_v5  ;;  %v5044_v22 = vld [vmem:[#allocation8 + $0xa8] sm:$0xff]  }
 0x4ea   : > { %v4046_v14 = vsel %vm1254_vm12, 1.0, %v8026_v5  ;;  %vm368_vm12 = vcmp.lt.s32.totalorder %v6348_v53, %v5813_v2  ;;  %vm1986_vm13 = vcmask 1044484  }
 0x4eb   : > { %v6611_v0 = vmul.f32 %v4046_v14, %v3997_v26  ;;  %v1449_v24 = vsel %vm1401_vm10, %v1385_v61, -1e+30  ;;  %v6613_v56 = vpack.c.bf16 %v1385_v61, %v1384_v51 }
 0x4ec   : > { %v1233_v35 = vpop.xlane.xlu0 %1232  ;;  %v1461_v42 = vmax.f32 %v1457_v31, %v1449_v24  ;;  %v8140_v31 = vmax.f32 %v6073_v17, 0.0 }
 0x4ed   : > { %8137 = vst [vmem:[#allocation29_spill] sm:$0xff] %v6611_v0  ;;  %vm1402_vm5 = vcmp.gt.f32.partialorder %v6611_v0, 0.5  ;;  %vm1255_vm6 = vcmp.lt.f32.partialorder %v1233_v35, %v6376_v19  ;;  %1318 = vxpose.xlu0.b32.cont [13/16] (narrow) %v6611_v0, 8  ;;  %4799 = vmatpush3.bf16.msra.mxu0 %v6613_v56  ;;  %v1386_v21 = vmul.f32 %v1370_v54, %v6611_v0  ;;  %v5130_v54 = vpop.eup %5129  ;;  %v4000_v35 = vsel %vm368_vm12, 1.0, %v8026_v5  ;;  %v5043_v0 = vld [vmem:[#allocation8 + $0xe8] sm:$0xff]  }
 0x4ee   : > { %v4047_v15 = vsel %vm1255_vm6, 1.0, %v8026_v5  ;;  %4800 = vmatprep.subr.bf16.mxu0 %v8123_v49  ;;  %v1371_v9 = vmul.f32 %v5126_v55, %v8140_v31  ;;  %v8144_v31 = vmax.f32 %v6087_v57, 0.0 }
 0x4ef   : > { %v6627_v51 = vmul.f32 %v4047_v15, %v3998_v37  ;;  %v1450_v25 = vsel %vm1402_vm5, %v1386_v21, -1e+30 }
 0x4f0   : > { %v1235_v30 = vpop.xlane.xlu0 %1234  ;;  %v1462_v26 = vmax.f32 %v6561_v32, %v1450_v25  ;;  %v8142_v32 = vmax.f32 %v6083_v28, 0.0 }
 0x4f1   : > { %8139 = vst [vmem:[#allocation30_spill] sm:$0xff] %v6627_v51  ;;  %vm1403_vm9 = vcmp.gt.f32.partialorder %v6627_v51, 0.5  ;;  %vm1256_vm10 = vcmp.lt.f32.partialorder %v1235_v30, %v6376_v19  ;;  %1319 = vxpose.xlu0.b32.cont [14/16] (narrow) %v6627_v51, 8  ;;  %v1387_v63 = vmul.f32 %v1371_v9, %v6627_v51  ;;  %v5041_v51 = vld [vmem:[#allocation8 + $0xe0] sm:$0xff]  }
 0x4f2   : > { %v4048_v17 = vsel %vm1256_vm10, 1.0, %v8026_v5  ;;  %v1372_v27 = vmul.f32 %v5128_v11, %v8142_v32 }
 0x4f3   : > { %v6640_v61 = vmul.f32 %v4048_v17, %v3999_v62  ;;  %v1451_v14 = vsel %vm1403_vm9, %v1387_v63, -1e+30  ;;  %v6642_v24 = vpack.c.bf16 %v1387_v63, %v1386_v21  ;;  %vm8054_vm9 = vcmask 1040384  }
 0x4f4   : > { %v1237_v55 = vpop.xlane.xlu0 %1236  ;;  %v1463_v37 = vmax.f32 %v6581_v59, %v1451_v14  ;;  %v1373_v59 = vmul.f32 %v5130_v54, %v8144_v31  ;;  %v5274_v14 = vld [vmem:[%s5795_s22] sm:$0xff]  ;;  %v5276_v54 = vld [vmem:[%s5795_s22 + $0x10] sm:$0xff] }
 0x4f5   : > { %8141 = vst [vmem:[#allocation31_spill] sm:$0xff] %v6640_v61  ;;  %vm1404_vm4 = vcmp.gt.f32.partialorder %v6640_v61, 0.5  ;;  %vm1257_vm5 = vcmp.lt.f32.partialorder %v1237_v55, %v6376_v19  ;;  %1320 = vxpose.xlu0.b32.cont [15/16] (narrow) %v6640_v61, 8  ;;  %4802 = vmatpush3.bf16.msra.mxu0 %v6642_v24  ;;  %v1388_v2 = vmul.f32 %v1372_v27, %v6640_v61  ;;  %v5040_v61 = vld [vmem:[#allocation8 + $0x98] sm:$0xff]  }
 0x4f6   : > { %v4049_v21 = vsel %vm1257_vm5, 1.0, %v8026_v5  ;;  %4803 = vmatprep.subr.bf16.mxu0 %v8123_v49  ;;  %v1466_v28 = vmax.f32 %v1462_v26, %v1463_v37  ;;  %v5035_v5 = vld [vmem:[#allocation8 + $0xc8] sm:$0xff]  }
 0x4f7   : > { %v6655_v15 = vmul.f32 %v4049_v21, %v4000_v35  ;;  %v1452_v9 = vsel %vm1404_vm4, %v1388_v2, -1e+30  ;;  %v5277_v35 = vld [vmem:[%s5795_s22 + $0x18] sm:$0xff] }
 0x4f8   : > { %v1464_v25 = vmax.f32 %v6601_v6, %v1452_v9 }
 0x4f9   : > { %8143 = vst [vmem:[#allocation32_spill] sm:$0xff] %v6655_v15  ;;  %vm1405_vm6 = vcmp.gt.f32.partialorder %v6655_v15, 0.5  ;;  %1321 = vxpose.xlu0.b32.end [16/16] (narrow) %v6655_v15, 8  ;;  %v1389_v19 = vmul.f32 %v1373_v59, %v6655_v15  ;;  %v5280_v59 = vld [vmem:[%s5795_s22 + $0x30] sm:$0xff] }
 0x4fa   : > { %v5038_v15 = vld [vmem:[#allocation8 + $0x90] sm:$0xff]  }
 0x4fb   : > { %v1453_v11 = vsel %vm1405_vm6, %v1389_v19, -1e+30  ;;  %v6663_v30 = vpack.c.bf16 %v1389_v19, %v1388_v2  ;;  %v5278_v2 = vld [vmem:[%s5795_s22 + $0x20] sm:$0xff] }
 0x4fc   : > { %v1465_v62 = vmax.f32 %v1461_v42, %v1453_v11  ;;  %v5273_v42 = vld [vmem:[%s5795_s22 + $0x40] sm:$0xff]  ;;  %v5282_v11 = vld [vmem:[%s5795_s22 + $0x48] sm:$0xff] }
 0x4fd   : > { %4805 = vmatpush3.bf16.msra.mxu0 %v6663_v30 }
 0x4fe   : > { %4578 = vmatprep.subr.bf16.mxu0 %v6416_v44  ;;  %v1467_v57 = vmax.f32 %v1464_v25, %v1465_v62  ;;  %v5281_v25 = vld [vmem:[%s5795_s22 + $0x38] sm:$0xff] }
 0x500   : > { %v6667_v26 = vmax.f32 %v1466_v28, %v1467_v57  ;;  %v5279_v28 = vld [vmem:[%s5795_s22 + $0x28] sm:$0xff]  ;;  %v5283_v57 = vld [vmem:[%s5795_s22 + $0x50] sm:$0xff] }
 0x502   : > { %8145 = vst [vmem:[#allocation33_spill] sm:$0xff] %v6667_v26  ;;  %v5037_v26 = vld [vmem:[#allocation8 + $0xd0] sm:$0xff]  }
 0x53d   : > { %v6669_v6 = vpop.trf.xlu0 }
 0x53e   : > { %v6673_v63 = vrot.slane %v6669_v6, %v5974_v40  ;;  %4576 = vmatmul.mubr.f32.vlgmr.msra.gmra.mrb[16].mxu0 %v6669_v6 }
 0x53f   : > { %4579 = vmatpush3.bf16.msra.mxu0 %v6416_v44  ;;  %v5275_v44 = vld [vmem:[%s5795_s22 + $0x8] sm:$0xff] }
 0x540   : > { %4580 = vmatprep.subr.bf16.mxu0 %v6448_v39  ;;  %v6680_v17 = vmul.f32 %v5273_v42, %v6673_v63  ;;  %v6684_v32 = vmul.f32 %v5274_v14, %v6673_v63  ;;  %v6692_v27 = vmul.f32 %v5275_v44, %v6673_v63  ;;  %v6699_v55 = vmul.f32 %v5276_v54, %v6673_v63  ;;  %v5284_v14 = vld [vmem:[%s5795_s22 + $0x58] sm:$0xff]  ;;  %v5285_v54 = vld [vmem:[%s5795_s22 + $0x60] sm:$0xff] }
 0x541   : > { %v6706_v37 = vmul.f32 %v5277_v35, %v6673_v63  ;;  %v6713_v21 = vmul.f32 %v5278_v2, %v6673_v63  ;;  %v6720_v31 = vmul.f32 %v5279_v28, %v6673_v63  ;;  %v6727_v9 = vmul.f32 %v5280_v59, %v6673_v63  ;;  %v5286_v2 = vld [vmem:[%s5795_s22 + $0x68] sm:$0xff]  ;;  %v5287_v59 = vld [vmem:[%s5795_s22 + $0x70] sm:$0xff] }
 0x542   : > { %1588 = vadd.xlane.f32.xlu0 %v6680_v17  ;;  %1572 = vadd.xlane.f32.xlu1 %v6684_v32  ;;  %v6733_v19 = vmul.f32 %v5281_v25, %v6673_v63  ;;  %v6739_v62 = vmul.f32 %v5282_v11, %v6673_v63  ;;  %v6744_v42 = vmul.f32 %v5283_v57, %v6673_v63  ;;  %v5288_v11 = vld [vmem:[%s5795_s22 + $0x78] sm:$0xff] }
 0x543   : > { %4581 = vmatpush3.bf16.msra.mxu0 %v6448_v39  ;;  %v6749_v44 = vmul.f32 %v5284_v14, %v6673_v63  ;;  %v6754_v35 = vmul.f32 %v5285_v54, %v6673_v63  ;;  %v6759_v28 = vmul.f32 %v5286_v2, %v6673_v63  ;;  %v6764_v25 = vmul.f32 %v5287_v59, %v6673_v63  ;;  %v5033_v14 = vld [vmem:[#allocation8 + $0xc0] sm:$0xff]   ;;  %v5036_v2 = vld [vmem:[#allocation8 + $0x88] sm:$0xff]   ;;  %v5039_v59 = vld [vmem:[#allocation8 + $0xd8] sm:$0xff]  }
 0x544   : > { %4582 = vmatprep.subr.bf16.mxu0 %v6493_v8  ;;  %v6769_v57 = vmul.f32 %v5288_v11, %v6673_v63  ;;  %v5034_v54 = vld [vmem:[#allocation8 + $0x80] sm:$0xff]   ;;  %4264 = vmatprep.subr.bf16.mxu1 %v5033_v14  ;;  %v5045_v14 = vld [vmem:[#allocation8 + $0xf0] sm:$0xff]  }
 0x545   : > { %4265 = vmatpush3.bf16.msra.mxu1 %v5034_v54  ;;  %v5042_v11 = vld [vmem:[#allocation8 + $0xa0] sm:$0xff]   ;;  %v5046_v54 = vld [vmem:[#allocation8 + $0xb0] sm:$0xff]  }
 0x546   : > { %1574 = vadd.xlane.f32.xlu1 %v6692_v27  ;;  %4266 = vmatprep.subr.bf16.mxu1 %v5035_v5  ;;  %v5047_v5 = vld [vmem:[#allocation8 + $0xf8] sm:$0xff]  }
 0x547   : > { %4583 = vmatpush3.bf16.msra.mxu0 %v6493_v8 }
 0x548   : > { %4584 = vmatprep.subr.bf16.mxu0 %v6538_v45 }
 0x549   : > { %4267 = vmatpush3.bf16.msra.mxu1 %v5036_v2  ;;  %v5048_v2 = vld [vmem:[#allocation8 + $0xb8] sm:$0xff]  }
 0x54a   : > { %1576 = vadd.xlane.f32.xlu1 %v6699_v55  ;;  %4268 = vmatprep.subr.bf16.mxu1 %v5037_v26 }
 0x54b   : > { %4585 = vmatpush3.bf16.msra.mxu0 %v6538_v45 }
 0x54c   : > { %4586 = vmatprep.subr.bf16.mxu0 %v6573_v34 }
 0x54d   : > { %4269 = vmatpush3.bf16.msra.mxu1 %v5038_v15 }
 0x54e   : > { %1578 = vadd.xlane.f32.xlu1 %v6706_v37  ;;  %4270 = vmatprep.subr.bf16.mxu1 %v5039_v59 }
 0x54f   : > { %4587 = vmatpush3.bf16.msra.mxu0 %v6573_v34 }
 0x550   : > { %4588 = vmatprep.subr.bf16.mxu0 %v6613_v56 }
 0x551   : > { %4271 = vmatpush3.bf16.msra.mxu1 %v5040_v61 }
 0x552   : > { %1580 = vadd.xlane.f32.xlu1 %v6713_v21  ;;  %4272 = vmatprep.subr.bf16.mxu1 %v5041_v51 }
 0x553   : > { %4589 = vmatpush3.bf16.msra.mxu0 %v6613_v56 }
 0x554   : > { %4590 = vmatprep.subr.bf16.mxu0 %v6642_v24 }
 0x555   : > { %4273 = vmatpush3.bf16.msra.mxu1 %v5042_v11 }
 0x556   : > { %1582 = vadd.xlane.f32.xlu1 %v6720_v31  ;;  %4274 = vmatprep.subr.bf16.mxu1 %v5043_v0 }
 0x557   : > { %4591 = vmatpush3.bf16.msra.mxu0 %v6642_v24 }
 0x558   : > { %4592 = vmatprep.subr.bf16.mxu0 %v6663_v30 }
 0x559   : > { %4275 = vmatpush3.bf16.msra.mxu1 %v5044_v22 }
 0x55a   : > { %1584 = vadd.xlane.f32.xlu1 %v6727_v9  ;;  %4276 = vmatprep.subr.bf16.mxu1 %v5045_v14 }
 0x55b   : > { %4593 = vmatpush3.bf16.msra.mxu0 %v6663_v30 }
 0x55c   : > { %4806 = vmatprep.subr.bf16.mxu0 %v8123_v49 }
 0x55d   : > { %4277 = vmatpush3.bf16.msra.mxu1 %v5046_v54 }
 0x55e   : > { %1586 = vadd.xlane.f32.xlu1 %v6733_v19  ;;  %4278 = vmatprep.subr.bf16.mxu1 %v5047_v5 }
 0x561   : > { %4279 = vmatpush3.bf16.msra.mxu1 %v5048_v2 }
 0x562   : > { %1590 = vadd.xlane.f32.xlu1 %v6739_v62 }
 0x566   : > { %1592 = vadd.xlane.f32.xlu1 %v6744_v42 }
 0x56a   : > { %1594 = vadd.xlane.f32.xlu1 %v6749_v44 }
 0x56e   : > { %1596 = vadd.xlane.f32.xlu1 %v6754_v35 }
 0x572   : > { %1598 = vadd.xlane.f32.xlu1 %v6759_v28 }
 0x576   : > { %1600 = vadd.xlane.f32.xlu1 %v6764_v25 }
 0x57a   : > { %1602 = vadd.xlane.f32.xlu1 %v6769_v57 }
 0x5cf   : > { %v1573_v15 = vpop.xlane.xlu1 %1572 }
 0x5d0   : > { %v1604_v26 = vmax.f32 %v1573_v15, 1.0 }
 0x5d2   : > { %5131 = vrcp.f32 %v1604_v26 }
 0x5d3   : > { %v1575_v59 = vpop.xlane.xlu1 %1574 }
 0x5d4   : > { %v1605_v61 = vmax.f32 %v1575_v59, 1.0 }
 0x5d6   : > { %5133 = vrcp.f32 %v1605_v61 }
 0x5d7   : > { %v1577_v51 = vpop.xlane.xlu1 %1576 }
 0x5d8   : > { %v1606_v41 = vmax.f32 %v1577_v51, 1.0 }
 0x5da   : > { %5135 = vrcp.f32 %v1606_v41 }
 0x5db   : > { %v1579_v11 = vpop.xlane.xlu1 %1578 }
 0x5dc   : > { %v1607_v0 = vmax.f32 %v1579_v11, 1.0  ;;  %v5132_v20 = vpop.eup %5131  ;;  %v1589_v11 = vpop.xlane.xlu0 %1588 }
 0x5dd   : > { %v1636_v54 = vmul.f32 %v5132_v20, %v6684_v32  ;;  %v1612_v20 = vmax.f32 %v1589_v11, 1.0 }
 0x5de   : > { %5137 = vrcp.f32 %v1607_v0 }
 0x5df   : > { %v1581_v22 = vpop.xlane.xlu1 %1580 }
 0x5e0   : > { %v5134_v14 = vpop.eup %5133  ;;  %v1608_v7 = vmax.f32 %v1581_v22, 1.0 }
 0x5e1   : > { %v1637_v5 = vmul.f32 %v5134_v14, %v6692_v27 }
 0x5e2   : > { %5139 = vrcp.f32 %v1608_v7 }
 0x5e3   : > { %v1583_v2 = vpop.xlane.xlu1 %1582  ;;  %v1652_v15 = vpack.c.bf16 %v1637_v5, %v1636_v54 }
 0x5e4   : > { %v1609_v26 = vmax.f32 %v1583_v2, 1.0  ;;  %v5136_v59 = vpop.eup %5135 }
 0x5e5   : > { %4594 = vmatprep.mubr.bf16.mxu0 %v1652_v15  ;;  %v1638_v0 = vmul.f32 %v5136_v59, %v6699_v55 }
 0x5e6   : > { %5141 = vrcp.f32 %v1609_v26 }
 0x5e7   : > { %v1585_v61 = vpop.xlane.xlu1 %1584 }
 0x5e8   : > { %v5138_v51 = vpop.eup %5137  ;;  %v1610_v41 = vmax.f32 %v1585_v61, 1.0 }
 0x5e9   : > { %v1639_v13 = vmul.f32 %v5138_v51, %v6706_v37 }
 0x5ea   : > { %5143 = vrcp.f32 %v1610_v41 }
 0x5eb   : > { %v1587_v22 = vpop.xlane.xlu1 %1586  ;;  %v1653_v3 = vpack.c.bf16 %v1639_v13, %v1638_v0 }
 0x5ec   : > { %v1611_v32 = vmax.f32 %v1587_v22, 1.0  ;;  %v5140_v27 = vpop.eup %5139 }
 0x5ed   : > { %4595 = vmatmul.mubr.bf16.vlgmr.msra.gmra.mrb[20].mxu0 %v1653_v3  ;;  %v1640_v5 = vmul.f32 %v5140_v27, %v6713_v21 }
 0x5ee   : > { %5145 = vrcp.f32 %v1611_v32 }
 0x5ef   : > { %v1591_v7 = vpop.xlane.xlu1 %1590  ;;  %5147 = vrcp.f32 %v1612_v20 }
 0x5f0   : > { %v5142_v14 = vpop.eup %5141  ;;  %v1613_v54 = vmax.f32 %v1591_v7, 1.0 }
 0x5f1   : > { %v1641_v2 = vmul.f32 %v5142_v14, %v6720_v31 }
 0x5f2   : > { %5149 = vrcp.f32 %v1613_v54 }
 0x5f3   : > { %v1593_v55 = vpop.xlane.xlu1 %1592  ;;  %v1654_v15 = vpack.c.bf16 %v1641_v2, %v1640_v5 }
 0x5f4   : > { %v1614_v37 = vmax.f32 %v1593_v55, 1.0  ;;  %v5144_v13 = vpop.eup %5143 }
 0x5f5   : > { %4598 = vmatprep.mubr.bf16.mxu0 %v1654_v15  ;;  %v1642_v61 = vmul.f32 %v5144_v13, %v6727_v9 }
 0x5f6   : > { %5151 = vrcp.f32 %v1614_v37 }
 0x5f7   : > { %v1595_v26 = vpop.xlane.xlu1 %1594 }
 0x5f8   : > { %v5146_v59 = vpop.eup %5145  ;;  %v1615_v3 = vmax.f32 %v1595_v26, 1.0 }
 0x5f9   : > { %v1643_v51 = vmul.f32 %v5146_v59, %v6733_v19  ;;  %v5148_v41 = vpop.eup %5147 }
 0x5fa   : > { %5153 = vrcp.f32 %v1615_v3  ;;  %v1644_v22 = vmul.f32 %v5148_v41, %v6680_v17 }
 0x5fb   : > { %v1597_v11 = vpop.xlane.xlu1 %1596  ;;  %v1655_v21 = vpack.c.bf16 %v1643_v51, %v1642_v61 }
 0x5fc   : > { %v5150_v0 = vpop.eup %5149  ;;  %v1616_v31 = vmax.f32 %v1597_v11, 1.0 }
 0x5fd   : > { %4599 = vmatmul.mubr.bf16.gmra.mrb[24].mxu0 %v1655_v21  ;;  %v1645_v20 = vmul.f32 %v5150_v0, %v6739_v62  ;;  %v8146_v21 = vmov 0.0  }
 0x5fe   : > { %5155 = vrcp.f32 %v1616_v31 }
 0x5ff   : > { %v1599_v32 = vpop.xlane.xlu1 %1598  ;;  %v1656_v27 = vpack.c.bf16 %v1645_v20, %v1644_v22 }
 0x600   : > { %v1617_v7 = vmax.f32 %v1599_v32, 1.0  ;;  %v5152_v14 = vpop.eup %5151 }
 0x601   : > { %4602 = vmatprep.mubr.bf16.mxu0 %v1656_v27  ;;  %v1646_v5 = vmul.f32 %v5152_v14, %v6744_v42 }
 0x602   : > { %5157 = vrcp.f32 %v1617_v7 }
 0x603   : > { %v1601_v9 = vpop.xlane.xlu1 %1600 }
 0x604   : > { %v5154_v19 = vpop.eup %5153  ;;  %v1618_v54 = vmax.f32 %v1601_v9, 1.0 }
 0x605   : > { %v1647_v2 = vmul.f32 %v5154_v19, %v6749_v44 }
 0x606   : > { %5159 = vrcp.f32 %v1618_v54 }
 0x607   : > { %v1603_v55 = vpop.xlane.xlu1 %1602  ;;  %v1657_v15 = vpack.c.bf16 %v1647_v2, %v1646_v5 }
 0x608   : > { %v1619_v17 = vmax.f32 %v1603_v55, 1.0  ;;  %v5156_v62 = vpop.eup %5155 }
 0x609   : > { %4603 = vmatmul.mubr.bf16.gmra.mrb[28].mxu0 %v1657_v15  ;;  %v1648_v13 = vmul.f32 %v5156_v62, %v6754_v35  ;;  %v1987_v35 = vsel %vm1986_vm13, %v5960_v48, 0.0 }
 0x60a   : > { %5161 = vrcp.f32 %v1619_v17  ;;  %1988 = vadd.xlane.f32.xlu1 %v1987_v35 }
 0x60c   : > { %v5158_v37 = vpop.eup %5157 }
 0x60d   : > { %v1649_v26 = vmul.f32 %v5158_v37, %v6759_v28 }
 0x60f   : > { %v1658_v59 = vpack.c.bf16 %v1649_v26, %v1648_v13  ;;  %v1775_v13 = vsub.s32 1, %v5971_v29 }
 0x610   : > { %v5160_v61 = vpop.eup %5159 }
 0x611   : > { %v6786_v3 = vpop.f32.mrb[16].mxu0  ;;  %4606 = vmatprep.mubr.bf16.mxu0 %v1658_v59  ;;  %v1650_v44 = vmul.f32 %v5160_v61, %v6764_v25 }
 0x612   : > { %v4577_v42 = vpop.f32.mrb[17].mxu0 }
 0x614   : > { %v5162_v51 = vpop.eup %5161 }
 0x615   : > { %v1651_v41 = vmul.f32 %v5162_v51, %v6769_v57 }
 0x617   : > { %v1659_v11 = vpack.c.bf16 %v1651_v41, %v1650_v44 }
 0x619   : > { %4607 = vmatmul.mubr.bf16.gmra.mrb[32].mxu0 %v1659_v11 }
 0x61a   : > { %4642 = vmatprep.mubr.msk.f32.mxu0 %vm8055_vm7, %v8146_v21 }
 0x6c0   : > { %v4596_v28 = vpop.f32.mrb[20].mxu0 }
 0x6c1   : > { %v1702_v0 = vpop.f32.mrb[21].mxu0 }
 0x6c2   : > { %v4597_v31 = vpop.f32.mrb[22].mxu0 }
 0x6c3   : > { %v1766_v22 = vpack.c.bf16 %v4597_v31, %v4596_v28  ;;  %v1705_v20 = vpop.f32.mrb[23].mxu0 }
 0x6c4   : > { %v1765_v32 = vpack.c.bf16 %v1705_v20, %v1702_v0 }
 0x6c6   : > { %1906 = vmatmul.mubr.bf16.vlgmr.msra.gmra.mrb[32].mxu1 %v1765_v32 }
 0x6c7   : > { %1913 = vmatprep.mubr.bf16.mxu1 %v6448_v39 }
 0x6ce   : > { %1914 = vmatmul.mubr.bf16.gmra.mrb[36].mxu1 %v1766_v22 }
 0x6cf   : > { %1921 = vmatprep.mubr.bf16.mxu1 %v6493_v8 }
 0x6d0   : > { %v4600_v25 = vpop.f32.mrb[24].mxu0 }
 0x6d1   : > { %v1718_v57 = vpop.f32.mrb[25].mxu0 }
 0x6d2   : > { %v4601_v27 = vpop.f32.mrb[26].mxu0 }
 0x6d3   : > { %v1768_v7 = vpack.c.bf16 %v4601_v27, %v4600_v25  ;;  %v1721_v14 = vpop.f32.mrb[27].mxu0 }
 0x6d4   : > { %v1767_v9 = vpack.c.bf16 %v1721_v14, %v1718_v57 }
 0x6d6   : > { %1922 = vmatmul.mubr.bf16.gmra.mrb[40].mxu1 %v1767_v9 }
 0x6d7   : > { %1929 = vmatprep.mubr.bf16.mxu1 %v6538_v45 }
 0x6dc   : > { %v4604_v19 = vpop.f32.mrb[28].mxu0 }
 0x6dd   : > { %v1734_v54 = vpop.f32.mrb[29].mxu0 }
 0x6de   : > { %v4605_v5 = vpop.f32.mrb[30].mxu0  ;;  %1930 = vmatmul.mubr.bf16.gmra.mrb[44].mxu1 %v1768_v7 }
 0x6df   : > { %v1770_v2 = vpack.c.bf16 %v4605_v5, %v4604_v19  ;;  %v1737_v55 = vpop.f32.mrb[31].mxu0  ;;  %1937 = vmatprep.mubr.bf16.mxu1 %v6573_v34  ;;  %v5289_v34 = vld [vmem:[#allocation9] sm:$0xff] }
 0x6e0   : > { %v1769_v39 = vpack.c.bf16 %v1737_v55, %v1734_v54  ;;  %v6801_v26 = vrot.slane %v5289_v34, %v1775_v13 }
 0x6e6   : > { %1938 = vmatmul.mubr.bf16.gmra.mrb[48].mxu1 %v1769_v39 }
 0x6e7   : > { %1945 = vmatprep.mubr.bf16.mxu1 %v6613_v56  ;;  %v1993_v56 = vsub.s32 4, %v5971_v29 }
 0x6ec   : > { %v4608_v8 = vpop.f32.mrb[32].mxu0 }
 0x6ed   : > { %v1750_v15 = vpop.f32.mrb[33].mxu0 }
 0x6ee   : > { %v4609_v17 = vpop.f32.mrb[34].mxu0  ;;  %1946 = vmatmul.mubr.bf16.gmra.mrb[52].mxu1 %v1770_v2 }
 0x6ef   : > { %v1772_v62 = vpack.c.bf16 %v4609_v17, %v4608_v8  ;;  %v1753_v37 = vpop.f32.mrb[35].mxu0  ;;  %1953 = vmatprep.mubr.bf16.mxu1 %v6642_v24  ;;  %v6806_v24 = vrot.slane %v5289_v34, %v1993_v56 }
 0x6f0   : > { %v1771_v45 = vpack.c.bf16 %v1753_v37, %v1750_v15 }
 0x6f6   : > { %1954 = vmatmul.mubr.bf16.gmra.mrb[56].mxu1 %v1771_v45 }
 0x6f7   : > { %1961 = vmatprep.mubr.bf16.mxu1 %v6663_v30 }
 0x6fe   : > { %1962 = vmatmul.mubr.bf16.gmra.mrb[60].mxu1 %v1772_v62 }
 0x799   : > { %v4280_v59 = vpop.f32.mrb[32].mxu1 }
 0x79a   : > { %v4281_v61 = vpop.f32.mrb[33].mxu1 }
 0x79b   : > { %v4282_v42 = vadd.f32 %v4281_v61, %v4280_v59  ;;  %v4283_v51 = vpop.f32.mrb[34].mxu1 }
 0x79c   : > { %v4284_v44 = vpop.f32.mrb[35].mxu1 }
 0x79d   : > { %v6809_v41 = vadd.f32 %v4282_v42, %v6801_v26  ;;  %v4285_v30 = vadd.f32 %v4284_v44, %v4283_v51 }
 0x79f   : > { %v8059_v11 = vmax.f32 %v6809_v41, 0.0  ;;  %v6813_v35 = vadd.f32 %v4285_v30, %v6801_v26 }
 0x7a1   : > { %v8053_v28 = vmax.f32 %v6813_v35, 0.0  ;;  %v4286_v0 = vpop.f32.mrb[36].mxu1  ;;  %v1995_v31 = vmul.f32 %v6806_v24, %v8059_v11 }
 0x7a2   : > { %v4287_v22 = vpop.f32.mrb[37].mxu1 }
 0x7a3   : > { %v4288_v20 = vadd.f32 %v4287_v22, %v4286_v0  ;;  %v4289_v32 = vpop.f32.mrb[38].mxu1  ;;  %2011 = vadd.xlane.f32.xlu1 %v1995_v31  ;;  %v1996_v7 = vmul.f32 %v6806_v24, %v8053_v28 }
 0x7a4   : > { %v4290_v25 = vpop.f32.mrb[39].mxu1 }
 0x7a5   : > { %v6820_v57 = vadd.f32 %v4288_v20, %v6801_v26  ;;  %v4291_v27 = vadd.f32 %v4290_v25, %v4289_v32 }
 0x7a7   : > { %v8052_v14 = vmax.f32 %v6820_v57, 0.0  ;;  %v6827_v9 = vadd.f32 %v4291_v27, %v6801_v26  ;;  %2013 = vadd.xlane.f32.xlu1 %v1996_v7 }
 0x7a9   : > { %v8051_v19 = vmax.f32 %v6827_v9, 0.0  ;;  %v4292_v54 = vpop.f32.mrb[40].mxu1  ;;  %v1997_v5 = vmul.f32 %v6806_v24, %v8052_v14 }
 0x7aa   : > { %v4293_v2 = vpop.f32.mrb[41].mxu1 }
 0x7ab   : > { %v4294_v55 = vadd.f32 %v4293_v2, %v4292_v54  ;;  %2015 = vadd.xlane.f32.xlu1 %v1997_v5  ;;  %v4295_v39 = vpop.f32.mrb[42].mxu1  ;;  %v1998_v8 = vmul.f32 %v6806_v24, %v8051_v19 }
 0x7ac   : > { %v4296_v15 = vpop.f32.mrb[43].mxu1 }
 0x7ad   : > { %v6837_v17 = vadd.f32 %v4294_v55, %v6801_v26  ;;  %v4297_v62 = vadd.f32 %v4296_v15, %v4295_v39  ;;  %2017 = vadd.xlane.f32.xlu0 %v1998_v8 }
 0x7af   : > { %v8050_v37 = vmax.f32 %v6837_v17, 0.0  ;;  %v6841_v45 = vadd.f32 %v4297_v62, %v6801_v26 }
 0x7b1   : > { %v8049_v13 = vmax.f32 %v6841_v45, 0.0  ;;  %v4298_v34 = vpop.f32.mrb[44].mxu1  ;;  %v1999_v59 = vmul.f32 %v6806_v24, %v8050_v37 }
 0x7b2   : > { %v4299_v61 = vpop.f32.mrb[45].mxu1 }
 0x7b3   : > { %v4300_v42 = vadd.f32 %v4299_v61, %v4298_v34  ;;  %v4301_v51 = vpop.f32.mrb[46].mxu1  ;;  %2019 = vadd.xlane.f32.xlu1 %v1999_v59  ;;  %v2000_v44 = vmul.f32 %v6806_v24, %v8049_v13 }
 0x7b4   : > { %v4302_v30 = vpop.f32.mrb[47].mxu1 }
 0x7b5   : > { %v6851_v0 = vadd.f32 %v4300_v42, %v6801_v26  ;;  %v4303_v31 = vadd.f32 %v4302_v30, %v4301_v51  ;;  %2021 = vadd.xlane.f32.xlu0 %v2000_v44 }
 0x7b7   : > { %v8048_v22 = vmax.f32 %v6851_v0, 0.0  ;;  %v6855_v20 = vadd.f32 %v4303_v31, %v6801_v26 }
 0x7b9   : > { %v8047_v32 = vmax.f32 %v6855_v20, 0.0  ;;  %v4304_v25 = vpop.f32.mrb[48].mxu1  ;;  %v2001_v27 = vmul.f32 %v6806_v24, %v8048_v22 }
 0x7ba   : > { %v4305_v7 = vpop.f32.mrb[49].mxu1 }
 0x7bb   : > { %v4306_v54 = vadd.f32 %v4305_v7, %v4304_v25  ;;  %2023 = vadd.xlane.f32.xlu1 %v2001_v27  ;;  %v4307_v5 = vpop.f32.mrb[50].mxu1  ;;  %v2002_v2 = vmul.f32 %v6806_v24, %v8047_v32 }
 0x7bc   : > { %v4308_v55 = vpop.f32.mrb[51].mxu1 }
 0x7bd   : > { %v6865_v39 = vadd.f32 %v4306_v54, %v6801_v26  ;;  %v4309_v8 = vadd.f32 %v4308_v55, %v4307_v5  ;;  %2025 = vadd.xlane.f32.xlu0 %v2002_v2 }
 0x7bf   : > { %v8042_v15 = vmax.f32 %v6865_v39, 0.0  ;;  %v6869_v62 = vadd.f32 %v4309_v8, %v6801_v26 }
 0x7c1   : > { %v8041_v34 = vmax.f32 %v6869_v62, 0.0  ;;  %v4310_v59 = vpop.f32.mrb[52].mxu1  ;;  %v2003_v61 = vmul.f32 %v6806_v24, %v8042_v15 }
 0x7c2   : > { %v4311_v42 = vpop.f32.mrb[53].mxu1 }
 0x7c3   : > { %v4312_v51 = vadd.f32 %v4311_v42, %v4310_v59  ;;  %v4313_v44 = vpop.f32.mrb[54].mxu1  ;;  %2027 = vadd.xlane.f32.xlu1 %v2003_v61  ;;  %v2004_v30 = vmul.f32 %v6806_v24, %v8041_v34 }
 0x7c4   : > { %v4314_v31 = vpop.f32.mrb[55].mxu1 }
 0x7c5   : > { %v6879_v25 = vadd.f32 %v4312_v51, %v6801_v26  ;;  %v4315_v27 = vadd.f32 %v4314_v31, %v4313_v44  ;;  %2029 = vadd.xlane.f32.xlu0 %v2004_v30 }
 0x7c7   : > { %v8039_v7 = vmax.f32 %v6879_v25, 0.0  ;;  %v6883_v54 = vadd.f32 %v4315_v27, %v6801_v26 }
 0x7c9   : > { %v8040_v5 = vmax.f32 %v6883_v54, 0.0  ;;  %v4316_v2 = vpop.f32.mrb[56].mxu1  ;;  %v2005_v55 = vmul.f32 %v6806_v24, %v8039_v7 }
 0x7ca   : > { %v4317_v8 = vpop.f32.mrb[57].mxu1 }
 0x7cb   : > { %v4318_v59 = vadd.f32 %v4317_v8, %v4316_v2  ;;  %2031 = vadd.xlane.f32.xlu1 %v2005_v55  ;;  %v4319_v61 = vpop.f32.mrb[58].mxu1  ;;  %v2006_v42 = vmul.f32 %v6806_v24, %v8040_v5 }
 0x7cc   : > { %v4320_v51 = vpop.f32.mrb[59].mxu1 }
 0x7cd   : > { %v6893_v44 = vadd.f32 %v4318_v59, %v6801_v26  ;;  %v4321_v30 = vadd.f32 %v4320_v51, %v4319_v61  ;;  %2033 = vadd.xlane.f32.xlu0 %v2006_v42 }
 0x7cf   : > { %v8043_v31 = vmax.f32 %v6893_v44, 0.0  ;;  %v6897_v27 = vadd.f32 %v4321_v30, %v6801_v26 }
 0x7d1   : > { %v8046_v7 = vmax.f32 %v6897_v27, 0.0  ;;  %v4322_v2 = vpop.f32.mrb[60].mxu1  ;;  %v2007_v55 = vmul.f32 %v6806_v24, %v8043_v31 }
 0x7d2   : > { %v4323_v8 = vpop.f32.mrb[61].mxu1 }
 0x7d3   : > { %v4324_v5 = vadd.f32 %v4323_v8, %v4322_v2  ;;  %v4325_v34 = vpop.f32.mrb[62].mxu1  ;;  %2035 = vadd.xlane.f32.xlu1 %v2007_v55  ;;  %v2008_v59 = vmul.f32 %v6806_v24, %v8046_v7 }
 0x7d4   : > { %v4326_v61 = vpop.f32.mrb[63].mxu1 }
 0x7d5   : > { %v6907_v42 = vadd.f32 %v4324_v5, %v6801_v26  ;;  %v4327_v51 = vadd.f32 %v4326_v61, %v4325_v34  ;;  %2037 = vadd.xlane.f32.xlu0 %v2008_v59  ;;  %v1339_v34 = vsel %vm8054_vm9, %v6669_v6, 0.0  ;;  %v1989_v5 = vpop.xlane.xlu1 %1988 }
 0x7d6   : > { %5163 = vrsqrt.f32 %v1989_v5 }
 0x7d7   : > { %v8045_v30 = vmax.f32 %v6907_v42, 0.0  ;;  %v6911_v15 = vadd.f32 %v4327_v51, %v6801_v26 }
 0x7d9   : > { %v8044_v31 = vmax.f32 %v6911_v15, 0.0  ;;  %v2009_v2 = vmul.f32 %v6806_v24, %v8045_v30 }
 0x7db   : > { %2039 = vadd.xlane.f32.xlu1 %v2009_v2  ;;  %v2010_v55 = vmul.f32 %v6806_v24, %v8044_v31 }
 0x7dd   : > { %2041 = vadd.xlane.f32.xlu0 %v2010_v55 }
 0x7e0   : > { %v5164_v26 = vpop.eup %5163 }
 0x7e1   : > { %1340 = vadd.xlane.f32.xlu0 %v1339_v34  ;;  %v2046_v8 = vrot.slane %v5164_v26, %v1993_v56 }
 0x830   : > { %v2012_v59 = vpop.xlane.xlu1 %2011 }
 0x831   : > { %v6924_v61 = vmul.f32 %v2046_v8, %v2012_v59 }
 0x833   : > { %2063 = vxpose.xlu1.b32.start [1/16] (narrow) %v6924_v61, 8  ;;  %5165 = vtanh.f32 %v6924_v61 }
 0x834   : > { %v2014_v51 = vpop.xlane.xlu1 %2013 }
 0x835   : > { %v6927_v2 = vmul.f32 %v2046_v8, %v2014_v51 }
 0x837   : > { %2064 = vxpose.xlu1.b32.cont [2/16] (narrow) %v6927_v2, 8  ;;  %5167 = vtanh.f32 %v6927_v2 }
 0x838   : > { %v2016_v24 = vpop.xlane.xlu1 %2015 }
 0x839   : > { %v6930_v55 = vmul.f32 %v2046_v8, %v2016_v24 }
 0x83a   : > { %v2018_v6 = vpop.xlane.xlu0 %2017 }
 0x83b   : > { %2065 = vxpose.xlu1.b32.cont [3/16] (narrow) %v6930_v55, 8  ;;  %v6933_v34 = vmul.f32 %v2046_v8, %v2018_v6  ;;  %5169 = vtanh.f32 %v6930_v55 }
 0x83d   : > { %5171 = vtanh.f32 %v6933_v34 }
 0x83f   : > { %2066 = vxpose.xlu1.b32.cont [4/16] (narrow) %v6933_v34, 8 }
 0x840   : > { %v2020_v56 = vpop.xlane.xlu1 %2019 }
 0x841   : > { %v6936_v5 = vmul.f32 %v2046_v8, %v2020_v56 }
 0x842   : > { %v2022_v26 = vpop.xlane.xlu0 %2021 }
 0x843   : > { %2067 = vxpose.xlu1.b32.cont [5/16] (narrow) %v6936_v5, 8  ;;  %v6939_v59 = vmul.f32 %v2046_v8, %v2022_v26  ;;  %5173 = vtanh.f32 %v6936_v5 }
 0x845   : > { %5175 = vtanh.f32 %v6939_v59 }
 0x847   : > { %2068 = vxpose.xlu1.b32.cont [6/16] (narrow) %v6939_v59, 8 }
 0x848   : > { %v2024_v51 = vpop.xlane.xlu1 %2023 }
 0x849   : > { %v6942_v24 = vmul.f32 %v2046_v8, %v2024_v51 }
 0x84a   : > { %v2026_v31 = vpop.xlane.xlu0 %2025 }
 0x84b   : > { %2069 = vxpose.xlu1.b32.cont [7/16] (narrow) %v6942_v24, 8  ;;  %v6945_v6 = vmul.f32 %v2046_v8, %v2026_v31  ;;  %5177 = vtanh.f32 %v6942_v24 }
 0x84d   : > { %5179 = vtanh.f32 %v6945_v6 }
 0x84f   : > { %2070 = vxpose.xlu1.b32.cont [8/16] (narrow) %v6945_v6, 8 }
 0x850   : > { %v2028_v30 = vpop.xlane.xlu1 %2027 }
 0x851   : > { %v6948_v56 = vmul.f32 %v2046_v8, %v2028_v30 }
 0x852   : > { %v2030_v7 = vpop.xlane.xlu0 %2029 }
 0x853   : > { %2071 = vxpose.xlu1.b32.cont [9/16] (narrow) %v6948_v56, 8  ;;  %v6951_v26 = vmul.f32 %v2046_v8, %v2030_v7  ;;  %5181 = vtanh.f32 %v6948_v56 }
 0x855   : > { %5183 = vtanh.f32 %v6951_v26 }
 0x857   : > { %2072 = vxpose.xlu1.b32.cont [10/16] (narrow) %v6951_v26, 8 }
 0x858   : > { %v2032_v32 = vpop.xlane.xlu1 %2031 }
 0x859   : > { %v6954_v51 = vmul.f32 %v2046_v8, %v2032_v32 }
 0x85a   : > { %v2034_v22 = vpop.xlane.xlu0 %2033 }
 0x85b   : > { %2073 = vxpose.xlu1.b32.cont [11/16] (narrow) %v6954_v51, 8  ;;  %v6957_v31 = vmul.f32 %v2046_v8, %v2034_v22  ;;  %5185 = vtanh.f32 %v6954_v51 }
 0x85d   : > { %5187 = vtanh.f32 %v6957_v31 }
 0x85f   : > { %2074 = vxpose.xlu1.b32.cont [12/16] (narrow) %v6957_v31, 8 }
 0x860   : > { %v2036_v13 = vpop.xlane.xlu1 %2035 }
 0x861   : > { %v6960_v30 = vmul.f32 %v2046_v8, %v2036_v13 }
 0x862   : > { %v2038_v37 = vpop.xlane.xlu0 %2037 }
 0x863   : > { %2075 = vxpose.xlu1.b32.cont [13/16] (narrow) %v6960_v30, 8  ;;  %v6963_v7 = vmul.f32 %v2046_v8, %v2038_v37  ;;  %5189 = vtanh.f32 %v6960_v30 }
 0x865   : > { %5191 = vtanh.f32 %v6963_v7 }
 0x867   : > { %2076 = vxpose.xlu1.b32.cont [14/16] (narrow) %v6963_v7, 8 }
 0x868   : > { %v2040_v19 = vpop.xlane.xlu1 %2039 }
 0x869   : > { %v6966_v32 = vmul.f32 %v2046_v8, %v2040_v19 }
 0x86a   : > { %v2042_v14 = vpop.xlane.xlu0 %2041 }
 0x86b   : > { %2077 = vxpose.xlu1.b32.cont [15/16] (narrow) %v6966_v32, 8  ;;  %v6969_v22 = vmul.f32 %v2046_v8, %v2042_v14  ;;  %5193 = vtanh.f32 %v6966_v32 }
 0x86d   : > { %5195 = vtanh.f32 %v6969_v22 }
 0x86f   : > { %2078 = vxpose.xlu1.b32.end [16/16] (narrow) %v6969_v22, 8 }
 0x8b3   : > { %v2079_v28 = vpop.trf.xlu1 }
 0x8b4   : > { %v6973_v13 = vrot.slane %v2079_v28, %v5974_v40 }
 0x8b6   : > { %vm2099_vm10 = vcmp.gt.f32.partialorder %v6973_v13, %v6924_v61  ;;  %vm2115_vm12 = vcmp.eq.f32.partialorder %v6973_v13, %v6924_v61  ;;  %vm2116_vm4 = vcmp.eq.f32.partialorder %v6973_v13, %v6927_v2  ;;  %vm2100_vm6 = vcmp.gt.f32.partialorder %v6973_v13, %v6927_v2 }
 0x8b7   : > { %vm2131_vm5 = vmand %vm2115_vm12, %vm1110_vm2  ;;  %vm2117_vm9 = vcmp.eq.f32.partialorder %v6973_v13, %v6930_v55  ;;  %vm2101_vm1 = vcmp.gt.f32.partialorder %v6973_v13, %v6930_v55  ;;  %vm2118_vm12 = vcmp.eq.f32.partialorder %v6973_v13, %v6933_v34  ;;  %v8159_v55 = vmax.f32 %v6809_v41, 0.0 }
 0x8b8   : > { %vm2147_vm13 = vmor %vm2099_vm10, %vm2131_vm5 }
 0x8b9   : > { %v4066_v28 = vsel %vm2147_vm13, 1.0, %v8146_v21  ;;  %vm2132_vm7 = vmand %vm2116_vm4, %vm1111_vm3  ;;  %vm2102_vm4 = vcmp.gt.f32.partialorder %v6973_v13, %v6933_v34 }
 0x8ba   : > { %v2195_v14 = vmul.f32 %v4066_v28, %v6673_v63  ;;  %vm2148_vm15 = vmor %vm2100_vm6, %vm2132_vm7  ;;  %vm2119_vm7 = vcmp.eq.f32.partialorder %v6973_v13, %v6936_v5  ;;  %vm2120_vm6 = vcmp.eq.f32.partialorder %v6973_v13, %v6939_v59 }
 0x8bb   : > { %v4067_v19 = vsel %vm2148_vm15, 1.0, %v8146_v21  ;;  %vm2133_vm10 = vmand %vm2117_vm9, %vm1112_vm11  ;;  %vm2103_vm9 = vcmp.gt.f32.partialorder %v6973_v13, %v6936_v5 }
 0x8bc   : > { %2211 = vadd.xlane.f32.xlu0 %v2195_v14  ;;  %vm2149_vm5 = vmor %vm2101_vm1, %vm2133_vm10  ;;  %v2196_v37 = vmul.f32 %v4067_v19, %v6673_v63  ;;  %vm2104_vm10 = vcmp.gt.f32.partialorder %v6973_v13, %v6939_v59 }
 0x8bd   : > { %vm2134_vm13 = vmand %vm2118_vm12, %vm1113_vm0  ;;  %v4068_v8 = vsel %vm2149_vm5, 1.0, %v8146_v21 }
 0x8be   : > { %vm2150_vm15 = vmor %vm2102_vm4, %vm2134_vm13  ;;  %v2197_v28 = vmul.f32 %v4068_v8, %v6673_v63  ;;  %vm2121_vm4 = vcmp.eq.f32.partialorder %v6973_v13, %v6942_v24 }
 0x8bf   : > { %vm2135_vm1 = vmand %vm2119_vm7, %vm1114_vm8  ;;  %v4069_v14 = vsel %vm2150_vm15, 1.0, %v8146_v21  ;;  %vm2105_vm7 = vcmp.gt.f32.partialorder %v6973_v13, %v6942_v24  ;;  %vm8147_vm15 = vcmp.lt.s32.totalorder %v5811_v1, %v6221_v38  ;;  %v8165_v24 = vmax.f32 %v6827_v9, 0.0 }
 0x8c0   : > { %2213 = vadd.xlane.f32.xlu0 %v2196_v37  ;;  %vm2151_vm12 = vmor %vm2103_vm9, %vm2135_vm1  ;;  %v2198_v19 = vmul.f32 %v4069_v14, %v6673_v63  ;;  %vm2122_vm1 = vcmp.eq.f32.partialorder %v6973_v13, %v6945_v6 }
 0x8c1   : > { %vm2136_vm5 = vmand %vm2120_vm6, %vm8099_vm14  ;;  %v4070_v37 = vsel %vm2151_vm12, 1.0, %v8146_v21  ;;  %vm2106_vm12 = vcmp.gt.f32.partialorder %v6973_v13, %v6945_v6 }
 0x8c2   : > { %vm2152_vm13 = vmor %vm2104_vm10, %vm2136_vm5  ;;  %v2199_v8 = vmul.f32 %v4070_v37, %v6673_v63  ;;  %vm8148_vm10 = vcmp.lt.s32.totalorder %v5811_v1, %v6235_v36 }
 0x8c3   : > { %vm2137_vm9 = vmand %vm2121_vm4, %vm8147_vm15  ;;  %vm2123_vm4 = vcmp.eq.f32.partialorder %v6973_v13, %v6948_v56 }
 0x8c4   : > { %2215 = vadd.xlane.f32.xlu0 %v2197_v28  ;;  %v4071_v28 = vsel %vm2152_vm13, 1.0, %v8146_v21  ;;  %vm2153_vm6 = vmor %vm2105_vm7, %vm2137_vm9  ;;  %vm2107_vm13 = vcmp.gt.f32.partialorder %v6973_v13, %v6948_v56  ;;  %vm8149_vm7 = vcmp.lt.s32.totalorder %v5811_v1, %v6249_v18  ;;  %v8171_v56 = vmax.f32 %v6841_v45, 0.0 }
 0x8c5   : > { %vm2138_vm5 = vmand %vm2122_vm1, %vm8148_vm10  ;;  %v2200_v14 = vmul.f32 %v4071_v28, %v6673_v63  ;;  %vm2124_vm1 = vcmp.eq.f32.partialorder %v6973_v13, %v6951_v26  ;;  %v8172_v45 = vmax.f32 %v6851_v0, 0.0 }
 0x8c6   : > { %vm2154_vm15 = vmor %vm2106_vm12, %vm2138_vm5  ;;  %vm8150_vm12 = vcmp.lt.s32.totalorder %v5811_v1, %v6263_v16 }
 0x8c7   : > { %vm2139_vm9 = vmand %vm2123_vm4, %vm8149_vm7  ;;  %vm2125_vm4 = vcmp.eq.f32.partialorder %v6973_v13, %v6954_v51 }
 0x8c8   : > { %2217 = vadd.xlane.f32.xlu0 %v2198_v19  ;;  %v4072_v19 = vsel %vm2153_vm6, 1.0, %v8146_v21  ;;  %vm2155_vm10 = vmor %vm2107_vm13, %vm2139_vm9  ;;  %vm2108_vm6 = vcmp.gt.f32.partialorder %v6973_v13, %v6951_v26  ;;  %vm8151_vm13 = vcmp.lt.s32.totalorder %v5811_v1, %v6272_v60 }
 0x8c9   : > { %v2201_v37 = vmul.f32 %v4072_v19, %v6673_v63  ;;  %vm2140_vm5 = vmand %vm2124_vm1, %vm8150_vm12  ;;  %vm2126_vm1 = vcmp.eq.f32.partialorder %v6973_v13, %v6957_v31 }
 0x8ca   : > { %vm2156_vm7 = vmor %vm2108_vm6, %vm2140_vm5  ;;  %vm8152_vm6 = vcmp.lt.s32.totalorder %v5811_v1, %v6291_v58 }
 0x8cb   : > { %vm2141_vm9 = vmand %vm2125_vm4, %vm8151_vm13  ;;  %vm2127_vm4 = vcmp.eq.f32.partialorder %v6973_v13, %v6960_v30 }
 0x8cc   : > { %2219 = vadd.xlane.f32.xlu0 %v2199_v8  ;;  %v4073_v8 = vsel %vm2154_vm15, 1.0, %v8146_v21  ;;  %vm2109_vm15 = vcmp.gt.f32.partialorder %v6973_v13, %v6954_v51  ;;  %vm2142_vm5 = vmand %vm2126_vm1, %vm8152_vm6  ;;  %vm2128_vm1 = vcmp.eq.f32.partialorder %v6973_v13, %v6963_v7 }
 0x8cd   : > { %v2202_v28 = vmul.f32 %v4073_v8, %v6673_v63  ;;  %vm2157_vm12 = vmor %vm2109_vm15, %vm2141_vm9  ;;  %vm8153_vm15 = vcmp.lt.s32.totalorder %v5811_v1, %v6306_v52 }
 0x8ce   : > { %vm2143_vm9 = vmand %vm2127_vm4, %vm8153_vm15  ;;  %vm2129_vm4 = vcmp.eq.f32.partialorder %v6973_v13, %v6966_v32 }
 0x8d0   : > { %2221 = vadd.xlane.f32.xlu0 %v2200_v14  ;;  %v4074_v14 = vsel %vm2155_vm10, 1.0, %v8146_v21  ;;  %vm2110_vm10 = vcmp.gt.f32.partialorder %v6973_v13, %v6957_v31 }
 0x8d1   : > { %v2203_v19 = vmul.f32 %v4074_v14, %v6673_v63  ;;  %vm2158_vm13 = vmor %vm2110_vm10, %vm2142_vm5  ;;  %vm8154_vm10 = vcmp.lt.s32.totalorder %v5811_v1, %v6320_v12 }
 0x8d2   : > { %vm2144_vm5 = vmand %vm2128_vm1, %vm8154_vm10  ;;  %vm2130_vm1 = vcmp.eq.f32.partialorder %v6973_v13, %v6969_v22 }
 0x8d4   : > { %2223 = vadd.xlane.f32.xlu0 %v2201_v37  ;;  %v4075_v37 = vsel %vm2156_vm7, 1.0, %v8146_v21  ;;  %vm2111_vm7 = vcmp.gt.f32.partialorder %v6973_v13, %v6960_v30 }
 0x8d5   : > { %v2204_v8 = vmul.f32 %v4075_v37, %v6673_v63  ;;  %vm2159_vm6 = vmor %vm2111_vm7, %vm2143_vm9  ;;  %vm8155_vm7 = vcmp.lt.s32.totalorder %v5811_v1, %v6334_v10  ;;  %v7119_v10 = vpop.xlane.xlu0 %1340 }
 0x8d6   : > { %vm2145_vm9 = vmand %vm2129_vm4, %vm8155_vm7 }
 0x8d8   : > { %2225 = vadd.xlane.f32.xlu0 %v2202_v28  ;;  %v4076_v28 = vsel %vm2157_vm12, 1.0, %v8146_v21  ;;  %vm2112_vm12 = vcmp.gt.f32.partialorder %v6973_v13, %v6963_v7 }
 0x8d9   : > { %v2205_v14 = vmul.f32 %v4076_v28, %v6673_v63  ;;  %vm2160_vm15 = vmor %vm2112_vm12, %vm2144_vm5  ;;  %vm8156_vm12 = vcmp.lt.s32.totalorder %v5811_v1, %v6348_v53 }
 0x8da   : > { %vm2146_vm5 = vmand %vm2130_vm1, %vm8156_vm12 }
 0x8dc   : > { %2227 = vadd.xlane.f32.xlu0 %v2203_v19  ;;  %v4077_v19 = vsel %vm2158_vm13, 1.0, %v8146_v21  ;;  %vm2113_vm13 = vcmp.gt.f32.partialorder %v6973_v13, %v6966_v32 }
 0x8dd   : > { %v2206_v37 = vmul.f32 %v4077_v19, %v6673_v63  ;;  %vm2161_vm10 = vmor %vm2113_vm13, %vm2145_vm9 }
 0x8e0   : > { %2229 = vadd.xlane.f32.xlu0 %v2204_v8  ;;  %v4078_v8 = vsel %vm2159_vm6, 1.0, %v8146_v21  ;;  %vm2114_vm6 = vcmp.gt.f32.partialorder %v6973_v13, %v6969_v22  ;;  %v2243_v13 = vmul.f32 0.5, %v7119_v10 }
 0x8e1   : > { %v2207_v28 = vmul.f32 %v4078_v8, %v6673_v63  ;;  %vm2162_vm4 = vmor %vm2114_vm6, %vm2146_vm5 }
 0x8e2   : > { %v4081_v11 = vsel %vm2162_vm4, 1.0, %v8146_v21 }
 0x8e4   : > { %2231 = vadd.xlane.f32.xlu0 %v2205_v14  ;;  %v4079_v14 = vsel %vm2160_vm15, 1.0, %v8146_v21 }
 0x8e5   : > { %v2208_v19 = vmul.f32 %v4079_v14, %v6673_v63  ;;  %v2244_v14 = vceil.f32 %v2243_v13  ;;  %v8160_v13 = vmax.f32 %v6813_v35, 0.0 }
 0x8e8   : > { %2233 = vadd.xlane.f32.xlu0 %v2206_v37  ;;  %v4080_v37 = vsel %vm2161_vm10, 1.0, %v8146_v21 }
 0x8e9   : > { %v2209_v8 = vmul.f32 %v4080_v37, %v6673_v63  ;;  %v8157_v37 = vld [vmem:[#allocation19_spill] sm:$0xff] }
 0x8ec   : > { %2235 = vadd.xlane.f32.xlu0 %v2207_v28  ;;  %v2210_v28 = vmul.f32 %v4081_v11, %v6673_v63  ;;  %v5166_v11 = vpop.eup %5165 }
 0x8ed   : > { %v5168_v61 = vpop.eup %5167  ;;  %v2364_v34 = vmul.f32 %v5166_v11, %v8159_v55  ;;  %v8164_v55 = vmax.f32 %v6820_v57, 0.0  ;;  %v8166_v57 = vld [vmem:[#allocation21_spill] sm:$0xff] }
 0x8f0   : > { %2237 = vadd.xlane.f32.xlu0 %v2208_v19  ;;  %v7125_v19 = vrot.slane %v2244_v14, %v5974_v40  ;;  %v2365_v14 = vmul.f32 %v5168_v61, %v8160_v13 }
 0x8f4   : > { %2239 = vadd.xlane.f32.xlu0 %v2209_v8 }
 0x8f8   : > { %2241 = vadd.xlane.f32.xlu0 %v2210_v28 }
 0x949   : > { %v2212_v53 = vpop.xlane.xlu0 %2211 }
 0x94a   : > { %vm2249_vm15 = vcmp.lt.f32.partialorder %v2212_v53, %v7125_v19 }
 0x94b   : > { %v4082_v63 = vsel %vm2249_vm15, 1.0, %v8146_v21 }
 0x94c   : > { %v7132_v8 = vmul.f32 %v4082_v63, %v8157_v37 }
 0x94d   : > { %v2214_v28 = vpop.xlane.xlu0 %2213 }
 0x94e   : > { %vm2250_vm13 = vcmp.lt.f32.partialorder %v2214_v28, %v7125_v19  ;;  %2313 = vxpose.xlu0.b32.start [1/16] (narrow) %v7132_v8, 8  ;;  %v2380_v37 = vmul.f32 %v2364_v34, %v7132_v8  ;;  %v5170_v28 = vpop.eup %5169  ;;  %vm2396_vm10 = vcmp.gt.f32.partialorder %v7132_v8, 0.5 }
 0x94f   : > { %v4083_v2 = vsel %vm2250_vm13, 1.0, %v8146_v21  ;;  %v5172_v35 = vpop.eup %5171  ;;  %v2366_v34 = vmul.f32 %v5170_v28, %v8164_v55 }
 0x950   : > { %v7139_v53 = vmul.f32 %v4083_v2, %v6396_v4  ;;  %v2367_v13 = vmul.f32 %v5172_v35, %v8165_v24  ;;  %v8168_v35 = vmax.f32 %v6837_v17, 0.0 }
 0x951   : > { %v2216_v63 = vpop.xlane.xlu0 %2215 }
 0x952   : > { %8158 = vst [vmem:[#allocation19_spill] sm:$0xff] %v7139_v53  ;;  %vm2251_vm7 = vcmp.lt.f32.partialorder %v2216_v63, %v7125_v19  ;;  %2314 = vxpose.xlu0.b32.cont [2/16] (narrow) %v7139_v53, 8  ;;  %v2381_v5 = vmul.f32 %v2365_v14, %v7139_v53  ;;  %v5174_v14 = vpop.eup %5173  ;;  %vm2397_vm5 = vcmp.gt.f32.partialorder %v7139_v53, 0.5 }
 0x953   : > { %v4084_v4 = vsel %vm2251_vm7, 1.0, %v8146_v21  ;;  %v5176_v55 = vpop.eup %5175 }
 0x954   : > { %v7152_v41 = vmul.f32 %v4084_v4, %v6413_v43  ;;  %v7154_v11 = vpack.c.bf16 %v2381_v5, %v2380_v37  ;;  %v8162_v43 = vld [vmem:[#allocation20_spill] sm:$0xff]  ;;  %v5178_v17 = vpop.eup %5177 }
 0x955   : > { %v2218_v61 = vpop.xlane.xlu0 %2217 }
 0x956   : > { %8161 = vst [vmem:[#allocation34_spill] sm:$0xff] %v7152_v41  ;;  %vm2252_vm9 = vcmp.lt.f32.partialorder %v2218_v61, %v7125_v19  ;;  %4808 = vmatpush3.bf16.msra.mxu0 %v7154_v11  ;;  %2911 = vmatprep.mubr.bf16.mxu1 %v7154_v11  ;;  %v2382_v4 = vmul.f32 %v2366_v34, %v7152_v41  ;;  %vm2398_vm13 = vcmp.gt.f32.partialorder %v7152_v41, 0.5 }
 0x957   : > { %v4085_v59 = vsel %vm2252_vm9, 1.0, %v8146_v21  ;;  %2315 = vxpose.xlu0.b32.cont [3/16] (narrow) %v7152_v41, 8  ;;  %4809 = vmatprep.subr.bf16.mxu0 %v8123_v49 }
 0x958   : > { %v7164_v2 = vmul.f32 %v4085_v59, %v8162_v43  ;;  %v2368_v43 = vmul.f32 %v5174_v14, %v8168_v35  ;;  %v8169_v14 = vld [vmem:[#allocation22_spill] sm:$0xff] }
 0x959   : > { %v2220_v63 = vpop.xlane.xlu0 %2219 }
 0x95a   : > { %8163 = vst [vmem:[#allocation20_spill] sm:$0xff] %v7164_v2  ;;  %vm2253_vm1 = vcmp.lt.f32.partialorder %v2220_v63, %v7125_v19  ;;  %v7173_v61 = vmul.f32 %v2367_v13, %v7164_v2  ;;  %v7195_v13 = vsel %vm2396_vm10, %v2380_v37, -1e+30 }
 0x95b   : > { %v4086_v59 = vsel %vm2253_vm1, 1.0, %v8146_v21  ;;  %2316 = vxpose.xlu0.b32.cont [4/16] (narrow) %v7164_v2, 8  ;;  %vm2399_vm1 = vcmp.gt.f32.partialorder %v7164_v2, 0.5 }
 0x95c   : > { %v7179_v28 = vmul.f32 %v4086_v59, %v8166_v57  ;;  %v7182_v9 = vpack.c.bf16 %v7173_v61, %v2382_v4  ;;  %v2369_v59 = vmul.f32 %v5176_v55, %v8171_v56  ;;  %v2370_v55 = vmul.f32 %v5178_v17, %v8172_v45 }
 0x95d   : > { %v2222_v34 = vpop.xlane.xlu0 %2221  ;;  %v2446_v17 = vsel %vm2398_vm13, %v2382_v4, -1e+30  ;;  %v8177_v45 = vmax.f32 %v6855_v20, 0.0  ;;  %v8178_v20 = vmax.f32 %v6865_v39, 0.0 }
 0x95e   : > { %8167 = vst [vmem:[#allocation21_spill] sm:$0xff] %v7179_v28  ;;  %vm2400_vm6 = vcmp.gt.f32.partialorder %v7179_v28, 0.5  ;;  %vm2254_vm12 = vcmp.lt.f32.partialorder %v2222_v34, %v7125_v19  ;;  %4811 = vmatpush3.bf16.msra.mxu0 %v7182_v9  ;;  %v2384_v6 = vmul.f32 %v2368_v43, %v7179_v28 }
 0x95f   : > { %v4087_v24 = vsel %vm2254_vm12, 1.0, %v8146_v21  ;;  %2317 = vxpose.xlu0.b32.cont [5/16] (narrow) %v7179_v28, 8  ;;  %4812 = vmatprep.subr.bf16.mxu0 %v8123_v49 }
 0x960   : > { %v7198_v63 = vmul.f32 %v4087_v24, %v8169_v14  ;;  %v7202_v57 = vsel %vm2400_vm6, %v2384_v6, -1e+30  ;;  %v7215_v24 = vsel %vm2397_vm5, %v2381_v5, -1e+30  ;;  %v8173_v14 = vld [vmem:[#allocation23_spill] sm:$0xff] }
 0x961   : > { %v2224_v35 = vpop.xlane.xlu0 %2223  ;;  %v2460_v43 = vmax.f32 %v7195_v13, %v7202_v57 }
 0x962   : > { %8170 = vst [vmem:[#allocation22_spill] sm:$0xff] %v7198_v63  ;;  %vm2401_vm4 = vcmp.gt.f32.partialorder %v7198_v63, 0.5  ;;  %vm2255_vm15 = vcmp.lt.f32.partialorder %v2224_v35, %v7125_v19  ;;  %v2385_v37 = vmul.f32 %v2369_v59, %v7198_v63  ;;  %v5180_v35 = vpop.eup %5179 }
 0x963   : > { %v4088_v34 = vsel %vm2255_vm15, 1.0, %v8146_v21  ;;  %2318 = vxpose.xlu0.b32.cont [6/16] (narrow) %v7198_v63, 8  ;;  %v5060_v63 = vld [vmem:[#allocation8 + $0x128] sm:$0xff]  }
 0x964   : > { %v7218_v56 = vmul.f32 %v4088_v34, %v8173_v14  ;;  %v7220_v13 = vsel %vm2401_vm4, %v2385_v37, -1e+30  ;;  %v7222_v57 = vpack.c.bf16 %v2385_v37, %v2384_v6  ;;  %v5182_v6 = vpop.eup %5181  ;;  %v8175_v37 = vld [vmem:[#allocation24_spill] sm:$0xff] }
 0x965   : > { %v2226_v26 = vpop.xlane.xlu0 %2225  ;;  %v2461_v59 = vmax.f32 %v7215_v24, %v7220_v13  ;;  %v2371_v24 = vmul.f32 %v5180_v35, %v8177_v45  ;;  %v2372_v35 = vmul.f32 %v5182_v6, %v8178_v20  ;;  %v8183_v6 = vmax.f32 %v6869_v62, 0.0 }
 0x966   : > { %8174 = vst [vmem:[#allocation23_spill] sm:$0xff] %v7218_v56  ;;  %vm2402_vm7 = vcmp.gt.f32.partialorder %v7218_v56, 0.5  ;;  %vm2256_vm9 = vcmp.lt.f32.partialorder %v2226_v26, %v7125_v19  ;;  %4814 = vmatpush3.bf16.msra.mxu0 %v7222_v57  ;;  %v2386_v0 = vmul.f32 %v2370_v55, %v7218_v56  ;;  %v2447_v26 = vsel %vm2399_vm1, %v7173_v61, -1e+30  ;;  %v8181_v61 = vld [vmem:[#allocation26_spill] sm:$0xff] }
 0x967   : > { %v4089_v5 = vsel %vm2256_vm9, 1.0, %v8146_v21  ;;  %2319 = vxpose.xlu0.b32.cont [7/16] (narrow) %v7218_v56, 8  ;;  %4815 = vmatprep.subr.bf16.mxu0 %v8123_v49  ;;  %v5059_v56 = vld [vmem:[#allocation8 + $0x168] sm:$0xff]  }
 0x968   : > { %v7236_v34 = vmul.f32 %v4089_v5, %v8175_v37  ;;  %v2450_v14 = vsel %vm2402_vm7, %v2386_v0, -1e+30  ;;  %v8179_v5 = vld [vmem:[#allocation25_spill] sm:$0xff] }
 0x969   : > { %v2228_v55 = vpop.xlane.xlu0 %2227  ;;  %v2462_v13 = vmax.f32 %v2446_v17, %v2450_v14  ;;  %v5184_v14 = vpop.eup %5183 }
 0x96a   : > { %8176 = vst [vmem:[#allocation24_spill] sm:$0xff] %v7236_v34  ;;  %vm2403_vm10 = vcmp.gt.f32.partialorder %v7236_v34, 0.5  ;;  %vm2257_vm6 = vcmp.lt.f32.partialorder %v2228_v55, %v7125_v19  ;;  %v2387_v51 = vmul.f32 %v2371_v24, %v7236_v34  ;;  %v5186_v20 = vpop.eup %5185 }
 0x96b   : > { %v4090_v4 = vsel %vm2257_vm6, 1.0, %v8146_v21  ;;  %2320 = vxpose.xlu0.b32.cont [8/16] (narrow) %v7236_v34, 8  ;;  %v5057_v34 = vld [vmem:[#allocation8 + $0x160] sm:$0xff]  }
 0x96c   : > { %v7251_v37 = vmul.f32 %v4090_v4, %v8179_v5  ;;  %v2451_v17 = vsel %vm2403_vm10, %v2387_v51, -1e+30  ;;  %v7253_v45 = vpack.c.bf16 %v2387_v51, %v2386_v0  ;;  %v2373_v51 = vmul.f32 %v5184_v14, %v8183_v6 }
 0x96d   : > { %v2230_v55 = vpop.xlane.xlu0 %2229  ;;  %v2463_v24 = vmax.f32 %v2447_v26, %v2451_v17  ;;  %v8184_v17 = vld [vmem:[#allocation27_spill] sm:$0xff] }
 0x96e   : > { %8180 = vst [vmem:[#allocation25_spill] sm:$0xff] %v7251_v37  ;;  %vm2404_vm12 = vcmp.gt.f32.partialorder %v7251_v37, 0.5  ;;  %vm2258_vm5 = vcmp.lt.f32.partialorder %v2230_v55, %v7125_v19  ;;  %4817 = vmatpush3.bf16.msra.mxu0 %v7253_v45  ;;  %v2388_v39 = vmul.f32 %v2372_v35, %v7251_v37 }
 0x96f   : > { %v4091_v31 = vsel %vm2258_vm5, 1.0, %v8146_v21  ;;  %2321 = vxpose.xlu0.b32.cont [9/16] (narrow) %v7251_v37, 8  ;;  %4818 = vmatprep.subr.bf16.mxu0 %v8123_v49  ;;  %v5056_v37 = vld [vmem:[#allocation8 + $0x118] sm:$0xff]  }
 0x970   : > { %v7264_v0 = vmul.f32 %v4091_v31, %v8181_v61  ;;  %v2452_v4 = vsel %vm2404_vm12, %v2388_v39, -1e+30  ;;  %v5188_v61 = vpop.eup %5187 }
 0x971   : > { %v2232_v26 = vpop.xlane.xlu0 %2231  ;;  %v7268_v5 = vmax.f32 %v2460_v43, %v2452_v4  ;;  %v8186_v43 = vmax.f32 %v6879_v25, 0.0  ;;  %v8187_v25 = vld [vmem:[#allocation28_spill] sm:$0xff] }
 0x972   : > { %8182 = vst [vmem:[#allocation26_spill] sm:$0xff] %v7264_v0  ;;  %vm2405_vm4 = vcmp.gt.f32.partialorder %v7264_v0, 0.5  ;;  %vm2259_vm15 = vcmp.lt.f32.partialorder %v2232_v26, %v7125_v19  ;;  %v2389_v30 = vmul.f32 %v2373_v51, %v7264_v0 }
 0x973   : > { %v4092_v35 = vsel %vm2259_vm15, 1.0, %v8146_v21  ;;  %2322 = vxpose.xlu0.b32.cont [10/16] (narrow) %v7264_v0, 8  ;;  %v2374_v31 = vmul.f32 %v5186_v20, %v8186_v43  ;;  %v8190_v43 = vld [vmem:[#allocation29_spill] sm:$0xff] }
 0x974   : > { %v7277_v62 = vmul.f32 %v4092_v35, %v8184_v17  ;;  %v2453_v14 = vsel %vm2405_vm4, %v2389_v30, -1e+30  ;;  %v7279_v55 = vpack.c.bf16 %v2389_v30, %v2388_v39  ;;  %v5190_v30 = vpop.eup %5189  ;;  %v5054_v0 = vld [vmem:[#allocation8 + $0x110] sm:$0xff]  }
 0x975   : > { %v2234_v6 = vpop.xlane.xlu0 %2233  ;;  %v2465_v4 = vmax.f32 %v2461_v59, %v2453_v14  ;;  %v8189_v59 = vmax.f32 %v6883_v54, 0.0 }
 0x976   : > { %8185 = vst [vmem:[#allocation27_spill] sm:$0xff] %v7277_v62  ;;  %vm2406_vm13 = vcmp.gt.f32.partialorder %v7277_v62, 0.5  ;;  %vm2260_vm7 = vcmp.lt.f32.partialorder %v2234_v6, %v7125_v19  ;;  %4820 = vmatpush3.bf16.msra.mxu0 %v7279_v55  ;;  %v2390_v7 = vmul.f32 %v2374_v31, %v7277_v62 }
 0x977   : > { %v4093_v51 = vsel %vm2260_vm7, 1.0, %v8146_v21  ;;  %2323 = vxpose.xlu0.b32.cont [11/16] (narrow) %v7277_v62, 8  ;;  %4821 = vmatprep.subr.bf16.mxu0 %v8123_v49  ;;  %v2375_v20 = vmul.f32 %v5188_v61, %v8189_v59  ;;  %v5053_v62 = vld [vmem:[#allocation8 + $0x150] sm:$0xff]   ;;  %vm8202_vm7 = vmmov 0  }
 0x978   : > { %v7292_v39 = vmul.f32 %v4093_v51, %v8187_v25  ;;  %v2454_v26 = vsel %vm2406_vm13, %v2390_v7, -1e+30  ;;  %v5192_v51 = vpop.eup %5191 }
 0x979   : > { %v2236_v35 = vpop.xlane.xlu0 %2235  ;;  %v2466_v17 = vmax.f32 %v2462_v13, %v2454_v26  ;;  %v8192_v13 = vmax.f32 %v6893_v44, 0.0  ;;  %v8195_v26 = vmax.f32 %v6897_v27, 0.0 }
 0x97a   : > { %8188 = vst [vmem:[#allocation28_spill] sm:$0xff] %v7292_v39  ;;  %vm2407_vm9 = vcmp.gt.f32.partialorder %v7292_v39, 0.5  ;;  %vm2261_vm1 = vcmp.lt.f32.partialorder %v2236_v35, %v7125_v19  ;;  %v2391_v32 = vmul.f32 %v2375_v20, %v7292_v39  ;;  %v5194_v35 = vpop.eup %5193 }
 0x97b   : > { %v4094_v14 = vsel %vm2261_vm1, 1.0, %v8146_v21  ;;  %2324 = vxpose.xlu0.b32.cont [12/16] (narrow) %v7292_v39, 8  ;;  %v2376_v6 = vmul.f32 %v5190_v30, %v8192_v13  ;;  %v8196_v13 = vld [vmem:[#allocation31_spill] sm:$0xff]  ;;  %v5051_v39 = vld [vmem:[#allocation8 + $0x148] sm:$0xff]   ;;  %vm8208_vm1 = vcmask 1040384  }
 0x97c   : > { %v7303_v31 = vmul.f32 %v4094_v14, %v8190_v43  ;;  %v2455_v54 = vsel %vm2407_vm9, %v2391_v32, -1e+30  ;;  %v7305_v61 = vpack.c.bf16 %v2391_v32, %v2390_v7  ;;  %v8193_v7 = vld [vmem:[#allocation30_spill] sm:$0xff]  ;;  %vm2992_vm9 = vcmask 1045509  }
 0x97d   : > { %v2238_v25 = vpop.xlane.xlu0 %2237  ;;  %v2467_v59 = vmax.f32 %v2463_v24, %v2455_v54  ;;  %v2377_v24 = vmul.f32 %v5192_v51, %v8195_v26 }
 0x97e   : > { %8191 = vst [vmem:[#allocation29_spill] sm:$0xff] %v7303_v31  ;;  %vm2408_vm10 = vcmp.gt.f32.partialorder %v7303_v31, 0.5  ;;  %vm2262_vm6 = vcmp.lt.f32.partialorder %v2238_v25, %v7125_v19  ;;  %4823 = vmatpush3.bf16.msra.mxu0 %v7305_v61  ;;  %v2392_v22 = vmul.f32 %v2376_v6, %v7303_v31  ;;  %v8198_v25 = vmax.f32 %v6907_v42, 0.0  ;;  %v8199_v42 = vld [vmem:[#allocation32_spill] sm:$0xff] }
 0x97f   : > { %v4095_v20 = vsel %vm2262_vm6, 1.0, %v8146_v21  ;;  %2325 = vxpose.xlu0.b32.cont [13/16] (narrow) %v7303_v31, 8  ;;  %4824 = vmatprep.subr.bf16.mxu0 %v8123_v49  ;;  %v5050_v31 = vld [vmem:[#allocation8 + $0x100] sm:$0xff]  }
 0x980   : > { %v7317_v44 = vmul.f32 %v4095_v20, %v8193_v7  ;;  %v2456_v30 = vsel %vm2408_vm10, %v2392_v22, -1e+30  ;;  %v2378_v20 = vmul.f32 %v5194_v35, %v8198_v25  ;;  %vm1475_vm10 = vcmp.gt.f32.partialorder %v7119_v10, 0.5 }
 0x981   : > { %v2240_v32 = vpop.xlane.xlu0 %2239  ;;  %v2468_v14 = vmax.f32 %v7268_v5, %v2456_v30  ;;  %v5196_v5 = vpop.eup %5195 }
 0x982   : > { %8194 = vst [vmem:[#allocation30_spill] sm:$0xff] %v7317_v44  ;;  %vm2409_vm12 = vcmp.gt.f32.partialorder %v7317_v44, 0.5  ;;  %vm2263_vm5 = vcmp.lt.f32.partialorder %v2240_v32, %v7125_v19  ;;  %v2393_v43 = vmul.f32 %v2377_v24, %v7317_v44 }
 0x983   : > { %v4096_v54 = vsel %vm2263_vm5, 1.0, %v8146_v21  ;;  %2326 = vxpose.xlu0.b32.cont [14/16] (narrow) %v7317_v44, 8 }
 0x984   : > { %v7328_v6 = vmul.f32 %v4096_v54, %v8196_v13  ;;  %v2457_v27 = vsel %vm2409_vm12, %v2393_v43, -1e+30  ;;  %v7330_v51 = vpack.c.bf16 %v2393_v43, %v2392_v22 }
 0x985   : > { %v2242_v7 = vpop.xlane.xlu0 %2241  ;;  %v2469_v26 = vmax.f32 %v2465_v4, %v2457_v27  ;;  %v8201_v4 = vmax.f32 %v6911_v15, 0.0 }
 0x986   : > { %8197 = vst [vmem:[#allocation31_spill] sm:$0xff] %v7328_v6  ;;  %vm2410_vm4 = vcmp.gt.f32.partialorder %v7328_v6, 0.5  ;;  %vm2264_vm15 = vcmp.lt.f32.partialorder %v2242_v7, %v7125_v19  ;;  %4826 = vmatpush3.bf16.msra.mxu0 %v7330_v51  ;;  %v2394_v24 = vmul.f32 %v2378_v20, %v7328_v6  ;;  %v5291_v7 = vld [vmem:[%s5795_s22] sm:$0xff] }
 0x987   : > { %v4097_v30 = vsel %vm2264_vm15, 1.0, %v8146_v21  ;;  %2327 = vxpose.xlu0.b32.cont [15/16] (narrow) %v7328_v6, 8  ;;  %4827 = vmatprep.subr.bf16.mxu0 %v8123_v49  ;;  %v2472_v22 = vmax.f32 %v2468_v14, %v2469_v26  ;;  %v2379_v32 = vmul.f32 %v5196_v5, %v8201_v4 }
 0x988   : > { %v7342_v35 = vmul.f32 %v4097_v30, %v8199_v42  ;;  %v2458_v43 = vsel %vm2410_vm4, %v2394_v24, -1e+30  ;;  %v5293_v30 = vld [vmem:[%s5795_s22 + $0x10] sm:$0xff]  ;;  %v5294_v42 = vld [vmem:[%s5795_s22 + $0x18] sm:$0xff] }
 0x989   : > { %v2470_v54 = vmax.f32 %v2466_v17, %v2458_v43 }
 0x98a   : > { %8200 = vst [vmem:[#allocation32_spill] sm:$0xff] %v7342_v35  ;;  %vm2411_vm13 = vcmp.gt.f32.partialorder %v7342_v35, 0.5  ;;  %v2395_v19 = vmul.f32 %v2379_v32, %v7342_v35  ;;  %v5295_v32 = vld [vmem:[%s5795_s22 + $0x20] sm:$0xff] }
 0x98b   : > { %2328 = vxpose.xlu0.b32.end [16/16] (narrow) %v7342_v35, 8 }
 0x98c   : > { %v2459_v13 = vsel %vm2411_vm13, %v2395_v19, -1e+30  ;;  %v7349_v27 = vpack.c.bf16 %v2395_v19, %v2394_v24 }
 0x98d   : > { %v2471_v14 = vmax.f32 %v2467_v59, %v2459_v13  ;;  %v5290_v59 = vld [vmem:[%s5795_s22 + $0x40] sm:$0xff]  ;;  %v5297_v13 = vld [vmem:[%s5795_s22 + $0x30] sm:$0xff] }
 0x98e   : > { %4829 = vmatpush3.bf16.msra.mxu0 %v7349_v27 }
 0x98f   : > { %4645 = vmatprep.subr.bf16.mxu0 %v7154_v11  ;;  %v2473_v15 = vmax.f32 %v2470_v54, %v2471_v14  ;;  %v5296_v54 = vld [vmem:[%s5795_s22 + $0x28] sm:$0xff] }
 0x991   : > { %v7353_v25 = vmax.f32 %v2472_v22, %v2473_v15  ;;  %v5298_v15 = vld [vmem:[%s5795_s22 + $0x38] sm:$0xff] }
 0x9cf   : > { %v7355_v17 = vpop.trf.xlu0 }
 0x9d0   : > { %v7359_v20 = vrot.slane %v7355_v17, %v5974_v40  ;;  %4643 = vmatmul.mubr.f32.vlgmr.msra.gmra.mrb[18].mxu0 %v7355_v17 }
 0x9d1   : > { %4646 = vmatpush3.bf16.msra.mxu0 %v7154_v11  ;;  %v5292_v11 = vld [vmem:[%s5795_s22 + $0x8] sm:$0xff] }
 0x9d2   : > { %4647 = vmatprep.subr.bf16.mxu0 %v7182_v9  ;;  %v7366_v5 = vmul.f32 %v5290_v59, %v7359_v20  ;;  %v7370_v26 = vmul.f32 %v5291_v7, %v7359_v20  ;;  %v7378_v24 = vmul.f32 %v5292_v11, %v7359_v20  ;;  %v7385_v22 = vmul.f32 %v5293_v30, %v7359_v20  ;;  %v5299_v7 = vld [vmem:[%s5795_s22 + $0x48] sm:$0xff]  ;;  %v5300_v30 = vld [vmem:[%s5795_s22 + $0x50] sm:$0xff] }
 0x9d3   : > { %v7392_v4 = vmul.f32 %v5294_v42, %v7359_v20  ;;  %v7399_v43 = vmul.f32 %v5295_v32, %v7359_v20  ;;  %v7406_v19 = vmul.f32 %v5296_v54, %v7359_v20  ;;  %v7413_v14 = vmul.f32 %v5297_v13, %v7359_v20  ;;  %v5301_v32 = vld [vmem:[%s5795_s22 + $0x58] sm:$0xff]  ;;  %v5302_v13 = vld [vmem:[%s5795_s22 + $0x60] sm:$0xff] }
 0x9d4   : > { %2594 = vadd.xlane.f32.xlu0 %v7366_v5  ;;  %2578 = vadd.xlane.f32.xlu1 %v7370_v26  ;;  %v7419_v59 = vmul.f32 %v5298_v15, %v7359_v20  ;;  %v7425_v11 = vmul.f32 %v5299_v7, %v7359_v20  ;;  %v7430_v42 = vmul.f32 %v5300_v30, %v7359_v20  ;;  %v5303_v7 = vld [vmem:[%s5795_s22 + $0x68] sm:$0xff]  ;;  %v5304_v30 = vld [vmem:[%s5795_s22 + $0x70] sm:$0xff] }
 0x9d5   : > { %4648 = vmatpush3.bf16.msra.mxu0 %v7182_v9  ;;  %v7435_v54 = vmul.f32 %v5301_v32, %v7359_v20  ;;  %v7440_v15 = vmul.f32 %v5302_v13, %v7359_v20  ;;  %v7445_v35 = vmul.f32 %v5303_v7, %v7359_v20  ;;  %v7450_v6 = vmul.f32 %v5304_v30, %v7359_v20  ;;  %v5305_v32 = vld [vmem:[%s5795_s22 + $0x78] sm:$0xff]  ;;  %v5049_v13 = vld [vmem:[#allocation8 + $0x140] sm:$0xff]   ;;  %v5052_v7 = vld [vmem:[#allocation8 + $0x108] sm:$0xff]  }
 0x9d6   : > { %4649 = vmatprep.subr.bf16.mxu0 %v7222_v57  ;;  %v7455_v44 = vmul.f32 %v5305_v32, %v7359_v20  ;;  %4361 = vmatprep.subr.bf16.mxu1 %v5049_v13  ;;  %v5055_v30 = vld [vmem:[#allocation8 + $0x158] sm:$0xff]   ;;  %v5058_v32 = vld [vmem:[#allocation8 + $0x120] sm:$0xff]   ;;  %v5061_v13 = vld [vmem:[#allocation8 + $0x170] sm:$0xff]  }
 0x9d7   : > { %4362 = vmatpush3.bf16.msra.mxu1 %v5050_v31  ;;  %v5062_v31 = vld [vmem:[#allocation8 + $0x130] sm:$0xff]  }
 0x9d8   : > { %2580 = vadd.xlane.f32.xlu1 %v7378_v24  ;;  %4363 = vmatprep.subr.bf16.mxu1 %v5051_v39  ;;  %v5063_v39 = vld [vmem:[#allocation8 + $0x178] sm:$0xff]  }
 0x9d9   : > { %4650 = vmatpush3.bf16.msra.mxu0 %v7222_v57 }
 0x9da   : > { %4651 = vmatprep.subr.bf16.mxu0 %v7253_v45 }
 0x9db   : > { %4364 = vmatpush3.bf16.msra.mxu1 %v5052_v7  ;;  %v5064_v7 = vld [vmem:[#allocation8 + $0x138] sm:$0xff]  }
 0x9dc   : > { %2582 = vadd.xlane.f32.xlu1 %v7385_v22  ;;  %4365 = vmatprep.subr.bf16.mxu1 %v5053_v62 }
 0x9dd   : > { %4652 = vmatpush3.bf16.msra.mxu0 %v7253_v45 }
 0x9de   : > { %4653 = vmatprep.subr.bf16.mxu0 %v7279_v55 }
 0x9df   : > { %4366 = vmatpush3.bf16.msra.mxu1 %v5054_v0 }
 0x9e0   : > { %2584 = vadd.xlane.f32.xlu1 %v7392_v4  ;;  %4367 = vmatprep.subr.bf16.mxu1 %v5055_v30 }
 0x9e1   : > { %4654 = vmatpush3.bf16.msra.mxu0 %v7279_v55 }
 0x9e2   : > { %4655 = vmatprep.subr.bf16.mxu0 %v7305_v61 }
 0x9e3   : > { %4368 = vmatpush3.bf16.msra.mxu1 %v5056_v37 }
 0x9e4   : > { %2586 = vadd.xlane.f32.xlu1 %v7399_v43  ;;  %4369 = vmatprep.subr.bf16.mxu1 %v5057_v34 }
 0x9e5   : > { %4656 = vmatpush3.bf16.msra.mxu0 %v7305_v61 }
 0x9e6   : > { %4657 = vmatprep.subr.bf16.mxu0 %v7330_v51 }
 0x9e7   : > { %4370 = vmatpush3.bf16.msra.mxu1 %v5058_v32 }
 0x9e8   : > { %2588 = vadd.xlane.f32.xlu1 %v7406_v19  ;;  %4371 = vmatprep.subr.bf16.mxu1 %v5059_v56 }
 0x9e9   : > { %4658 = vmatpush3.bf16.msra.mxu0 %v7330_v51 }
 0x9ea   : > { %4659 = vmatprep.subr.bf16.mxu0 %v7349_v27 }
 0x9eb   : > { %4372 = vmatpush3.bf16.msra.mxu1 %v5060_v63 }
 0x9ec   : > { %2590 = vadd.xlane.f32.xlu1 %v7413_v14  ;;  %4373 = vmatprep.subr.bf16.mxu1 %v5061_v13 }
 0x9ed   : > { %4660 = vmatpush3.bf16.msra.mxu0 %v7349_v27 }
 0x9ee   : > { %4830 = vmatprep.subr.bf16.mxu0 %v8123_v49 }
 0x9ef   : > { %4374 = vmatpush3.bf16.msra.mxu1 %v5062_v31 }
 0x9f0   : > { %2592 = vadd.xlane.f32.xlu1 %v7419_v59  ;;  %4375 = vmatprep.subr.bf16.mxu1 %v5063_v39 }
 0x9f3   : > { %4376 = vmatpush3.bf16.msra.mxu1 %v5064_v7 }
 0x9f4   : > { %2596 = vadd.xlane.f32.xlu1 %v7425_v11  ;;  %4886 = vmatprep.subr.bf16.mxu1 %v8123_v49 }
 0x9f8   : > { %2598 = vadd.xlane.f32.xlu1 %v7430_v42 }
 0x9fc   : > { %2600 = vadd.xlane.f32.xlu1 %v7435_v54 }
 0xa00   : > { %2602 = vadd.xlane.f32.xlu1 %v7440_v15 }
 0xa04   : > { %2604 = vadd.xlane.f32.xlu1 %v7445_v35 }
 0xa08   : > { %2606 = vadd.xlane.f32.xlu1 %v7450_v6 }
 0xa0c   : > { %2608 = vadd.xlane.f32.xlu1 %v7455_v44 }
 0xa61   : > { %v2579_v0 = vpop.xlane.xlu1 %2578 }
 0xa62   : > { %v2610_v62 = vmax.f32 %v2579_v0, 1.0 }
 0xa64   : > { %5197 = vrcp.f32 %v2610_v62 }
 0xa65   : > { %v2581_v37 = vpop.xlane.xlu1 %2580 }
 0xa66   : > { %v2611_v34 = vmax.f32 %v2581_v37, 1.0 }
 0xa68   : > { %5199 = vrcp.f32 %v2611_v34 }
 0xa69   : > { %v2583_v30 = vpop.xlane.xlu1 %2582 }
 0xa6a   : > { %v2612_v32 = vmax.f32 %v2583_v30, 1.0 }
 0xa6c   : > { %5201 = vrcp.f32 %v2612_v32 }
 0xa6d   : > { %v2585_v56 = vpop.xlane.xlu1 %2584 }
 0xa6e   : > { %v2613_v63 = vmax.f32 %v2585_v56, 1.0  ;;  %v5198_v28 = vpop.eup %5197  ;;  %v2595_v56 = vpop.xlane.xlu0 %2594 }
 0xa6f   : > { %v2642_v39 = vmul.f32 %v5198_v28, %v7370_v26  ;;  %v2618_v28 = vmax.f32 %v2595_v56, 1.0 }
 0xa70   : > { %5203 = vrcp.f32 %v2613_v63 }
 0xa71   : > { %v2587_v13 = vpop.xlane.xlu1 %2586 }
 0xa72   : > { %v5200_v31 = vpop.eup %5199  ;;  %v2614_v2 = vmax.f32 %v2587_v13, 1.0 }
 0xa73   : > { %v2643_v7 = vmul.f32 %v5200_v31, %v7378_v24 }
 0xa74   : > { %5205 = vrcp.f32 %v2614_v2 }
 0xa75   : > { %v2589_v49 = vpop.xlane.xlu1 %2588  ;;  %v2658_v0 = vpack.c.bf16 %v2643_v7, %v2642_v39 }
 0xa76   : > { %v2615_v62 = vmax.f32 %v2589_v49, 1.0  ;;  %v5202_v37 = vpop.eup %5201 }
 0xa77   : > { %4661 = vmatprep.mubr.bf16.mxu0 %v2658_v0  ;;  %v2644_v63 = vmul.f32 %v5202_v37, %v7385_v22 }
 0xa78   : > { %5207 = vrcp.f32 %v2615_v62 }
 0xa79   : > { %v2591_v34 = vpop.xlane.xlu1 %2590 }
 0xa7a   : > { %v5204_v30 = vpop.eup %5203  ;;  %v2616_v32 = vmax.f32 %v2591_v34, 1.0 }
 0xa7b   : > { %v2645_v41 = vmul.f32 %v5204_v30, %v7392_v4 }
 0xa7c   : > { %5209 = vrcp.f32 %v2616_v32 }
 0xa7d   : > { %v2593_v13 = vpop.xlane.xlu1 %2592  ;;  %v2659_v53 = vpack.c.bf16 %v2645_v41, %v2644_v63 }
 0xa7e   : > { %v2617_v26 = vmax.f32 %v2593_v13, 1.0  ;;  %v5206_v24 = vpop.eup %5205 }
 0xa7f   : > { %4662 = vmatmul.mubr.bf16.vlgmr.msra.gmra.mrb[36].mxu0 %v2659_v53  ;;  %v2646_v39 = vmul.f32 %v5206_v24, %v7399_v43 }
 0xa80   : > { %5211 = vrcp.f32 %v2617_v26 }
 0xa81   : > { %v2597_v49 = vpop.xlane.xlu1 %2596  ;;  %5213 = vrcp.f32 %v2618_v28 }
 0xa82   : > { %v5208_v2 = vpop.eup %5207  ;;  %v2619_v31 = vmax.f32 %v2597_v49, 1.0 }
 0xa83   : > { %v2647_v7 = vmul.f32 %v5208_v2, %v7406_v19 }
 0xa84   : > { %5215 = vrcp.f32 %v2619_v31 }
 0xa85   : > { %v2599_v22 = vpop.xlane.xlu1 %2598  ;;  %v2660_v0 = vpack.c.bf16 %v2647_v7, %v2646_v39 }
 0xa86   : > { %v2620_v4 = vmax.f32 %v2599_v22, 1.0  ;;  %v5210_v41 = vpop.eup %5209 }
 0xa87   : > { %4665 = vmatprep.mubr.bf16.mxu0 %v2660_v0  ;;  %v2648_v34 = vmul.f32 %v5210_v41, %v7413_v14 }
 0xa88   : > { %5217 = vrcp.f32 %v2620_v4 }
 0xa89   : > { %v2601_v62 = vpop.xlane.xlu1 %2600 }
 0xa8a   : > { %v5212_v37 = vpop.eup %5211  ;;  %v2621_v53 = vmax.f32 %v2601_v62, 1.0 }
 0xa8b   : > { %v2649_v30 = vmul.f32 %v5212_v37, %v7419_v59  ;;  %v5214_v32 = vpop.eup %5213 }
 0xa8c   : > { %5219 = vrcp.f32 %v2621_v53  ;;  %v2650_v13 = vmul.f32 %v5214_v32, %v7366_v5 }
 0xa8d   : > { %v2603_v56 = vpop.xlane.xlu1 %2602  ;;  %v2661_v43 = vpack.c.bf16 %v2649_v30, %v2648_v34 }
 0xa8e   : > { %v5216_v63 = vpop.eup %5215  ;;  %v2622_v19 = vmax.f32 %v2603_v56, 1.0 }
 0xa8f   : > { %4666 = vmatmul.mubr.bf16.gmra.mrb[40].mxu0 %v2661_v43  ;;  %v2651_v28 = vmul.f32 %v5216_v63, %v7425_v11 }
 0xa90   : > { %5221 = vrcp.f32 %v2622_v19 }
 0xa91   : > { %v2605_v26 = vpop.xlane.xlu1 %2604  ;;  %v2662_v24 = vpack.c.bf16 %v2651_v28, %v2650_v13 }
 0xa92   : > { %v2623_v49 = vmax.f32 %v2605_v26, 1.0  ;;  %v5218_v2 = vpop.eup %5217 }
 0xa93   : > { %4669 = vmatprep.mubr.bf16.mxu0 %v2662_v24  ;;  %v2652_v39 = vmul.f32 %v5218_v2, %v7430_v42 }
 0xa94   : > { %5223 = vrcp.f32 %v2623_v49 }
 0xa95   : > { %v2607_v14 = vpop.xlane.xlu1 %2606 }
 0xa96   : > { %v5220_v59 = vpop.eup %5219  ;;  %v2624_v31 = vmax.f32 %v2607_v14, 1.0 }
 0xa97   : > { %v2653_v7 = vmul.f32 %v5220_v59, %v7435_v54 }
 0xa98   : > { %5225 = vrcp.f32 %v2624_v31 }
 0xa99   : > { %v2609_v22 = vpop.xlane.xlu1 %2608  ;;  %v2663_v0 = vpack.c.bf16 %v2653_v7, %v2652_v39 }
 0xa9a   : > { %v2625_v5 = vmax.f32 %v2609_v22, 1.0  ;;  %v5222_v11 = vpop.eup %5221 }
 0xa9b   : > { %4670 = vmatmul.mubr.bf16.gmra.mrb[44].mxu0 %v2663_v0  ;;  %v2654_v41 = vmul.f32 %v5222_v11, %v7440_v15  ;;  %v2993_v15 = vsel %vm2992_vm9, %v5960_v48, 0.0  ;;  %v5306_v11 = vld [vmem:[#allocation9] sm:$0xff] }
 0xa9c   : > { %5227 = vrcp.f32 %v2625_v5  ;;  %2994 = vadd.xlane.f32.xlu1 %v2993_v15 }
 0xa9e   : > { %v5224_v4 = vpop.eup %5223 }
 0xa9f   : > { %v2655_v62 = vmul.f32 %v5224_v4, %v7445_v35  ;;  %v2999_v4 = vsub.s32 5, %v5971_v29 }
 0xaa1   : > { %v2664_v37 = vpack.c.bf16 %v2655_v62, %v2654_v41 }
 0xaa2   : > { %v5226_v34 = vpop.eup %5225 }
 0xaa3   : > { %v7473_v53 = vpop.f32.mrb[18].mxu0  ;;  %4673 = vmatprep.mubr.bf16.mxu0 %v2664_v37  ;;  %v2656_v54 = vmul.f32 %v5226_v34, %v7450_v6 }
 0xaa4   : > { %v4644_v42 = vpop.f32.mrb[19].mxu0 }
 0xaa5   : > { %v7495_v42 = vrot.slane %v5306_v11, %v2999_v4 }
 0xaa6   : > { %v5228_v30 = vpop.eup %5227 }
 0xaa7   : > { %v2657_v32 = vmul.f32 %v5228_v30, %v7455_v44 }
 0xaa9   : > { %v2665_v56 = vpack.c.bf16 %v2657_v32, %v2656_v54 }
 0xaab   : > { %4674 = vmatmul.mubr.bf16.gmra.mrb[48].mxu0 %v2665_v56 }
 0xaac   : > { %4709 = vmatprep.mubr.msk.f32.mxu0 %vm8202_vm7, %v8146_v21 }
 0xb52   : > { %v4663_v35 = vpop.f32.mrb[36].mxu0 }
 0xb53   : > { %v2708_v43 = vpop.f32.mrb[37].mxu0 }
 0xb54   : > { %v4664_v63 = vpop.f32.mrb[38].mxu0 }
 0xb55   : > { %v2772_v19 = vpack.c.bf16 %v4664_v63, %v4663_v35  ;;  %v2711_v13 = vpop.f32.mrb[39].mxu0 }
 0xb56   : > { %v2771_v28 = vpack.c.bf16 %v2711_v13, %v2708_v43 }
 0xb58   : > { %2912 = vmatmul.mubr.bf16.vlgmr.msra.gmra.mrb[64].mxu1 %v2771_v28 }
 0xb59   : > { %2919 = vmatprep.mubr.bf16.mxu1 %v7182_v9 }
 0xb60   : > { %2920 = vmatmul.mubr.bf16.gmra.mrb[68].mxu1 %v2772_v19 }
 0xb61   : > { %2927 = vmatprep.mubr.bf16.mxu1 %v7222_v57 }
 0xb62   : > { %v4667_v44 = vpop.f32.mrb[40].mxu0 }
 0xb63   : > { %v2724_v6 = vpop.f32.mrb[41].mxu0 }
 0xb64   : > { %v4668_v26 = vpop.f32.mrb[42].mxu0 }
 0xb65   : > { %v2774_v24 = vpack.c.bf16 %v4668_v26, %v4667_v44  ;;  %v2727_v49 = vpop.f32.mrb[43].mxu0 }
 0xb66   : > { %v2773_v2 = vpack.c.bf16 %v2727_v49, %v2724_v6 }
 0xb68   : > { %2928 = vmatmul.mubr.bf16.gmra.mrb[72].mxu1 %v2773_v2 }
 0xb69   : > { %2935 = vmatprep.mubr.bf16.mxu1 %v7253_v45 }
 0xb6e   : > { %v4671_v48 = vpop.f32.mrb[44].mxu0 }
 0xb6f   : > { %v2740_v14 = vpop.f32.mrb[45].mxu0 }
 0xb70   : > { %v4672_v59 = vpop.f32.mrb[46].mxu0  ;;  %2936 = vmatmul.mubr.bf16.gmra.mrb[76].mxu1 %v2774_v24 }
 0xb71   : > { %v2776_v31 = vpack.c.bf16 %v4672_v59, %v4671_v48  ;;  %v2743_v39 = vpop.f32.mrb[47].mxu0  ;;  %2943 = vmatprep.mubr.bf16.mxu1 %v7279_v55  ;;  %v2781_v55 = vsub.s32 2, %v5971_v29 }
 0xb72   : > { %v2775_v9 = vpack.c.bf16 %v2743_v39, %v2740_v14 }
 0xb78   : > { %2944 = vmatmul.mubr.bf16.gmra.mrb[80].mxu1 %v2775_v9 }
 0xb79   : > { %2951 = vmatprep.mubr.bf16.mxu1 %v7305_v61  ;;  %v7490_v61 = vrot.slane %v5306_v11, %v2781_v55 }
 0xb7e   : > { %v4675_v57 = vpop.f32.mrb[48].mxu0 }
 0xb7f   : > { %v2756_v7 = vpop.f32.mrb[49].mxu0 }
 0xb80   : > { %v4676_v22 = vpop.f32.mrb[50].mxu0  ;;  %2952 = vmatmul.mubr.bf16.gmra.mrb[84].mxu1 %v2776_v31 }
 0xb81   : > { %v2778_v0 = vpack.c.bf16 %v4676_v22, %v4675_v57  ;;  %v2759_v5 = vpop.f32.mrb[51].mxu0  ;;  %2959 = vmatprep.mubr.bf16.mxu1 %v7330_v51 }
 0xb82   : > { %v2777_v45 = vpack.c.bf16 %v2759_v5, %v2756_v7 }
 0xb88   : > { %2960 = vmatmul.mubr.bf16.gmra.mrb[88].mxu1 %v2777_v45 }
 0xb89   : > { %2967 = vmatprep.mubr.bf16.mxu1 %v7349_v27 }
 0xb90   : > { %2968 = vmatmul.mubr.bf16.gmra.mrb[92].mxu1 %v2778_v0 }
 0xb91   : > { %4744 = vmatprep.mubr.msk.f32.mxu1 %vm8202_vm7, %v8146_v21 }
 0xc2b   : > { %v4377_v41 = vpop.f32.mrb[64].mxu1 }
 0xc2c   : > { %v4378_v62 = vpop.f32.mrb[65].mxu1 }
 0xc2d   : > { %v4379_v37 = vadd.f32 %v4378_v62, %v4377_v41  ;;  %v4380_v34 = vpop.f32.mrb[66].mxu1 }
 0xc2e   : > { %v4381_v51 = vpop.f32.mrb[67].mxu1 }
 0xc2f   : > { %v7498_v27 = vadd.f32 %v4379_v37, %v7490_v61  ;;  %v4382_v30 = vadd.f32 %v4381_v51, %v4380_v34 }
 0xc31   : > { %v8093_v54 = vmax.f32 %v7498_v27, 0.0  ;;  %v7502_v32 = vadd.f32 %v4382_v30, %v7490_v61 }
 0xc33   : > { %v8092_v56 = vmax.f32 %v7502_v32, 0.0  ;;  %v4383_v15 = vpop.f32.mrb[68].mxu1  ;;  %v3001_v35 = vmul.f32 %v7495_v42, %v8093_v54 }
 0xc34   : > { %v4384_v43 = vpop.f32.mrb[69].mxu1 }
 0xc35   : > { %v4385_v63 = vadd.f32 %v4384_v43, %v4383_v15  ;;  %v4386_v19 = vpop.f32.mrb[70].mxu1  ;;  %3017 = vadd.xlane.f32.xlu1 %v3001_v35  ;;  %v3002_v6 = vmul.f32 %v7495_v42, %v8092_v56 }
 0xc36   : > { %v4387_v13 = vpop.f32.mrb[71].mxu1 }
 0xc37   : > { %v7509_v28 = vadd.f32 %v4385_v63, %v7490_v61  ;;  %v4388_v44 = vadd.f32 %v4387_v13, %v4386_v19 }
 0xc39   : > { %v8091_v26 = vmax.f32 %v7509_v28, 0.0  ;;  %v7516_v24 = vadd.f32 %v4388_v44, %v7490_v61  ;;  %3019 = vadd.xlane.f32.xlu1 %v3002_v6 }
 0xc3b   : > { %v8090_v49 = vmax.f32 %v7516_v24, 0.0  ;;  %v4389_v2 = vpop.f32.mrb[72].mxu1  ;;  %v3003_v48 = vmul.f32 %v7495_v42, %v8091_v26 }
 0xc3c   : > { %v4390_v14 = vpop.f32.mrb[73].mxu1 }
 0xc3d   : > { %v4391_v59 = vadd.f32 %v4390_v14, %v4389_v2  ;;  %3021 = vadd.xlane.f32.xlu1 %v3003_v48  ;;  %v4392_v31 = vpop.f32.mrb[74].mxu1  ;;  %v3004_v39 = vmul.f32 %v7495_v42, %v8090_v49 }
 0xc3e   : > { %v4393_v9 = vpop.f32.mrb[75].mxu1 }
 0xc3f   : > { %v7526_v57 = vadd.f32 %v4391_v59, %v7490_v61  ;;  %v4394_v7 = vadd.f32 %v4393_v9, %v4392_v31  ;;  %3023 = vadd.xlane.f32.xlu0 %v3004_v39 }
 0xc41   : > { %v8089_v22 = vmax.f32 %v7526_v57, 0.0  ;;  %v7530_v0 = vadd.f32 %v4394_v7, %v7490_v61 }
 0xc43   : > { %v8088_v5 = vmax.f32 %v7530_v0, 0.0  ;;  %v4395_v45 = vpop.f32.mrb[76].mxu1  ;;  %v3005_v55 = vmul.f32 %v7495_v42, %v8089_v22 }
 0xc44   : > { %v4396_v11 = vpop.f32.mrb[77].mxu1 }
 0xc45   : > { %v4397_v41 = vadd.f32 %v4396_v11, %v4395_v45  ;;  %v4398_v62 = vpop.f32.mrb[78].mxu1  ;;  %3025 = vadd.xlane.f32.xlu1 %v3005_v55  ;;  %v3006_v37 = vmul.f32 %v7495_v42, %v8088_v5 }
 0xc46   : > { %v4399_v34 = vpop.f32.mrb[79].mxu1 }
 0xc47   : > { %v7540_v51 = vadd.f32 %v4397_v41, %v7490_v61  ;;  %v4400_v30 = vadd.f32 %v4399_v34, %v4398_v62  ;;  %3027 = vadd.xlane.f32.xlu0 %v3006_v37 }
 0xc49   : > { %v8087_v15 = vmax.f32 %v7540_v51, 0.0  ;;  %v7544_v35 = vadd.f32 %v4400_v30, %v7490_v61 }
 0xc4b   : > { %v8086_v43 = vmax.f32 %v7544_v35, 0.0  ;;  %v4401_v63 = vpop.f32.mrb[80].mxu1  ;;  %v3007_v19 = vmul.f32 %v7495_v42, %v8087_v15 }
 0xc4c   : > { %v4402_v13 = vpop.f32.mrb[81].mxu1 }
 0xc4d   : > { %v4403_v44 = vadd.f32 %v4402_v13, %v4401_v63  ;;  %3029 = vadd.xlane.f32.xlu1 %v3007_v19  ;;  %v4404_v6 = vpop.f32.mrb[82].mxu1  ;;  %v3008_v2 = vmul.f32 %v7495_v42, %v8086_v43 }
 0xc4e   : > { %v4405_v48 = vpop.f32.mrb[83].mxu1 }
 0xc4f   : > { %v7554_v14 = vadd.f32 %v4403_v44, %v7490_v61  ;;  %v4406_v59 = vadd.f32 %v4405_v48, %v4404_v6  ;;  %3031 = vadd.xlane.f32.xlu0 %v3008_v2 }
 0xc51   : > { %v8085_v31 = vmax.f32 %v7554_v14, 0.0  ;;  %v7558_v39 = vadd.f32 %v4406_v59, %v7490_v61 }
 0xc53   : > { %v8084_v9 = vmax.f32 %v7558_v39, 0.0  ;;  %v4407_v7 = vpop.f32.mrb[84].mxu1  ;;  %v3009_v45 = vmul.f32 %v7495_v42, %v8085_v31  ;;  %v8209_v31 = vld [vmem:[#allocation33_spill] sm:$0xff] }
 0xc54   : > { %v4408_v55 = vpop.f32.mrb[85].mxu1  ;;  %v1469_v43 = vrot.slane %v8209_v31, 4 }
 0xc55   : > { %v4409_v11 = vadd.f32 %v4408_v55, %v4407_v7  ;;  %v4410_v41 = vpop.f32.mrb[86].mxu1  ;;  %3033 = vadd.xlane.f32.xlu1 %v3009_v45  ;;  %v3010_v62 = vmul.f32 %v7495_v42, %v8084_v9 }
 0xc56   : > { %v4411_v37 = vpop.f32.mrb[87].mxu1 }
 0xc57   : > { %v7568_v34 = vadd.f32 %v4409_v11, %v7490_v61  ;;  %v4412_v30 = vadd.f32 %v4411_v37, %v4410_v41  ;;  %3035 = vadd.xlane.f32.xlu0 %v3010_v62 }
 0xc59   : > { %v8079_v63 = vmax.f32 %v7568_v34, 0.0  ;;  %v7572_v19 = vadd.f32 %v4412_v30, %v7490_v61 }
 0xc5b   : > { %8203 = vst [vmem:[#allocation35_spill] sm:$0xff] %v7572_v19  ;;  %v8078_v13 = vmax.f32 %v7572_v19, 0.0  ;;  %v4413_v44 = vpop.f32.mrb[88].mxu1  ;;  %v3011_v6 = vmul.f32 %v7495_v42, %v8079_v63 }
 0xc5c   : > { %v4414_v2 = vpop.f32.mrb[89].mxu1 }
 0xc5d   : > { %v4415_v48 = vadd.f32 %v4414_v2, %v4413_v44  ;;  %3037 = vadd.xlane.f32.xlu1 %v3011_v6  ;;  %v4416_v59 = vpop.f32.mrb[90].mxu1  ;;  %v3012_v7 = vmul.f32 %v7495_v42, %v8078_v13 }
 0xc5e   : > { %v4417_v45 = vpop.f32.mrb[91].mxu1 }
 0xc5f   : > { %v7582_v55 = vadd.f32 %v4415_v48, %v7490_v61  ;;  %v4418_v11 = vadd.f32 %v4417_v45, %v4416_v59  ;;  %3039 = vadd.xlane.f32.xlu0 %v3012_v7 }
 0xc61   : > { %8204 = vst [vmem:[#allocation36_spill] sm:$0xff] %v7582_v55  ;;  %v8080_v41 = vmax.f32 %v7582_v55, 0.0  ;;  %v7586_v62 = vadd.f32 %v4418_v11, %v7490_v61 }
 0xc63   : > { %8205 = vst [vmem:[#allocation37_spill] sm:$0xff] %v7586_v62  ;;  %v8083_v37 = vmax.f32 %v7586_v62, 0.0  ;;  %v4419_v30 = vpop.f32.mrb[92].mxu1  ;;  %v3013_v44 = vmul.f32 %v7495_v42, %v8080_v41 }
 0xc64   : > { %v4420_v6 = vpop.f32.mrb[93].mxu1 }
 0xc65   : > { %v4421_v2 = vadd.f32 %v4420_v6, %v4419_v30  ;;  %v4422_v13 = vpop.f32.mrb[94].mxu1  ;;  %3041 = vadd.xlane.f32.xlu1 %v3013_v44  ;;  %v3014_v48 = vmul.f32 %v7495_v42, %v8083_v37  ;;  %v2995_v6 = vpop.xlane.xlu1 %2994 }
 0xc66   : > { %v4423_v59 = vpop.f32.mrb[95].mxu1  ;;  %5229 = vrsqrt.f32 %v2995_v6 }
 0xc67   : > { %v7596_v7 = vadd.f32 %v4421_v2, %v7490_v61  ;;  %v4424_v45 = vadd.f32 %v4423_v59, %v4422_v13  ;;  %3043 = vadd.xlane.f32.xlu0 %v3014_v48  ;;  %v2345_v13 = vsel %vm8208_vm1, %v7355_v17, 0.0 }
 0xc69   : > { %8206 = vst [vmem:[#allocation38_spill] sm:$0xff] %v7596_v7  ;;  %v8082_v11 = vmax.f32 %v7596_v7, 0.0  ;;  %v7600_v63 = vadd.f32 %v4424_v45, %v7490_v61 }
 0xc6b   : > { %8207 = vst [vmem:[#allocation39_spill] sm:$0xff] %v7600_v63  ;;  %v8081_v41 = vmax.f32 %v7600_v63, 0.0  ;;  %v3015_v30 = vmul.f32 %v7495_v42, %v8082_v11 }
 0xc6d   : > { %3045 = vadd.xlane.f32.xlu1 %v3015_v30  ;;  %v3016_v44 = vmul.f32 %v7495_v42, %v8081_v41 }
 0xc6f   : > { %3047 = vadd.xlane.f32.xlu0 %v3016_v44 }
 0xc70   : > { %v5230_v61 = vpop.eup %5229 }
 0xc71   : > { %v3052_v2 = vrot.slane %v5230_v61, %v2999_v4 }
 0xc73   : > { %2346 = vadd.xlane.f32.xlu0 %v2345_v13 }
 0xcc2   : > { %v3018_v48 = vpop.xlane.xlu1 %3017 }
 0xcc3   : > { %v7613_v59 = vmul.f32 %v3052_v2, %v3018_v48 }
 0xcc5   : > { %3069 = vxpose.xlu1.b32.start [1/16] (narrow) %v7613_v59, 8 }
 0xcc6   : > { %v3020_v45 = vpop.xlane.xlu1 %3019 }
 0xcc7   : > { %v7616_v30 = vmul.f32 %v3052_v2, %v3020_v45 }
 0xcc9   : > { %3070 = vxpose.xlu1.b32.cont [2/16] (narrow) %v7616_v30, 8 }
 0xcca   : > { %v3022_v42 = vpop.xlane.xlu1 %3021 }
 0xccb   : > { %v7619_v44 = vmul.f32 %v3052_v2, %v3022_v42 }
 0xccc   : > { %v3024_v17 = vpop.xlane.xlu0 %3023 }
 0xccd   : > { %3071 = vxpose.xlu1.b32.cont [3/16] (narrow) %v7619_v44, 8  ;;  %v7622_v13 = vmul.f32 %v3052_v2, %v3024_v17 }
 0xcd1   : > { %3072 = vxpose.xlu1.b32.cont [4/16] (narrow) %v7622_v13, 8 }
 0xcd2   : > { %v3026_v4 = vpop.xlane.xlu1 %3025 }
 0xcd3   : > { %v7625_v6 = vmul.f32 %v3052_v2, %v3026_v4 }
 0xcd4   : > { %v3028_v61 = vpop.xlane.xlu0 %3027 }
 0xcd5   : > { %3073 = vxpose.xlu1.b32.cont [5/16] (narrow) %v7625_v6, 8  ;;  %v7628_v48 = vmul.f32 %v3052_v2, %v3028_v61 }
 0xcd9   : > { %3074 = vxpose.xlu1.b32.cont [6/16] (narrow) %v7628_v48, 8 }
 0xcda   : > { %v3030_v45 = vpop.xlane.xlu1 %3029 }
 0xcdb   : > { %v7631_v42 = vmul.f32 %v3052_v2, %v3030_v45 }
 0xcdc   : > { %v3032_v41 = vpop.xlane.xlu0 %3031 }
 0xcdd   : > { %3075 = vxpose.xlu1.b32.cont [7/16] (narrow) %v7631_v42, 8  ;;  %v7634_v17 = vmul.f32 %v3052_v2, %v3032_v41  ;;  %v2475_v41 = vrot.slane %v7353_v25, 4 }
 0xcdf   : > { %v2476_v22 = vmax.f32 %v7353_v25, %v2475_v41 }
 0xce1   : > { %3076 = vxpose.xlu1.b32.cont [8/16] (narrow) %v7634_v17, 8  ;;  %v2477_v56 = vrot.slane %v2476_v22, 2 }
 0xce2   : > { %v3034_v11 = vpop.xlane.xlu1 %3033 }
 0xce3   : > { %v7637_v4 = vmul.f32 %v3052_v2, %v3034_v11  ;;  %v1470_v11 = vmax.f32 %v8209_v31, %v1469_v43  ;;  %v2478_v7 = vmax.f32 %v2476_v22, %v2477_v56 }
 0xce4   : > { %v3036_v37 = vpop.xlane.xlu0 %3035 }
 0xce5   : > { %3077 = vxpose.xlu1.b32.cont [9/16] (narrow) %v7637_v4, 8  ;;  %v7640_v61 = vmul.f32 %v3052_v2, %v3036_v37  ;;  %v2479_v41 = vrot.slane %v2478_v7, 1 }
 0xce7   : > { %v2480_v56 = vmax.f32 %v2478_v7, %v2479_v41 }
 0xce9   : > { %3078 = vxpose.xlu1.b32.cont [10/16] (narrow) %v7640_v61, 8 }
 0xcea   : > { %v3038_v9 = vpop.xlane.xlu1 %3037 }
 0xceb   : > { %v7643_v45 = vmul.f32 %v3052_v2, %v3038_v9  ;;  %v1471_v9 = vrot.slane %v1470_v11, 2 }
 0xcec   : > { %v3040_v15 = vpop.xlane.xlu0 %3039 }
 0xced   : > { %3079 = vxpose.xlu1.b32.cont [11/16] (narrow) %v7643_v45, 8  ;;  %v7648_v5 = vmul.f32 %v3052_v2, %v3040_v15  ;;  %v1472_v63 = vmax.f32 %v1470_v11, %v1471_v9 }
 0xcef   : > { %v1473_v25 = vrot.slane %v1472_v63, 1 }
 0xcf1   : > { %3080 = vxpose.xlu1.b32.cont [12/16] (narrow) %v7648_v5, 8 }
 0xcf2   : > { %v3042_v37 = vpop.xlane.xlu1 %3041 }
 0xcf3   : > { %v7653_v49 = vmul.f32 %v3052_v2, %v3042_v37  ;;  %v1549_v37 = vmax.f32 %v7119_v10, 1.0 }
 0xcf4   : > { %v3044_v26 = vpop.xlane.xlu0 %3043 }
 0xcf5   : > { %3081 = vxpose.xlu1.b32.cont [13/16] (narrow) %v7653_v49, 8  ;;  %v7656_v54 = vmul.f32 %v3052_v2, %v3044_v26  ;;  %v1474_v26 = vmax.f32 %v1472_v63, %v1473_v25  ;;  %5231 = vrcp.f32 %v1549_v37 }
 0xcf7   : > { %v1478_v11 = vsel %vm1475_vm10, %v1474_v26, 0.0 }
 0xcf9   : > { %3082 = vxpose.xlu1.b32.cont [14/16] (narrow) %v7656_v54, 8 }
 0xcfa   : > { %v3046_v15 = vpop.xlane.xlu1 %3045 }
 0xcfb   : > { %v7659_v43 = vmul.f32 %v3052_v2, %v3046_v15 }
 0xcfc   : > { %v3048_v31 = vpop.xlane.xlu0 %3047 }
 0xcfd   : > { %3083 = vxpose.xlu1.b32.cont [15/16] (narrow) %v7659_v43, 8  ;;  %v7664_v62 = vmul.f32 %v3052_v2, %v3048_v31 }
 0xcff   : > { %v5232_v19 = vpop.eup %5231 }
 0xd00   : > { %v7666_v55 = vpop.xlane.xlu0 %2346  ;;  %v1551_v2 = vmul.f32 %v5232_v19, %v6786_v3 }
 0xd01   : > { %vm2481_vm6 = vcmp.gt.f32.partialorder %v7666_v55, 0.5  ;;  %v2555_v22 = vmax.f32 %v7666_v55, 1.0  ;;  %3084 = vxpose.xlu1.b32.end [16/16] (narrow) %v7664_v62, 8 }
 0xd02   : > { %v2484_v9 = vsel %vm2481_vm6, %v2480_v56, 0.0 }
 0xd03   : > { %5233 = vrcp.f32 %v2555_v22  ;;  %v7671_v15 = vadd.f32 %v2484_v9, %v1478_v11 }
 0xd04   : > { %5235 = vtanh.f32 %v7613_v59 }
 0xd05   : > { %5237 = vtanh.f32 %v7616_v30 }
 0xd06   : > { %5239 = vtanh.f32 %v7619_v44 }
 0xd07   : > { %5241 = vtanh.f32 %v7622_v13 }
 0xd08   : > { %5243 = vtanh.f32 %v7625_v6 }
 0xd09   : > { %5245 = vtanh.f32 %v7628_v48 }
 0xd0a   : > { %5247 = vtanh.f32 %v7631_v42 }
 0xd0b   : > { %5249 = vtanh.f32 %v7634_v17 }
 0xd0c   : > { %5251 = vtanh.f32 %v7637_v4 }
 0xd0d   : > { %v5234_v10 = vpop.eup %5233  ;;  %5253 = vtanh.f32 %v7640_v61 }
 0xd0e   : > { %v2557_v63 = vmul.f32 %v5234_v10, %v7473_v53  ;;  %5255 = vtanh.f32 %v7643_v45 }
 0xd0f   : > { %5257 = vtanh.f32 %v7648_v5 }
 0xd10   : > { %v7675_v25 = vadd.f32 %v2557_v63, %v1551_v2  ;;  %v8219_v63 = vld [vmem:[#allocation17_spill] sm:$0xff]  ;;  %5259 = vtanh.f32 %v7653_v49 }
 0xd11   : > { %5261 = vtanh.f32 %v7656_v54 }
 0xd12   : > { %5263 = vtanh.f32 %v7659_v43 }
 0xd13   : > { %5265 = vtanh.f32 %v7664_v62 }
 0xd45   : > { %v3085_v7 = vpop.trf.xlu1 }
 0xd46   : > { %v7678_v31 = vrot.slane %v3085_v7, %v5974_v40 }
 0xd48   : > { %vm3105_vm12 = vcmp.gt.f32.partialorder %v7678_v31, %v7613_v59  ;;  %vm3121_vm5 = vcmp.eq.f32.partialorder %v7678_v31, %v7613_v59  ;;  %vm3122_vm4 = vcmp.eq.f32.partialorder %v7678_v31, %v7616_v30  ;;  %vm3106_vm13 = vcmp.gt.f32.partialorder %v7678_v31, %v7616_v30 }
 0xd49   : > { %vm3137_vm15 = vmand %vm3121_vm5, %vm1110_vm2  ;;  %vm3123_vm1 = vcmp.eq.f32.partialorder %v7678_v31, %v7619_v44  ;;  %vm3107_vm6 = vcmp.gt.f32.partialorder %v7678_v31, %v7619_v44  ;;  %vm3124_vm2 = vcmp.eq.f32.partialorder %v7678_v31, %v7622_v13  ;;  %v8223_v59 = vmax.f32 %v7498_v27, 0.0  ;;  %v8225_v27 = vld [vmem:[#allocation19_spill] sm:$0xff] }
 0xd4a   : > { %vm3153_vm9 = vmor %vm3105_vm12, %vm3137_vm15  ;;  %vm3125_vm15 = vcmp.eq.f32.partialorder %v7678_v31, %v7625_v6 }
 0xd4b   : > { %v4114_v3 = vsel %vm3153_vm9, 1.0, %v8146_v21  ;;  %vm3138_vm10 = vmand %vm3122_vm4, %vm1111_vm3  ;;  %vm3108_vm3 = vcmp.gt.f32.partialorder %v7678_v31, %v7622_v13  ;;  %v8224_v13 = vmax.f32 %v7502_v32, 0.0  ;;  %v8227_v32 = vld [vmem:[#allocation34_spill] sm:$0xff] }
 0xd4c   : > { %v3201_v53 = vmul.f32 %v4114_v3, %v7359_v20  ;;  %vm3154_vm14 = vmor %vm3106_vm13, %vm3138_vm10  ;;  %vm8210_vm10 = vcmp.lt.s32.totalorder %v5811_v1, %v6207_v50  ;;  %v8221_v3 = vld [vmem:[#allocation18_spill] sm:$0xff] }
 0xd4d   : > { %v4115_v29 = vsel %vm3154_vm14, 1.0, %v8146_v21  ;;  %vm3139_vm12 = vmand %vm3123_vm1, %vm1112_vm11  ;;  %vm3109_vm11 = vcmp.gt.f32.partialorder %v7678_v31, %v7625_v6  ;;  %vm3110_vm1 = vcmp.gt.f32.partialorder %v7678_v31, %v7628_v48 }
 0xd4e   : > { %3217 = vadd.xlane.f32.xlu0 %v3201_v53  ;;  %vm3155_vm5 = vmor %vm3107_vm6, %vm3139_vm12  ;;  %v3202_v23 = vmul.f32 %v4115_v29, %v7359_v20  ;;  %vm3111_vm12 = vcmp.gt.f32.partialorder %v7678_v31, %v7631_v42 }
 0xd4f   : > { %vm3140_vm4 = vmand %vm3124_vm2, %vm1113_vm0  ;;  %v4116_v19 = vsel %vm3155_vm5, 1.0, %v8146_v21  ;;  %vm3126_vm0 = vcmp.eq.f32.partialorder %v7678_v31, %v7628_v48  ;;  %vm8211_vm5 = vcmp.lt.s32.totalorder %v5811_v1, %v6221_v38 }
 0xd50   : > { %vm3156_vm14 = vmor %vm3108_vm3, %vm3140_vm4  ;;  %v3203_v46 = vmul.f32 %v4116_v19, %v7359_v20  ;;  %vm3128_vm4 = vcmp.eq.f32.partialorder %v7678_v31, %v7634_v17 }
 0xd51   : > { %vm3141_vm13 = vmand %vm3125_vm15, %vm1114_vm8  ;;  %v4117_v33 = vsel %vm3156_vm14, 1.0, %v8146_v21  ;;  %vm3127_vm8 = vcmp.eq.f32.partialorder %v7678_v31, %v7631_v42  ;;  %vm3112_vm14 = vcmp.gt.f32.partialorder %v7678_v31, %v7634_v17 }
 0xd52   : > { %3219 = vadd.xlane.f32.xlu0 %v3202_v23  ;;  %vm3157_vm9 = vmor %vm3109_vm11, %vm3141_vm13  ;;  %v3204_v41 = vmul.f32 %v4117_v33, %v7359_v20  ;;  %vm8212_vm11 = vcmp.lt.s32.totalorder %v5811_v1, %v6235_v36 }
 0xd53   : > { %vm3142_vm6 = vmand %vm3126_vm0, %vm8210_vm10  ;;  %v4118_v47 = vsel %vm3157_vm9, 1.0, %v8146_v21  ;;  %vm3129_vm0 = vcmp.eq.f32.partialorder %v7678_v31, %v7637_v4  ;;  %vm8213_vm10 = vcmp.lt.s32.totalorder %v5811_v1, %v6249_v18 }
 0xd54   : > { %vm3158_vm2 = vmor %vm3110_vm1, %vm3142_vm6  ;;  %v3205_v37 = vmul.f32 %v4118_v47, %v7359_v20  ;;  %vm3113_vm1 = vcmp.gt.f32.partialorder %v7678_v31, %v7637_v4 }
 0xd55   : > { %vm3143_vm3 = vmand %vm3127_vm8, %vm8211_vm5  ;;  %v4119_v50 = vsel %vm3158_vm2, 1.0, %v8146_v21  ;;  %vm3130_vm8 = vcmp.eq.f32.partialorder %v7678_v31, %v7640_v61  ;;  %vm8214_vm5 = vcmp.lt.s32.totalorder %v5811_v1, %v6263_v16 }
 0xd56   : > { %3221 = vadd.xlane.f32.xlu0 %v3203_v46  ;;  %vm3159_vm15 = vmor %vm3111_vm12, %vm3143_vm3  ;;  %v3206_v26 = vmul.f32 %v4119_v50, %v7359_v20  ;;  %vm3114_vm12 = vcmp.gt.f32.partialorder %v7678_v31, %v7640_v61 }
 0xd57   : > { %vm3144_vm13 = vmand %vm3128_vm4, %vm8212_vm11  ;;  %v4120_v38 = vsel %vm3159_vm15, 1.0, %v8146_v21  ;;  %vm3131_vm4 = vcmp.eq.f32.partialorder %v7678_v31, %v7643_v45  ;;  %vm8215_vm11 = vcmp.lt.s32.totalorder %v5811_v1, %v6272_v60 }
 0xd58   : > { %vm3160_vm9 = vmor %vm3112_vm14, %vm3144_vm13  ;;  %v3207_v56 = vmul.f32 %v4120_v38, %v7359_v20  ;;  %vm3115_vm14 = vcmp.gt.f32.partialorder %v7678_v31, %v7643_v45 }
 0xd59   : > { %vm3145_vm6 = vmand %vm3129_vm0, %vm8213_vm10  ;;  %v4121_v36 = vsel %vm3160_vm9, 1.0, %v8146_v21  ;;  %vm3132_vm0 = vcmp.eq.f32.partialorder %v7678_v31, %v7648_v5  ;;  %vm8216_vm10 = vcmp.lt.s32.totalorder %v5811_v1, %v6291_v58 }
 0xd5a   : > { %3223 = vadd.xlane.f32.xlu0 %v3204_v41  ;;  %vm3161_vm2 = vmor %vm3113_vm1, %vm3145_vm6  ;;  %v3208_v22 = vmul.f32 %v4121_v36, %v7359_v20  ;;  %vm3116_vm1 = vcmp.gt.f32.partialorder %v7678_v31, %v7648_v5  ;;  %v5236_v41 = vpop.eup %5235 }
 0xd5b   : > { %vm3146_vm3 = vmand %vm3130_vm8, %vm8214_vm5  ;;  %v4122_v18 = vsel %vm3161_vm2, 1.0, %v8146_v21  ;;  %vm3133_vm8 = vcmp.eq.f32.partialorder %v7678_v31, %v7653_v49  ;;  %vm8217_vm5 = vcmp.lt.s32.totalorder %v5811_v1, %v6306_v52  ;;  %v5238_v30 = vpop.eup %5237 }
 0xd5c   : > { %vm3162_vm15 = vmor %vm3114_vm12, %vm3146_vm3  ;;  %v3209_v11 = vmul.f32 %v4122_v18, %v7359_v20  ;;  %vm3117_vm12 = vcmp.gt.f32.partialorder %v7678_v31, %v7653_v49  ;;  %v3371_v38 = vmul.f32 %v5238_v30, %v8224_v13  ;;  %v5240_v36 = vpop.eup %5239  ;;  %v8234_v30 = vld [vmem:[#allocation22_spill] sm:$0xff] }
 0xd5d   : > { %vm3147_vm13 = vmand %vm3131_vm4, %vm8215_vm11  ;;  %v4123_v16 = vsel %vm3162_vm15, 1.0, %v8146_v21  ;;  %vm3134_vm4 = vcmp.eq.f32.partialorder %v7678_v31, %v7656_v54  ;;  %vm8218_vm11 = vcmp.lt.s32.totalorder %v5811_v1, %v6320_v12 }
 0xd5e   : > { %3225 = vadd.xlane.f32.xlu0 %v3205_v37  ;;  %vm3163_vm9 = vmor %vm3115_vm14, %vm3147_vm13  ;;  %v3210_v9 = vmul.f32 %v4123_v16, %v7359_v20  ;;  %vm3118_vm14 = vcmp.gt.f32.partialorder %v7678_v31, %v7656_v54  ;;  %v3370_v37 = vmul.f32 %v5236_v41, %v8223_v59 }
 0xd5f   : > { %vm3148_vm6 = vmand %vm3132_vm0, %vm8216_vm10  ;;  %v4124_v60 = vsel %vm3163_vm9, 1.0, %v8146_v21  ;;  %vm3135_vm0 = vcmp.eq.f32.partialorder %v7678_v31, %v7659_v43  ;;  %vm8220_vm10 = vcmp.lt.s32.totalorder %v5811_v1, %v8219_v63 }
 0xd60   : > { %vm3164_vm2 = vmor %vm3116_vm1, %vm3148_vm6  ;;  %v3211_v10 = vmul.f32 %v4124_v60, %v7359_v20  ;;  %vm3119_vm1 = vcmp.gt.f32.partialorder %v7678_v31, %v7659_v43 }
 0xd61   : > { %vm3149_vm3 = vmand %vm3133_vm8, %vm8217_vm5  ;;  %v4125_v58 = vsel %vm3164_vm2, 1.0, %v8146_v21  ;;  %vm3136_vm8 = vcmp.eq.f32.partialorder %v7678_v31, %v7664_v62  ;;  %vm8222_vm5 = vcmp.lt.s32.totalorder %v5811_v1, %v8221_v3 }
 0xd62   : > { %3227 = vadd.xlane.f32.xlu0 %v3206_v26  ;;  %vm3165_vm15 = vmor %vm3117_vm12, %vm3149_vm3  ;;  %v3212_v2 = vmul.f32 %v4125_v58, %v7359_v20  ;;  %vm3120_vm12 = vcmp.gt.f32.partialorder %v7678_v31, %v7664_v62  ;;  %v3249_v31 = vmul.f32 0.5, %v7666_v55 }
 0xd63   : > { %vm3150_vm13 = vmand %vm3134_vm4, %vm8218_vm11  ;;  %v4126_v52 = vsel %vm3165_vm15, 1.0, %v8146_v21 }
 0xd64   : > { %vm3166_vm9 = vmor %vm3118_vm14, %vm3150_vm13  ;;  %v3213_v7 = vmul.f32 %v4126_v52, %v7359_v20  ;;  %v3250_v1 = vceil.f32 %v3249_v31  ;;  %v8228_v52 = vmov 0.0|0.0  }
 0xd65   : > { %vm3151_vm6 = vmand %vm3135_vm0, %vm8220_vm10  ;;  %v4127_v12 = vsel %vm3166_vm9, 1.0, %v8146_v21 }
 0xd66   : > { %3229 = vadd.xlane.f32.xlu0 %v3207_v56  ;;  %vm3167_vm2 = vmor %vm3119_vm1, %vm3151_vm6  ;;  %v3214_v53 = vmul.f32 %v4127_v12, %v7359_v20  ;;  %v7829_v33 = vrot.slane %v3250_v1, %v5974_v40  ;;  %v8230_v12 = vld [vmem:[#allocation20_spill] sm:$0xff] }
 0xd67   : > { %vm3152_vm3 = vmand %vm3136_vm8, %vm8222_vm5  ;;  %v4128_v29 = vsel %vm3167_vm2, 1.0, %v8146_v21 }
 0xd68   : > { %vm3168_vm4 = vmor %vm3120_vm12, %vm3152_vm3  ;;  %v3215_v23 = vmul.f32 %v4128_v29, %v7359_v20 }
 0xd69   : > { %v4129_v19 = vsel %vm3168_vm4, 1.0, %v8146_v21 }
 0xd6a   : > { %3231 = vadd.xlane.f32.xlu0 %v3208_v22  ;;  %v3216_v46 = vmul.f32 %v4129_v19, %v7359_v20 }
 0xd6e   : > { %3233 = vadd.xlane.f32.xlu0 %v3209_v11  ;;  %v8226_v11 = vmax.f32 %v7509_v28, 0.0  ;;  %v8229_v28 = vmax.f32 %v7516_v24, 0.0  ;;  %v8232_v24 = vld [vmem:[#allocation21_spill] sm:$0xff] }
 0xd70   : > { %v3372_v16 = vmul.f32 %v5240_v36, %v8226_v11  ;;  %v8236_v36 = vld [vmem:[#allocation23_spill] sm:$0xff] }
 0xd72   : > { %3235 = vadd.xlane.f32.xlu0 %v3210_v9 }
 0xd76   : > { %3237 = vadd.xlane.f32.xlu0 %v3211_v10  ;;  %v5242_v10 = vpop.eup %5241 }
 0xd7a   : > { %3239 = vadd.xlane.f32.xlu0 %v3212_v2 }
 0xd7e   : > { %3241 = vadd.xlane.f32.xlu0 %v3213_v7  ;;  %v3373_v7 = vmul.f32 %v5242_v10, %v8229_v28 }
 0xd82   : > { %3243 = vadd.xlane.f32.xlu0 %v3214_v53  ;;  %v5244_v53 = vpop.eup %5243 }
 0xd86   : > { %3245 = vadd.xlane.f32.xlu0 %v3215_v23 }
 0xd8a   : > { %3247 = vadd.xlane.f32.xlu0 %v3216_v46  ;;  %v8231_v46 = vmax.f32 %v7526_v57, 0.0  ;;  %v8233_v57 = vmax.f32 %v7530_v0, 0.0 }
 0xd8c   : > { %v3374_v31 = vmul.f32 %v5244_v53, %v8231_v46  ;;  %v8241_v46 = vmax.f32 %v7558_v39, 0.0 }
 0xddb   : > { %v3218_v47 = vpop.xlane.xlu0 %3217 }
 0xddc   : > { %vm3255_vm15 = vcmp.lt.f32.partialorder %v3218_v47, %v7829_v33  ;;  %v5246_v47 = vpop.eup %5245 }
 0xddd   : > { %v4130_v20 = vsel %vm3255_vm15, 1.0, %v8146_v21 }
 0xdde   : > { %v3303_v55 = vmul.f32 %v4130_v20, %v7132_v8 }
 0xddf   : > { %v3220_v50 = vpop.xlane.xlu0 %3219 }
 0xde0   : > { %v3386_v26 = vmul.f32 %v3370_v37, %v3303_v55  ;;  %vm3402_vm14 = vcmp.gt.f32.partialorder %v3303_v55, 0.5  ;;  %vm3256_vm11 = vcmp.lt.f32.partialorder %v3220_v50, %v7829_v33  ;;  %3319 = vxpose.xlu0.b32.start [1/16] (narrow) %v3303_v55, 8  ;;  %v3375_v55 = vmul.f32 %v5246_v47, %v8233_v57 }
 0xde1   : > { %v4131_v40 = vsel %vm3256_vm11, 1.0, %v8146_v21 }
 0xde2   : > { %v7840_v44 = vsel %vm3402_vm14, %v3386_v26, -1e+30  ;;  %v3304_v56 = vmul.f32 %v4131_v40, %v8225_v27 }
 0xde3   : > { %v3222_v8 = vpop.xlane.xlu0 %3221 }
 0xde4   : > { %v3387_v22 = vmul.f32 %v3371_v38, %v3304_v56  ;;  %vm3403_vm13 = vcmp.gt.f32.partialorder %v3304_v56, 0.5  ;;  %vm3257_vm0 = vcmp.lt.f32.partialorder %v3222_v8, %v7829_v33  ;;  %3320 = vxpose.xlu0.b32.cont [2/16] (narrow) %v3304_v56, 8  ;;  %v8235_v56 = vmax.f32 %v7540_v51, 0.0 }
 0xde5   : > { %v4132_v6 = vsel %vm3257_vm0, 1.0, %v8146_v21 }
 0xde6   : > { %v7848_v18 = vsel %vm3403_vm13, %v3387_v22, -1e+30  ;;  %v3305_v9 = vmul.f32 %v4132_v6, %v8227_v32  ;;  %v4831_v60 = vpack.c.bf16 %v3387_v22, %v3386_v26  ;;  %v5248_v26 = vpop.eup %5247  ;;  %v8237_v32 = vmax.f32 %v7544_v35, 0.0 }
 0xde7   : > { %v3224_v58 = vpop.xlane.xlu0 %3223  ;;  %v3376_v0 = vmul.f32 %v5248_v26, %v8235_v56  ;;  %v5250_v6 = vpop.eup %5249 }
 0xde8   : > { %v3388_v2 = vmul.f32 %v3372_v16, %v3305_v9  ;;  %vm3404_vm9 = vcmp.gt.f32.partialorder %v3305_v9, 0.5  ;;  %vm3258_vm1 = vcmp.lt.f32.partialorder %v3224_v58, %v7829_v33  ;;  %4832 = vmatpush3.bf16.msra.mxu0 %v4831_v60  ;;  %3321 = vxpose.xlu0.b32.cont [3/16] (narrow) %v3305_v9, 8  ;;  %v3377_v9 = vmul.f32 %v5250_v6, %v8237_v32  ;;  %v8238_v60 = vld [vmem:[#allocation24_spill] sm:$0xff] }
 0xde9   : > { %v4133_v48 = vsel %vm3258_vm1, 1.0, %v8146_v21  ;;  %4833 = vmatprep.subr.bf16.mxu0 %v8228_v52 }
 0xdea   : > { %v7857_v63 = vsel %vm3404_vm9, %v3388_v2, -1e+30  ;;  %v3306_v3 = vmul.f32 %v4133_v48, %v8230_v12  ;;  %v8240_v12 = vld [vmem:[#allocation25_spill] sm:$0xff] }
 0xdeb   : > { %v3226_v29 = vpop.xlane.xlu0 %3225 }
 0xdec   : > { %v3389_v23 = vmul.f32 %v3373_v7, %v3306_v3  ;;  %vm3405_vm10 = vcmp.gt.f32.partialorder %v3306_v3, 0.5  ;;  %vm3259_vm6 = vcmp.lt.f32.partialorder %v3226_v29, %v7829_v33  ;;  %3322 = vxpose.xlu0.b32.cont [4/16] (narrow) %v3306_v3, 8  ;;  %v8239_v7 = vmax.f32 %v7554_v14, 0.0 }
 0xded   : > { %v4134_v42 = vsel %vm3259_vm6, 1.0, %v8146_v21 }
 0xdee   : > { %v7865_v19 = vsel %vm3405_vm10, %v3389_v23, -1e+30  ;;  %v3307_v1 = vmul.f32 %v4134_v42, %v8232_v24  ;;  %v4834_v41 = vpack.c.bf16 %v3389_v23, %v3388_v2  ;;  %v8242_v24 = vld [vmem:[#allocation26_spill] sm:$0xff] }
 0xdef   : > { %v3228_v20 = vpop.xlane.xlu0 %3227 }
 0xdf0   : > { %v3390_v59 = vmul.f32 %v3374_v31, %v3307_v1  ;;  %vm3406_vm8 = vcmp.gt.f32.partialorder %v3307_v1, 0.5  ;;  %vm3260_vm2 = vcmp.lt.f32.partialorder %v3228_v20, %v7829_v33  ;;  %4835 = vmatpush3.bf16.msra.mxu0 %v4834_v41  ;;  %3323 = vxpose.xlu0.b32.cont [5/16] (narrow) %v3307_v1, 8 }
 0xdf1   : > { %v4135_v17 = vsel %vm3260_vm2, 1.0, %v8146_v21  ;;  %4836 = vmatprep.subr.bf16.mxu0 %v8228_v52 }
 0xdf2   : > { %v3454_v37 = vsel %vm3406_vm8, %v3390_v59, -1e+30  ;;  %v3308_v50 = vmul.f32 %v4135_v17, %v8234_v30  ;;  %v8243_v17 = vmax.f32 %v7568_v34, 0.0 }
 0xdf3   : > { %v3466_v40 = vmax.f32 %v7840_v44, %v3454_v37  ;;  %v3230_v13 = vpop.xlane.xlu0 %3229  ;;  %v8244_v37 = vld [vmem:[#allocation27_spill] sm:$0xff] }
 0xdf4   : > { %v3391_v38 = vmul.f32 %v3375_v55, %v3308_v50  ;;  %vm3407_vm12 = vcmp.gt.f32.partialorder %v3308_v50, 0.5  ;;  %vm3261_vm5 = vcmp.lt.f32.partialorder %v3230_v13, %v7829_v33  ;;  %3324 = vxpose.xlu0.b32.cont [6/16] (narrow) %v3308_v50, 8  ;;  %v8245_v13 = vld [vmem:[#allocation35_spill] sm:$0xff] }
 0xdf5   : > { %v4136_v4 = vsel %vm3261_vm5, 1.0, %v8146_v21 }
 0xdf6   : > { %v3455_v27 = vsel %vm3407_vm12, %v3391_v38, -1e+30  ;;  %v3309_v8 = vmul.f32 %v4136_v4, %v8236_v36  ;;  %v4837_v22 = vpack.c.bf16 %v3391_v38, %v3390_v59  ;;  %v8246_v38 = vmax.f32 %v8245_v13, 0.0 }
 0xdf7   : > { %v3467_v44 = vmax.f32 %v7848_v18, %v3455_v27  ;;  %v3232_v11 = vpop.xlane.xlu0 %3231  ;;  %v5252_v18 = vpop.eup %5251  ;;  %v8247_v27 = vld [vmem:[#allocation28_spill] sm:$0xff] }
 0xdf8   : > { %v3392_v16 = vmul.f32 %v3376_v0, %v3309_v8  ;;  %vm3408_vm3 = vcmp.gt.f32.partialorder %v3309_v8, 0.5  ;;  %vm3262_vm4 = vcmp.lt.f32.partialorder %v3232_v11, %v7829_v33  ;;  %4838 = vmatpush3.bf16.msra.mxu0 %v4837_v22  ;;  %3325 = vxpose.xlu0.b32.cont [7/16] (narrow) %v3309_v8, 8  ;;  %v3378_v35 = vmul.f32 %v5252_v18, %v8239_v7  ;;  %v5254_v29 = vpop.eup %5253 }
 0xdf9   : > { %v4137_v61 = vsel %vm3262_vm4, 1.0, %v8146_v21  ;;  %4839 = vmatprep.subr.bf16.mxu0 %v8228_v52  ;;  %v3379_v31 = vmul.f32 %v5254_v29, %v8241_v46 }
 0xdfa   : > { %v3456_v51 = vsel %vm3408_vm3, %v3392_v16, -1e+30  ;;  %v3310_v10 = vmul.f32 %v4137_v61, %v8238_v60  ;;  %v8250_v61 = vld [vmem:[#allocation29_spill] sm:$0xff] }
 0xdfb   : > { %v3468_v58 = vmax.f32 %v7857_v63, %v3456_v51  ;;  %v3234_v2 = vpop.xlane.xlu0 %3233 }
 0xdfc   : > { %v3393_v48 = vmul.f32 %v3377_v9, %v3310_v10  ;;  %vm3409_vm15 = vcmp.gt.f32.partialorder %v3310_v10, 0.5  ;;  %vm3263_vm14 = vcmp.lt.f32.partialorder %v3234_v2, %v7829_v33  ;;  %3326 = vxpose.xlu0.b32.cont [8/16] (narrow) %v3310_v10, 8  ;;  %v8251_v2 = vld [vmem:[#allocation37_spill] sm:$0xff] }
 0xdfd   : > { %v4138_v45 = vsel %vm3263_vm14, 1.0, %v8146_v21 }
 0xdfe   : > { %v3457_v28 = vsel %vm3409_vm15, %v3393_v48, -1e+30  ;;  %v3311_v3 = vmul.f32 %v4138_v45, %v8240_v12  ;;  %v4840_v53 = vpack.c.bf16 %v3393_v48, %v3392_v16  ;;  %v8252_v48 = vmax.f32 %v8251_v2, 0.0  ;;  %v3575_v2 = vld [vmem:[#allocation11 + $0x38] sm:$0xff] }
 0xdff   : > { %v3469_v63 = vmax.f32 %v7865_v19, %v3457_v28  ;;  %v3236_v23 = vpop.xlane.xlu0 %3235  ;;  %v5256_v19 = vpop.eup %5255  ;;  %v8253_v28 = vld [vmem:[#allocation30_spill] sm:$0xff] }
 0xe00   : > { %v3394_v42 = vmul.f32 %v3378_v35, %v3311_v3  ;;  %vm3410_vm11 = vcmp.gt.f32.partialorder %v3311_v3, 0.5  ;;  %vm3264_vm13 = vcmp.lt.f32.partialorder %v3236_v23, %v7829_v33  ;;  %4841 = vmatpush3.bf16.msra.mxu0 %v4840_v53  ;;  %3327 = vxpose.xlu0.b32.cont [9/16] (narrow) %v3311_v3, 8  ;;  %v3380_v39 = vmul.f32 %v5256_v19, %v8243_v17  ;;  %v5258_v30 = vpop.eup %5257  ;;  %v8254_v23 = vld [vmem:[#allocation31_spill] sm:$0xff] }
 0xe01   : > { %v4139_v5 = vsel %vm3264_vm13, 1.0, %v8146_v21  ;;  %4842 = vmatprep.subr.bf16.mxu0 %v8228_v52  ;;  %v3381_v4 = vmul.f32 %v5258_v30, %v8246_v38  ;;  %v5260_v0 = vpop.eup %5259  ;;  %v3584_v38 = vld [vmem:[#allocation11 + $0x80] sm:$0xff] }
 0xe02   : > { %v3458_v14 = vsel %vm3410_vm11, %v3394_v42, -1e+30  ;;  %v3312_v1 = vmul.f32 %v4139_v5, %v8242_v24  ;;  %v5262_v9 = vpop.eup %5261  ;;  %v8255_v5 = vld [vmem:[#allocation38_spill] sm:$0xff]  ;;  %vm8260_vm11 = vcmask 1040384  }
 0xe03   : > { %v7907_v41 = vmax.f32 %v3466_v40, %v3458_v14  ;;  %v3238_v47 = vpop.xlane.xlu0 %3237  ;;  %v3383_v45 = vmul.f32 %v5262_v9, %v8252_v48  ;;  %v5264_v35 = vpop.eup %5263  ;;  %v8256_v14 = vmax.f32 %v8255_v5, 0.0  ;;  %v3573_v9 = vld [vmem:[#allocation11 + $0x28] sm:$0xff]  ;;  %v3592_v48 = vld [vmem:[#allocation11 + $0xc0] sm:$0xff] }
 0xe04   : > { %v3395_v20 = vmul.f32 %v3379_v31, %v3312_v1  ;;  %vm3411_vm0 = vcmp.gt.f32.partialorder %v3312_v1, 0.5  ;;  %vm3265_vm9 = vcmp.lt.f32.partialorder %v3238_v47, %v7829_v33  ;;  %3328 = vxpose.xlu0.b32.cont [10/16] (narrow) %v3312_v1, 8  ;;  %v5266_v24 = vpop.eup %5265  ;;  %v3596_v5 = vld [vmem:[#allocation11 + $0xe0] sm:$0xff] }
 0xe05   : > { %v4140_v49 = vsel %vm3265_vm9, 1.0, %v8146_v21  ;;  %v3384_v46 = vmul.f32 %v5264_v35, %v8256_v14  ;;  %v3576_v35 = vld [vmem:[#allocation11 + $0x40] sm:$0xff]  ;;  %v3597_v14 = vld [vmem:[#allocation11 + $0xe8] sm:$0xff] }
 0xe06   : > { %v3459_v59 = vsel %vm3411_vm0, %v3395_v20, -1e+30  ;;  %v3313_v57 = vmul.f32 %v4140_v49, %v8244_v37  ;;  %v4843_v55 = vpack.c.bf16 %v3395_v20, %v3394_v42  ;;  %v8259_v37 = vld [vmem:[#allocation32_spill] sm:$0xff] }
 0xe07   : > { %v3471_v50 = vmax.f32 %v3467_v44, %v3459_v59  ;;  %v3240_v26 = vpop.xlane.xlu0 %3239  ;;  %v8248_v44 = vld [vmem:[#allocation36_spill] sm:$0xff]  ;;  %v8257_v59 = vld [vmem:[#allocation39_spill] sm:$0xff] }
 0xe08   : > { %v3396_v40 = vmul.f32 %v3380_v39, %v3313_v57  ;;  %vm3412_vm1 = vcmp.gt.f32.partialorder %v3313_v57, 0.5  ;;  %vm3266_vm10 = vcmp.lt.f32.partialorder %v3240_v26, %v7829_v33  ;;  %4844 = vmatpush3.bf16.msra.mxu0 %v4843_v55  ;;  %3329 = vxpose.xlu0.b32.cont [11/16] (narrow) %v3313_v57, 8  ;;  %v8249_v11 = vmax.f32 %v8248_v44, 0.0  ;;  %v3571_v44 = vld [vmem:[#allocation11 + $0x18] sm:$0xff] }
 0xe09   : > { %v4141_v54 = vsel %vm3266_vm10, 1.0, %v8146_v21  ;;  %4845 = vmatprep.subr.bf16.mxu0 %v8228_v52  ;;  %v8258_v17 = vmax.f32 %v8257_v59, 0.0  ;;  %v3583_v59 = vld [vmem:[#allocation11 + $0x78] sm:$0xff] }
 0xe0a   : > { %v3460_v34 = vsel %vm3412_vm1, %v3396_v40, -1e+30  ;;  %v3314_v56 = vmul.f32 %v4141_v54, %v8247_v27  ;;  %v3382_v16 = vmul.f32 %v5260_v0, %v8249_v11  ;;  %v3568_v27 = vld [vmem:[#allocation11] sm:$0xff]  ;;  %v3569_v0 = vld [vmem:[#allocation11 + $0x8] sm:$0xff] }
 0xe0b   : > { %v3472_v36 = vmax.f32 %v3468_v58, %v3460_v34  ;;  %v3242_v8 = vpop.xlane.xlu0 %3241  ;;  %v3385_v39 = vmul.f32 %v5266_v24, %v8258_v17  ;;  %v3588_v11 = vld [vmem:[#allocation11 + $0xa0] sm:$0xff] }
 0xe0c   : > { %v3397_v22 = vmul.f32 %v3381_v4, %v3314_v56  ;;  %vm3413_vm6 = vcmp.gt.f32.partialorder %v3314_v56, 0.5  ;;  %vm3267_vm8 = vcmp.lt.f32.partialorder %v3242_v8, %v7829_v33  ;;  %3330 = vxpose.xlu0.b32.cont [12/16] (narrow) %v3314_v56, 8  ;;  %v3585_v4 = vld [vmem:[#allocation11 + $0x88] sm:$0xff]  ;;  %v3587_v8 = vld [vmem:[#allocation11 + $0x98] sm:$0xff]  ;;  %v3580_v24 = vld [vmem:[#allocation11 + $0x60] sm:$0xff] }
 0xe0d   : > { %v4142_v43 = vsel %vm3267_vm8, 1.0, %v8146_v21  ;;  %v4854_v56 = vpack.c.bf16 %v3585_v4, %v3584_v38  ;;  %v3608_v4 = vld [vmem:[#allocation11 + $0x140] sm:$0xff] }
 0xe0e   : > { %v3461_v6 = vsel %vm3413_vm6, %v3397_v22, -1e+30  ;;  %v3315_v51 = vmul.f32 %v4142_v43, %v8250_v61  ;;  %v4846_v32 = vpack.c.bf16 %v3397_v22, %v3396_v40  ;;  %v4856_v22 = vpack.c.bf16 %v3569_v0, %v3568_v27  ;;  %v3609_v27 = vld [vmem:[#allocation11 + $0x148] sm:$0xff]  ;;  %v3610_v0 = vld [vmem:[#allocation11 + $0x150] sm:$0xff] }
 0xe0f   : > { %v3473_v60 = vmax.f32 %v3469_v63, %v3461_v6  ;;  %v3244_v10 = vpop.xlane.xlu0 %3243  ;;  %v3570_v6 = vld [vmem:[#allocation11 + $0x10] sm:$0xff] }
 0xe10   : > { %v3398_v18 = vmul.f32 %v3382_v16, %v3315_v51  ;;  %vm3414_vm2 = vcmp.gt.f32.partialorder %v3315_v51, 0.5  ;;  %vm3268_vm12 = vcmp.lt.f32.partialorder %v3244_v10, %v7829_v33  ;;  %4847 = vmatpush3.bf16.msra.mxu0 %v4846_v32  ;;  %3331 = vxpose.xlu0.b32.cont [13/16] (narrow) %v3315_v51, 8  ;;  %v3589_v16 = vld [vmem:[#allocation11 + $0xa8] sm:$0xff]  ;;  %v4860_v61 = vpack.c.bf16 %v3571_v44, %v3570_v6  ;;  %v3572_v32 = vld [vmem:[#allocation11 + $0x20] sm:$0xff]  ;;  %v3591_v10 = vld [vmem:[#allocation11 + $0xb8] sm:$0xff] }
 0xe11   : > { %v4143_v62 = vsel %vm3268_vm12, 1.0, %v8146_v21  ;;  %4848 = vmatprep.subr.bf16.mxu0 %v8228_v52  ;;  %v4862_v51 = vpack.c.bf16 %v3589_v16, %v3588_v11 }
 0xe12   : > { %v3462_v58 = vsel %vm3414_vm2, %v3398_v18, -1e+30  ;;  %v3316_v7 = vmul.f32 %v4143_v62, %v8253_v28 }
 0xe13   : > { %v3474_v12 = vmax.f32 %v7907_v41, %v3462_v58  ;;  %v3246_v3 = vpop.xlane.xlu0 %3245  ;;  %v3574_v58 = vld [vmem:[#allocation11 + $0x30] sm:$0xff] }
 0xe14   : > { %v3399_v53 = vmul.f32 %v3383_v45, %v3316_v7  ;;  %vm3415_vm5 = vcmp.gt.f32.partialorder %v3316_v7, 0.5  ;;  %vm3269_vm3 = vcmp.lt.f32.partialorder %v3246_v3, %v7829_v33  ;;  %3332 = vxpose.xlu0.b32.cont [14/16] (narrow) %v3316_v7, 8  ;;  %v3593_v45 = vld [vmem:[#allocation11 + $0xc8] sm:$0xff]  ;;  %v4868_v28 = vpack.c.bf16 %v3575_v2, %v3574_v58  ;;  %v3594_v3 = vld [vmem:[#allocation11 + $0xd0] sm:$0xff] }
 0xe15   : > { %v4144_v29 = vsel %vm3269_vm3, 1.0, %v8146_v21  ;;  %v4870_v7 = vpack.c.bf16 %v3593_v45, %v3592_v48 }
 0xe16   : > { %v3463_v63 = vsel %vm3415_vm5, %v3399_v53, -1e+30  ;;  %v3317_v42 = vmul.f32 %v4144_v29, %v8254_v23  ;;  %v4849_v31 = vpack.c.bf16 %v3399_v53, %v3398_v18  ;;  %v4864_v18 = vpack.c.bf16 %v3573_v9, %v3572_v32  ;;  %v3595_v53 = vld [vmem:[#allocation11 + $0xd8] sm:$0xff]  ;;  %v3578_v23 = vld [vmem:[#allocation11 + $0x50] sm:$0xff] }
 0xe17   : > { %v3475_v1 = vmax.f32 %v3471_v50, %v3463_v63  ;;  %v3248_v19 = vpop.xlane.xlu0 %3247  ;;  %v4874_v63 = vpack.c.bf16 %v3595_v53, %v3594_v3  ;;  %v3619_v53 = vld [vmem:[#allocation11 + $0x198] sm:$0xff] }
 0xe18   : > { %v3400_v47 = vmul.f32 %v3384_v46, %v3317_v42  ;;  %vm3416_vm4 = vcmp.gt.f32.partialorder %v3317_v42, 0.5  ;;  %vm3270_vm15 = vcmp.lt.f32.partialorder %v3248_v19, %v7829_v33  ;;  %4850 = vmatpush3.bf16.msra.mxu0 %v4849_v31  ;;  %3333 = vxpose.xlu0.b32.cont [15/16] (narrow) %v3317_v42, 8  ;;  %v3579_v42 = vld [vmem:[#allocation11 + $0x58] sm:$0xff]  ;;  %v4878_v31 = vpack.c.bf16 %v3597_v14, %v3596_v5  ;;  %v3624_v14 = vld [vmem:[#allocation11 + $0x1c0] sm:$0xff] }
 0xe19   : > { %v3478_v41 = vmax.f32 %v3474_v12, %v3475_v1  ;;  %v4145_v20 = vsel %vm3270_vm15, 1.0, %v8146_v21  ;;  %4851 = vmatprep.subr.bf16.mxu0 %v8228_v52  ;;  %v3577_v12 = vld [vmem:[#allocation11 + $0x48] sm:$0xff]  ;;  %v4876_v46 = vpack.c.bf16 %v3579_v42, %v3578_v23  ;;  %v3623_v42 = vld [vmem:[#allocation11 + $0x1b8] sm:$0xff] }
 0xe1a   : > { %v3464_v49 = vsel %vm3416_vm4, %v3400_v47, -1e+30  ;;  %v3318_v57 = vmul.f32 %v4145_v20, %v8259_v37  ;;  %v4872_v29 = vpack.c.bf16 %v3577_v12, %v3576_v35  ;;  %v3581_v1 = vld [vmem:[#allocation11 + $0x68] sm:$0xff]  ;;  %v3582_v20 = vld [vmem:[#allocation11 + $0x70] sm:$0xff]  ;;  %v3616_v35 = vld [vmem:[#allocation11 + $0x180] sm:$0xff] }
 0xe1b   : > { %v3476_v55 = vmax.f32 %v3472_v36, %v3464_v49  ;;  %v3586_v36 = vld [vmem:[#allocation11 + $0x90] sm:$0xff]  ;;  %v4880_v19 = vpack.c.bf16 %v3581_v1, %v3580_v24  ;;  %v4884_v17 = vpack.c.bf16 %v3583_v59, %v3582_v20  ;;  %v3601_v37 = vld [vmem:[#allocation11 + $0x108] sm:$0xff]  ;;  %v3627_v1 = vld [vmem:[#allocation11 + $0x1d8] sm:$0xff] }
 0xe1c   : > { %v3401_v30 = vmul.f32 %v3385_v39, %v3318_v57  ;;  %vm3417_vm14 = vcmp.gt.f32.partialorder %v3318_v57, 0.5  ;;  %3334 = vxpose.xlu0.b32.end [16/16] (narrow) %v3318_v57, 8  ;;  %v4858_v43 = vpack.c.bf16 %v3587_v8, %v3586_v36  ;;  %v3600_v39 = vld [vmem:[#allocation11 + $0x100] sm:$0xff]  ;;  %v3602_v57 = vld [vmem:[#allocation11 + $0x110] sm:$0xff]  ;;  %v3611_v36 = vld [vmem:[#allocation11 + $0x158] sm:$0xff] }
 0xe1d   : > { %v4902_v8 = vpack.c.bf16 %v3611_v36, %v3610_v0  ;;  %v3617_v12 = vld [vmem:[#allocation11 + $0x188] sm:$0xff]  ;;  %v3626_v24 = vld [vmem:[#allocation11 + $0x1d0] sm:$0xff] }
 0xe1e   : > { %v3465_v50 = vsel %vm3417_vm14, %v3401_v30, -1e+30  ;;  %v4852_v26 = vpack.c.bf16 %v3401_v30, %v3400_v47  ;;  %v3598_v47 = vld [vmem:[#allocation11 + $0xf0] sm:$0xff]  ;;  %v3603_v30 = vld [vmem:[#allocation11 + $0x118] sm:$0xff]  ;;  %v4911_v3 = vpack.c.bf16 %v3617_v12, %v3616_v35 }
 0xe1f   : > { %v3477_v33 = vmax.f32 %v3473_v60, %v3465_v50  ;;  %v3590_v60 = vld [vmem:[#allocation11 + $0xb0] sm:$0xff]  ;;  %v4890_v50 = vpack.c.bf16 %v3603_v30, %v3602_v57 }
 0xe20   : > { %4853 = vmatpush3.bf16.msra.mxu0 %v4852_v26  ;;  %v4866_v62 = vpack.c.bf16 %v3591_v10, %v3590_v60  ;;  %v3604_v26 = vld [vmem:[#allocation11 + $0x120] sm:$0xff]  ;;  %v5307_v59 = vld [vmem:[#allocation9] sm:$0xff] }
 0xe21   : > { %v3479_v40 = vmax.f32 %v3476_v55, %v3477_v33  ;;  %4855 = vmatprep.subr.bf16.mxu0 %v4854_v56  ;;  %v4887_v55 = vpack.c.bf16 %v3601_v37, %v3600_v39  ;;  %v3605_v33 = vld [vmem:[#allocation11 + $0x128] sm:$0xff]  ;;  %v4899_v56 = vpack.c.bf16 %v3609_v27, %v3608_v4  ;;  %v3630_v30 = vld [vmem:[#allocation11 + $0x1f0] sm:$0xff] }
 0xe23   : > { %v7946_v54 = vmax.f32 %v3478_v41, %v3479_v40  ;;  %v3599_v41 = vld [vmem:[#allocation11 + $0xf8] sm:$0xff]  ;;  %4888 = vmatpush3.bf16.msra.mxu1 %v4887_v55  ;;  %v4893_v40 = vpack.c.bf16 %v3605_v33, %v3604_v26  ;;  %v3706_v33 = vrot.slane %v5307_v59, 7 }
 0xe24   : > { %v4882_v49 = vpack.c.bf16 %v3599_v41, %v3598_v47  ;;  %4889 = vmatprep.subr.bf16.mxu1 %v8228_v52  ;;  %v3628_v47 = vld [vmem:[#allocation11 + $0x1e0] sm:$0xff]  ;;  %v3629_v41 = vld [vmem:[#allocation11 + $0x1e8] sm:$0xff] }
 0xe25   : > { %v3481_v44 = vrot.slane %v7946_v54, 4  ;;  %v4929_v20 = vpack.c.bf16 %v3629_v41, %v3628_v47 }
 0xe27   : > { %4891 = vmatpush3.bf16.msra.mxu1 %v4890_v50  ;;  %v3482_v11 = vmax.f32 %v7946_v54, %v3481_v44  ;;  %v3614_v54 = vld [vmem:[#allocation11 + $0x170] sm:$0xff]  ;;  %v3631_v50 = vld [vmem:[#allocation11 + $0x1f8] sm:$0xff] }
 0xe28   : > { %4892 = vmatprep.subr.bf16.mxu1 %v8228_v52  ;;  %v4932_v26 = vpack.c.bf16 %v3631_v50, %v3630_v30 }
 0xe29   : > { %v3483_v16 = vrot.slane %v3482_v11, 2 }
 0xe2b   : > { %4894 = vmatpush3.bf16.msra.mxu1 %v4893_v40 }
 0xe2c   : > { %4895 = vmatprep.subr.bf16.mxu1 %v8228_v52 }
 0xe60   : > { %v3335_v34 = vpop.trf.xlu0 }
 0xe61   : > { %v3351_v13 = vsel %vm8260_vm11, %v3335_v34, 0.0  ;;  %4710 = vmatmul.mubr.f32.vlgmr.msra.gmra.mrb[52].mxu0 %v3335_v34  ;;  %v3606_v34 = vld [vmem:[#allocation11 + $0x130] sm:$0xff] }
 0xe62   : > { %3352 = vadd.xlane.f32.xlu1 %v3351_v13  ;;  %4857 = vmatpush3.bf16.msra.mxu0 %v4856_v22  ;;  %v3607_v13 = vld [vmem:[#allocation11 + $0x138] sm:$0xff]  ;;  %v3612_v22 = vld [vmem:[#allocation11 + $0x160] sm:$0xff] }
 0xe63   : > { %4859 = vmatprep.subr.bf16.mxu0 %v4858_v43  ;;  %v4896_v38 = vpack.c.bf16 %v3607_v13, %v3606_v34  ;;  %v3613_v43 = vld [vmem:[#allocation11 + $0x168] sm:$0xff] }
 0xe64   : > { %v4905_v6 = vpack.c.bf16 %v3613_v43, %v3612_v22 }
 0xe65   : > { %4897 = vmatpush3.bf16.msra.mxu1 %v4896_v38 }
 0xe66   : > { %4861 = vmatpush3.bf16.msra.mxu0 %v4860_v61  ;;  %4898 = vmatprep.subr.bf16.mxu1 %v8228_v52  ;;  %v3484_v61 = vmax.f32 %v3482_v11, %v3483_v16 }
 0xe67   : > { %4863 = vmatprep.subr.bf16.mxu0 %v4862_v51 }
 0xe68   : > { %v3485_v51 = vrot.slane %v3484_v61, 1 }
 0xe69   : > { %4900 = vmatpush3.bf16.msra.mxu1 %v4899_v56 }
 0xe6a   : > { %4865 = vmatpush3.bf16.msra.mxu0 %v4864_v18  ;;  %4901 = vmatprep.subr.bf16.mxu1 %v8228_v52  ;;  %v3486_v9 = vmax.f32 %v3484_v61, %v3485_v51 }
 0xe6b   : > { %4867 = vmatprep.subr.bf16.mxu0 %v4866_v62 }
 0xe6d   : > { %4903 = vmatpush3.bf16.msra.mxu1 %v4902_v8 }
 0xe6e   : > { %4869 = vmatpush3.bf16.msra.mxu0 %v4868_v28  ;;  %4904 = vmatprep.subr.bf16.mxu1 %v8228_v52  ;;  %v3615_v28 = vld [vmem:[#allocation11 + $0x178] sm:$0xff] }
 0xe6f   : > { %4871 = vmatprep.subr.bf16.mxu0 %v4870_v7  ;;  %v4908_v7 = vpack.c.bf16 %v3615_v28, %v3614_v54 }
 0xe71   : > { %4906 = vmatpush3.bf16.msra.mxu1 %v4905_v6 }
 0xe72   : > { %4873 = vmatpush3.bf16.msra.mxu0 %v4872_v29  ;;  %4907 = vmatprep.subr.bf16.mxu1 %v8228_v52 }
 0xe73   : > { %4875 = vmatprep.subr.bf16.mxu0 %v4874_v63  ;;  %v3620_v63 = vld [vmem:[#allocation11 + $0x1a0] sm:$0xff] }
 0xe75   : > { %4909 = vmatpush3.bf16.msra.mxu1 %v4908_v7 }
 0xe76   : > { %4877 = vmatpush3.bf16.msra.mxu0 %v4876_v46  ;;  %v3625_v46 = vld [vmem:[#allocation11 + $0x1c8] sm:$0xff] }
 0xe77   : > { %4879 = vmatprep.subr.bf16.mxu0 %v4878_v31  ;;  %v4923_v31 = vpack.c.bf16 %v3625_v46, %v3624_v14 }
 0xe7a   : > { %4881 = vmatpush3.bf16.msra.mxu0 %v4880_v19  ;;  %v4926_v19 = vpack.c.bf16 %v3627_v1, %v3626_v24 }
 0xe7b   : > { %4883 = vmatprep.subr.bf16.mxu0 %v4882_v49 }
 0xe7e   : > { %4885 = vmatpush3.bf16.msra.mxu0 %v4884_v17  ;;  %v3633_v17 = vrot.slane %v5307_v59, 6 }
 0xe7f   : > { %4910 = vmatprep.subr.bf16.mxu0 %v8228_v52 }
 0xeef   : > { %v3353_v32 = vpop.xlane.xlu1 %3352 }
 0xef0   : > { %vm3487_vm13 = vcmp.gt.f32.partialorder %v3353_v32, 0.5  ;;  %v3561_v18 = vmax.f32 %v3353_v32, 1.0 }
 0xef1   : > { %v3490_v60 = vsel %vm3487_vm13, %v3486_v9, 0.0 }
 0xef2   : > { %v3566_v10 = vadd.f32 %v7671_v15, %v3490_v60  ;;  %5267 = vrcp.f32 %v3561_v18  ;;  %v3618_v15 = vld [vmem:[#allocation11 + $0x190] sm:$0xff] }
 0xef3   : > { %v4914_v29 = vpack.c.bf16 %v3619_v53, %v3618_v15 }
 0xefc   : > { %v5268_v62 = vpop.eup %5267 }
 0xf34   : > { %v3557_v58 = vpop.f32.mrb[52].mxu0 }
 0xf35   : > { %v3563_v2 = vmul.f32 %v5268_v62, %v3557_v58  ;;  %v4711_v48 = vpop.f32.mrb[53].mxu0 }
 0xf37   : > { %v3567_v45 = vadd.f32 %v7675_v25, %v3563_v2  ;;  %v3621_v25 = vld [vmem:[#allocation11 + $0x1a8] sm:$0xff] }
 0xf38   : > { %v4917_v23 = vpack.c.bf16 %v3621_v25, %v3620_v63 }
 0xf39   : > { %3699 = vmatprep.mubr.f32.mxu0 %v3567_v45 }
 0xf3a   : > { %3700 = vmatmul.mubr.f32.vlgmr.msra.gmra.mrb[54].mxu0 %v3566_v10 }
 0xf3b   : > { %4779 = vmatprep.mubr.msk.f32.mxu0 %vm8202_vm7, %v8146_v21  ;;  %4912 = vmatpush3.bf16.msra.mxu0 %v4911_v3  ;;  %v3622_v21 = vld [vmem:[#allocation11 + $0x1b0] sm:$0xff]  ;;  %vm3855_vm7 = vcmask 0  }
 0xf3c   : > { %4913 = vmatprep.subr.bf16.mxu0 %v8228_v52  ;;  %v4920_v5 = vpack.c.bf16 %v3623_v42, %v3622_v21 }
 0xf3f   : > { %4915 = vmatpush3.bf16.msra.mxu0 %v4914_v29 }
 0xf40   : > { %4916 = vmatprep.subr.bf16.mxu0 %v8228_v52 }
 0xf43   : > { %4918 = vmatpush3.bf16.msra.mxu0 %v4917_v23 }
 0xf44   : > { %4919 = vmatprep.subr.bf16.mxu0 %v8228_v52 }
 0xf47   : > { %4921 = vmatpush3.bf16.msra.mxu0 %v4920_v5 }
 0xf48   : > { %4922 = vmatprep.subr.bf16.mxu0 %v8228_v52 }
 0xf4b   : > { %4924 = vmatpush3.bf16.msra.mxu0 %v4923_v31 }
 0xf4c   : > { %4925 = vmatprep.subr.bf16.mxu0 %v8228_v52 }
 0xf4f   : > { %4927 = vmatpush3.bf16.msra.mxu0 %v4926_v19 }
 0xf50   : > { %4928 = vmatprep.subr.bf16.mxu0 %v8228_v52 }
 0xf53   : > { %4930 = vmatpush3.bf16.msra.mxu0 %v4929_v20 }
 0xf54   : > { %4931 = vmatprep.subr.bf16.mxu0 %v8228_v52  ;;  %v421_v52 = vld [vmem:[#allocation9 + $0x8] sm:$0xff] }
 0xf57   : > { %4933 = vmatpush3.bf16.msra.mxu0 %v4932_v26 }
0x100d   : > { %v4474_v49 = vpop.f32.mrb[54].mxu0 }
0x100e   : > { %v4475_v39 = vpop.f32.mrb[55].mxu0 }
0x100f   : > { %v4476_v37 = vadd.f32 %v4475_v39, %v4474_v49 }
0x1011   : > { %v3702_v57 = vadd.f32 %v4476_v37, %v3633_v17 }
0x1013   : > { %v3705_v55 = vmax.f32 %v3702_v57, 0.0 }
0x1015   : > { %4745 = vmatmul.mubr.f32.vlgmr.msra.gmra.mrb[96].mxu1 %v3705_v55 }
0x10e8   : > { %v3774_v40 = vpop.f32.mrb[96].mxu1 }
0x10e9   : > { %v3775_v34 = vadd.f32 %v3774_v40, %v3706_v33  ;;  %v4746_v13 = vpop.f32.mrb[97].mxu1 }
0x10eb   : > { %v3778_v38 = vmax.f32 %v3775_v34, 0.0 }
0x10ed   : > { %4780 = vmatmul.mubr.f32.vlgmr.msra.gmra.mrb[56].mxu0 %v3778_v38 }
0x11c0   : > { %v3845_v4 = vpop.f32.mrb[56].mxu0 }
0x11c1   : > { %v3846_v27 = vadd.f32 %v3845_v4, %v421_v52  ;;  %v4781_v56 = vpop.f32.mrb[57].mxu0 }
0x11c3   : > { %v4146_v0 = vmul.f32 -1.442695, %v3846_v27 }
0x11c5   : > { %5269 = vpow2.f32 %v4146_v0 }
0x11cf   : > { %v5270_v36 = vpop.eup %5269 }
0x11d0   : > { %v3852_v8 = vadd.f32 1.0, %v5270_v36 }
0x11d2   : > { %5271 = vrcp.f32 %v3852_v8 }
0x11dc   : > { %v5272_v22 = vpop.eup %5271 }
0x11dd   : > { %3856 = vst.msk [vmem:[%s330_s21] sm:$0x1] %vm3855_vm7, %v5272_v22 }
0x11de PF: > { %p24_p1 = scmp.ge.s32.totalorder %s5668_s29, 4   ;;  %s8261_s7 = smov %s5502_s8 }
0x11df   : > { %s8262_s8 = smov %s5506_s9  ;;  %s8263_s9 = smov %s5699_s15 }
0x11e0   : > { %s8264_s10 = smov %s5668_s29  ;;  %26 = sbr.rel (!%p24_p1) target bundleno = 18 (0x12), region = 105 }
0x11e7   :  { %3874 = vsyncpa [#allocation5], 1 }
0x11e8   :  { %3876 = vsyncpa [#allocation5 + $0x1], 1 }
0x11e9   :  { %3877 = vsyncpa [#allocation7], 1 }
0x11ea   :  { %3879 = vsyncpa [#allocation7 + $0x1], 1 }
0x11eb   :  { %3880 = vsyncpa [#allocation10], 1 }

</bundles_post_ra>
